<compile_context>
chip_gen: v7x
topology: tpu7x:2x2x1
jax: 0.10.0
libtpu: 0.0.40
codegen_flags: <defaults>
</compile_context>

<pallas_src>
import math
from functools import partial

import jax
import jax.numpy as jnp
from jax import lax
from jax.experimental import pallas as pl
from jax.experimental.pallas import tpu as pltpu


_PAD = 3                                  # max dilation of the 3x3 convs -> 3-wide zero pad
_VMEM_LIMIT = 32 * 1024 * 1024            # raise v5e's 16 MiB default scoped VMEM
_FUSED_VMEM_BUDGET = 24 * 1024 * 1024     # gate for the single fused kernel path


def _round_up(n, m):
    return ((n + m - 1) // m) * m


def _sigmoid(z):
    return jax.nn.sigmoid(z)


# --------------------------------------------------------------------- shared kernel body
def _spatial_chain(saw_ref, sab_ref, buf_ref, H, W):
    """Three chained dilated 3x3 'same' convs on both packed (mean, max) planes."""
    acc0 = acc1 = None
    for ci, dil in enumerate((1, 2, 3)):
        acc0 = jnp.full((H, W), sab_ref[0, ci], jnp.float32)
        acc1 = jnp.full((H, W), sab_ref[1, ci], jnp.float32)
        for kh in range(3):
            r0 = _PAD + (kh - 1) * dil
            for kw in range(3):
                c0 = _PAD + (kw - 1) * dil
                idx = ci * 9 + kh * 3 + kw
                tap = buf_ref[:, r0:r0 + H, c0:c0 + W]     # (2,H,W): one slice, both planes
                acc0 = acc0 + saw_ref[0, idx] * tap[0]
                acc1 = acc1 + saw_ref[1, idx] * tap[1]
        if ci < 2:                                         # feed next conv; pad stays zero
            buf_ref[0, _PAD:_PAD + H, _PAD:_PAD + W] = acc0
            buf_ref[1, _PAD:_PAD + H, _PAD:_PAD + W] = acc1
    return acc0, acc1


def _attention_body(x_ref, w1_ref, w2_ref, saw_ref, sab_ref, buf_ref):
    """Per-batch: returns (xb (H,W,C), ca (1,C), sa_sum (H,W))."""
    H, W, C = x_ref.shape[1], x_ref.shape[2], x_ref.shape[3]
    xb = x_ref[0]                                          # (H, W, C)

    # ---- channel attention: batched (avg | max) MLP, one pair of MXU matmuls ----
    xf = xb.reshape(H * W, C)
    pooled = jnp.concatenate([jnp.mean(xf, axis=0, keepdims=True),
                              jnp.max(xf, axis=0, keepdims=True)], axis=0)   # (2, C)
    h = jnp.maximum(jnp.dot(pooled, w1_ref[...], preferred_element_type=jnp.float32), 0.0)
    z = jnp.dot(h, w2_ref[...], preferred_element_type=jnp.float32)          # (2, C)
    ca = _sigmoid(z[0:1] + z[1:2])                                           # (1, C)

    # ---- spatial attention: both 1-channel maps packed into one small padded scratch ----
    # Zero-fill EVERY grid step (buffer is only ~24 KiB) -- never under
    # pl.when(program_id == 0): parallel batch sharding gives each core its own scratch.
    buf_ref[...] = jnp.zeros_like(buf_ref)
    buf_ref[0, _PAD:_PAD + H, _PAD:_PAD + W] = jnp.mean(xb, axis=2)
    buf_ref[1, _PAD:_PAD + H, _PAD:_PAD + W] = jnp.max(xb, axis=2)
    a0, a1 = _spatial_chain(saw_ref, sab_ref, buf_ref, H, W)
    sa_sum = _sigmoid(a0) + _sigmoid(a1)                                     # (H, W)
    return xb, ca, sa_sum


# ------------------------------------------------------------------- fused (default) path
def _fused_kernel(x_ref, w1_ref, w2_ref, saw_ref, sab_ref, o_ref, buf_ref):
    xb, ca, sa_sum = _attention_body(x_ref, w1_ref, w2_ref, saw_ref, sab_ref, buf_ref)
    # out = x * ca * (sa1 + sa2), written straight from the resident x block.
    o_ref[0] = xb * ca[None] * sa_sum[:, :, None]


def _fused_forward(x, w1, w2, saw, sab):
    B, H, W, C = x.shape
    cr = w1.shape[1]
    Hp = _round_up(H + 2 * _PAD, 8)
    Wp = _round_up(W + 2 * _PAD, 128)
    smem = pl.BlockSpec(memory_space=pltpu.MemorySpace.SMEM)
    return pl.pallas_call(
        _fused_kernel,
        out_shape=jax.ShapeDtypeStruct((B, H, W, C), jnp.float32),
        grid_spec=pltpu.PrefetchScalarGridSpec(
            num_scalar_prefetch=0,
            grid=(B,),
            in_specs=[pl.BlockSpec((1, H, W, C), lambda b: (b, 0, 0, 0)),
                      pl.BlockSpec((C, cr), lambda b: (0, 0)),
                      pl.BlockSpec((cr, C), lambda b: (0, 0)),
                      smem, smem],
            out_specs=pl.BlockSpec((1, H, W, C), lambda b: (b, 0, 0, 0)),
            scratch_shapes=[pltpu.VMEM((2, Hp, Wp), jnp.float32)]),
        compiler_params=pltpu.CompilerParams(
            dimension_semantics=("parallel",),
            vmem_limit_bytes=_VMEM_LIMIT),
    )(x, w1, w2, saw, sab)


# ------------------------------------------------------- two-kernel fallback (large maps)
def _maps_kernel(x_ref, w1_ref, w2_ref, saw_ref, sab_ref, ca_ref, sa_ref, buf_ref):
    _, ca, sa_sum = _attention_body(x_ref, w1_ref, w2_ref, saw_ref, sab_ref, buf_ref)
    ca_ref[...] = ca[None]          # (1, 1, C)
    sa_ref[...] = sa_sum[None]      # (1, H, W)


def _attention_maps(x, w1, w2, saw, sab):
    B, H, W, C = x.shape
    cr = w1.shape[1]
    Hp = _round_up(H + 2 * _PAD, 8)
    Wp = _round_up(W + 2 * _PAD, 128)
    smem = pl.BlockSpec(memory_space=pltpu.MemorySpace.SMEM)
    return pl.pallas_call(
        _maps_kernel,
        out_shape=(jax.ShapeDtypeStruct((B, 1, C), jnp.float32),
                   jax.ShapeDtypeStruct((B, H, W), jnp.float32)),
        grid_spec=pltpu.PrefetchScalarGridSpec(
            num_scalar_prefetch=0,
            grid=(B,),
            in_specs=[pl.BlockSpec((1, H, W, C), lambda b: (b, 0, 0, 0)),
                      pl.BlockSpec((C, cr), lambda b: (0, 0)),
                      pl.BlockSpec((cr, C), lambda b: (0, 0)),
                      smem, smem],
            out_specs=[pl.BlockSpec((1, 1, C), lambda b: (b, 0, 0)),
                       pl.BlockSpec((1, H, W), lambda b: (b, 0, 0))],
            scratch_shapes=[pltpu.VMEM((2, Hp, Wp), jnp.float32)]),
        compiler_params=pltpu.CompilerParams(
            dimension_semantics=("parallel",),
            vmem_limit_bytes=_VMEM_LIMIT),
    )(x, w1, w2, saw, sab)


def _combine_kernel(x_ref, ca_ref, sa_ref, o_ref):
    # (1,th,W,C) * (1,1,1,C) * (1,th,W,1): sublane-broadcast ca, lane-broadcast sa.
    o_ref[...] = x_ref[...] * ca_ref[...] * sa_ref[...]


def _pick_row_tile(H, W, C, target_bytes=2 << 20):
    """Largest divisor of H whose (th, W, C) f32 block stays under ~2 MiB."""
    best = 1
    for th in range(1, H + 1):
        if H % th == 0 and th * W * C * 4 <= target_bytes:
            best = th
    return best


def _combine(x, ca4, sa4):
    B, H, W, C = x.shape
    th = _pick_row_tile(H, W, C)
    return pl.pallas_call(
        _combine_kernel,
        out_shape=jax.ShapeDtypeStruct((B, H, W, C), jnp.float32),
        grid_spec=pltpu.PrefetchScalarGridSpec(
            num_scalar_prefetch=0,
            grid=(B, H // th),
            in_specs=[pl.BlockSpec((1, th, W, C), lambda b, h: (b, h, 0, 0)),
                      pl.BlockSpec((1, 1, 1, C), lambda b, h: (b, 0, 0, 0)),
                      pl.BlockSpec((1, th, W, 1), lambda b, h: (b, h, 0, 0))],
            out_specs=pl.BlockSpec((1, th, W, C), lambda b, h: (b, h, 0, 0))),
        compiler_params=pltpu.CompilerParams(
            dimension_semantics=("parallel", "parallel"),
            vmem_limit_bytes=_VMEM_LIMIT),
    )(x, ca4, sa4)


# --------------------------------------------------------------------- params / forward
def init_dsaca_params(key, in_planes, ratio=4):
    cr = max(in_planes // ratio, 1)
    ks = jax.random.split(key, 6)
    return {
        # fc weights stored pre-transposed for v @ W layout.
        "fc1_w": jax.random.normal(ks[0], (in_planes, cr), jnp.float32) / math.sqrt(in_planes),
        "fc2_w": jax.random.normal(ks[1], (cr, in_planes), jnp.float32) / math.sqrt(cr),
        # three 3x3 convs per spatial-attention branch, flattened [conv, kh, kw].
        "sa1_w": jax.random.normal(ks[2], (27,), jnp.float32) / 3.0,
        "sa1_b": jax.random.normal(ks[3], (3,), jnp.float32) * 0.1,
        "sa2_w": jax.random.normal(ks[4], (27,), jnp.float32) / 3.0,
        "sa2_b": jax.random.normal(ks[5], (3,), jnp.float32) * 0.1,
    }


@partial(jax.jit, static_argnames=("force_two_kernel",))
def dsaca_forward(params, x_nchw, force_two_kernel=False):
    """DSACA forward: x (B, C, H, W) f32 -> (B, C, H, W)."""
    x = jnp.transpose(x_nchw, (0, 2, 3, 1)).astype(jnp.float32)   # NHWC, C on lanes
    B, H, W, C = x.shape
    saw = jnp.stack([params["sa1_w"], params["sa2_w"]])           # (2, 27)
    sab = jnp.stack([params["sa1_b"], params["sa2_b"]])           # (2, 3)
    # fused-path per-batch footprint: double-buffered (1,H,W,C) in + out blocks.
    fused_bytes = 4 * (H * W * C * 4)
    if (not force_two_kernel) and fused_bytes <= _FUSED_VMEM_BUDGET:
        out = _fused_forward(x, params["fc1_w"], params["fc2_w"], saw, sab)
    else:
        ca, sa = _attention_maps(x, params["fc1_w"], params["fc2_w"], saw, sab)
        out = _combine(x, ca.reshape(B, 1, 1, C), sa.reshape(B, H, W, 1))
    return jnp.transpose(out, (0, 3, 1, 2))                       # back to NCHW


# ----------------------------------------------------------- plain-JAX reference (checks)
def _ref_spatial(m_nchw, w_flat, b):
    m = m_nchw                                       # (B, 1, H, W)
    for ci, d in enumerate((1, 2, 3)):
        w = w_flat[ci * 9:(ci + 1) * 9].reshape(1, 1, 3, 3)
        m = lax.conv_general_dilated(
            m, w, window_strides=(1, 1), padding=[(d, d), (d, d)],
            rhs_dilation=(d, d), dimension_numbers=("NCHW", "OIHW", "NCHW"),
            precision=lax.Precision.HIGHEST) + b[ci]
    return jax.nn.sigmoid(m)


def _ref_channel(x_nchw, w1, w2):
    avg = jnp.mean(x_nchw, axis=(2, 3))
    mx = jnp.max(x_nchw, axis=(2, 3))

    def mlp(v):
        h = jnp.maximum(jnp.dot(v, w1, precision=lax.Precision.HIGHEST), 0.0)
        return jnp.dot(h, w2, precision=lax.Precision.HIGHEST)

    return jax.nn.sigmoid(mlp(avg) + mlp(mx))        # (B, C)


# --------------------------------------------------------------------------------- main
if __name__ == "__main__":
    key = jax.random.PRNGKey(0)
    pkey, xkey = jax.random.split(key)
    B, C, H, W = 2, 32, 16, 16                       # in_planes=32, ratio=4
    params = init_dsaca_params(pkey, C, ratio=4)
    x_nchw = jax.random.normal(xkey, (B, C, H, W), jnp.float32)

    # fused single-kernel path (default for small/medium feature maps)
    out = jax.block_until_ready(dsaca_forward(params, x_nchw))
    assert out.shape == (B, C, H, W), out.shape
    assert bool(jnp.all(jnp.isfinite(out)))

    # two-kernel fallback (large-feature-map path) must agree with the fused path
    out_two = jax.block_until_ready(dsaca_forward(params, x_nchw, force_two_kernel=True))
    assert float(jnp.max(jnp.abs(out - out_two))) < 1e-5

    # --- correctness spot-checks against a plain-JAX reference ---
    x_nhwc = jnp.transpose(x_nchw, (0, 2, 3, 1))
    saw = jnp.stack([params["sa1_w"], params["sa2_w"]])
    sab = jnp.stack([params["sa1_b"], params["sa2_b"]])
    ca_k, sa_k = _attention_maps(x_nhwc, params["fc1_w"], params["fc2_w"], saw, sab)
    ca_k = ca_k.reshape(B, C)                        # (B, C)
    sa_k = sa_k.reshape(B, H, W)                     # (B, H, W)

    # spatial-attention stencil chain (pure f32 VPU) vs exact-precision XLA conv.
    sa_ref = (_ref_spatial(jnp.mean(x_nchw, axis=1, keepdims=True),
                           params["sa1_w"], params["sa1_b"])
              + _ref_spatial(jnp.max(x_nchw, axis=1, keepdims=True),
                             params["sa2_w"], params["sa2_b"]))[:, 0]
    assert float(jnp.max(jnp.abs(sa_k - sa_ref))) < 1e-4

    # channel attention (tiny MXU matmul; tolerance covers default matmul precision).
    ca_ref = _ref_channel(x_nchw, params["fc1_w"], params["fc2_w"])
    assert float(jnp.max(jnp.abs(ca_k - ca_ref))) < 5e-2

    # fused output vs. the kernel's own attention maps (tight check on the epilogue).
    full_ref = ca_k[:, :, None, None] * x_nchw * sa_k[:, None, :, :]
    assert float(jnp.max(jnp.abs(out - full_ref))) < 1e-4

    print("KERNEL_OK")
</pallas_src>

<mosaic_0001>
module attributes {stable_mosaic.version = 11 : i64} {
  func.func @_fused_kernel(%arg0: i32, %arg1: memref<1x16x16x32xf32, #tpu.memory_space<vmem>>, %arg2: memref<32x8xf32, #tpu.memory_space<vmem>>, %arg3: memref<8x32xf32, #tpu.memory_space<vmem>>, %arg4: memref<2x27xf32, #tpu.memory_space<smem>>, %arg5: memref<2x3xf32, #tpu.memory_space<smem>>, %arg6: memref<1x16x16x32xf32, #tpu.memory_space<vmem>>, %arg7: memref<2x24x128xf32, #tpu.memory_space<vmem>>) attributes {dimension_semantics = [#tpu.dimension_semantics<parallel>], iteration_bounds = array<i64: 2>, scalar_prefetch = 0 : i64, scratch_operands = 1 : i64, tpu.core_type = #tpu.core_type<tc>, window_params = [{transform_indices = @transform_0, window_bounds = array<i64: 1, 16, 16, 32>}, {pipeline_mode = #tpu.pipeline_mode<synchronous>, transform_indices = @transform_1, window_bounds = array<i64: 32, 8>}, {pipeline_mode = #tpu.pipeline_mode<synchronous>, transform_indices = @transform_2, window_bounds = array<i64: 8, 32>}, {transform_indices = @transform_3, window_bounds = array<i64: 2, 27>}, {transform_indices = @transform_4, window_bounds = array<i64: 2, 3>}, {transform_indices = @transform_5, window_bounds = array<i64: 1, 16, 16, 32>}]} {
    %c0 = arith.constant 0 : index
    %c0_0 = arith.constant 0 : index
    %c0_1 = arith.constant 0 : index
    %c0_2 = arith.constant 0 : index
    %0 = vector.load %arg1[%c0, %c0_0, %c0_1, %c0_2] : memref<1x16x16x32xf32, #tpu.memory_space<vmem>>, vector<1x16x16x32xf32>
    %1 = vector.shape_cast %0 : vector<1x16x16x32xf32> to vector<16x16x32xf32>
    %2 = vector.shape_cast %1 : vector<16x16x32xf32> to vector<256x32xf32>
    %cst = arith.constant dense<0.000000e+00> : vector<32xf32>
    %3 = vector.multi_reduction <add>, %2, %cst [0] : vector<256x32xf32> to vector<32xf32>
    %4 = vector.shape_cast %3 : vector<32xf32> to vector<1x32xf32>
    %cst_3 = arith.constant 2.560000e+02 : f32
    %5 = vector.broadcast %cst_3 : f32 to vector<1x32xf32>
    %6 = arith.divf %4, %5 : vector<1x32xf32>
    %cst_4 = arith.constant dense<0xFF800000> : vector<32xf32>
    %7 = vector.multi_reduction <maximumf>, %2, %cst_4 [0] : vector<256x32xf32> to vector<32xf32>
    %8 = vector.shape_cast %7 : vector<32xf32> to vector<1x32xf32>
    %9 = tpu.concatenate %6, %8 in 0 : vector<1x32xf32>, vector<1x32xf32> -> vector<2x32xf32>
    %c0_5 = arith.constant 0 : index
    %c0_6 = arith.constant 0 : index
    %10 = vector.load %arg2[%c0_5, %c0_6] : memref<32x8xf32, #tpu.memory_space<vmem>>, vector<32x8xf32>
    %cst_7 = arith.constant dense<0.000000e+00> : vector<2x8xf32>
    %11 = tpu.matmul %9, %10, %cst_7 {dimension_numbers = #tpu.dot_dimension_numbers<[1], [0], [0], [1], [0, 0, 1, 1], [], []>} : vector<2x32xf32>, vector<32x8xf32>, vector<2x8xf32> -> vector<2x8xf32>
    %cst_8 = arith.constant 0.000000e+00 : f32
    %12 = vector.broadcast %cst_8 : f32 to vector<2x8xf32>
    %13 = arith.maximumf %11, %12 : vector<2x8xf32>
    %c0_9 = arith.constant 0 : index
    %c0_10 = arith.constant 0 : index
    %14 = vector.load %arg3[%c0_9, %c0_10] : memref<8x32xf32, #tpu.memory_space<vmem>>, vector<8x32xf32>
    %cst_11 = arith.constant dense<0.000000e+00> : vector<2x32xf32>
    %15 = tpu.matmul %13, %14, %cst_11 {dimension_numbers = #tpu.dot_dimension_numbers<[1], [0], [0], [1], [0, 0, 1, 1], [], []>} : vector<2x8xf32>, vector<8x32xf32>, vector<2x32xf32> -> vector<2x32xf32>
    %16 = vector.extract_strided_slice %15 {offsets = [0, 0], sizes = [1, 32], strides = [1, 1]} : vector<2x32xf32> to vector<1x32xf32>
    %17 = vector.extract_strided_slice %15 {offsets = [1, 0], sizes = [1, 32], strides = [1, 1]} : vector<2x32xf32> to vector<1x32xf32>
    %18 = arith.addf %16, %17 : vector<1x32xf32>
    %19 = arith.negf %18 : vector<1x32xf32>
    %20 = math.exp %19 : vector<1x32xf32>
    %cst_12 = arith.constant 1.000000e+00 : f32
    %21 = vector.broadcast %cst_12 : f32 to vector<1x32xf32>
    %22 = arith.addf %21, %20 : vector<1x32xf32>
    %23 = arith.divf %21, %22 : vector<1x32xf32>
    %cst_13 = arith.constant 0.000000e+00 : f32
    %24 = vector.broadcast %cst_13 : f32 to vector<2x24x128xf32>
    %c0_14 = arith.constant 0 : index
    %c0_15 = arith.constant 0 : index
    %c0_16 = arith.constant 0 : index
    %25 = vector.load %arg7[%c0_14, %c0_15, %c0_16] : memref<2x24x128xf32, #tpu.memory_space<vmem>>, vector<2x24x128xf32>
    tpu.vector_store %arg7[%c0_14, %c0_15, %c0_16], %24 {strides = array<i32>} : memref<2x24x128xf32, #tpu.memory_space<vmem>>, vector<2x24x128xf32>,
    %cst_17 = arith.constant dense<0.000000e+00> : vector<16x16xf32>
    %26 = vector.multi_reduction <add>, %1, %cst_17 [2] : vector<16x16x32xf32> to vector<16x16xf32>
    %cst_18 = arith.constant 3.200000e+01 : f32
    %27 = vector.broadcast %cst_18 : f32 to vector<16x16xf32>
    %28 = arith.divf %26, %27 : vector<16x16xf32>
    %c0_19 = arith.constant 0 : index
    %c3 = arith.constant 3 : index
    %c3_20 = arith.constant 3 : index
    %29 = vector.load %arg7[%c0_19, %c3, %c3_20] : memref<2x24x128xf32, #tpu.memory_space<vmem>>, vector<1x16x16xf32>
    %30 = vector.shape_cast %29 : vector<1x16x16xf32> to vector<16x16xf32>
    %31 = vector.shape_cast %28 : vector<16x16xf32> to vector<1x16x16xf32>
    tpu.vector_store %arg7[%c0_19, %c3, %c3_20], %31 {strides = array<i32>} : memref<2x24x128xf32, #tpu.memory_space<vmem>>, vector<1x16x16xf32>,
    %cst_21 = arith.constant dense<0xFF800000> : vector<16x16xf32>
    %32 = vector.multi_reduction <maximumf>, %1, %cst_21 [2] : vector<16x16x32xf32> to vector<16x16xf32>
    %c1 = arith.constant 1 : index
    %c3_22 = arith.constant 3 : index
    %c3_23 = arith.constant 3 : index
    %33 = vector.load %arg7[%c1, %c3_22, %c3_23] : memref<2x24x128xf32, #tpu.memory_space<vmem>>, vector<1x16x16xf32>
    %34 = vector.shape_cast %33 : vector<1x16x16xf32> to vector<16x16xf32>
    %35 = vector.shape_cast %32 : vector<16x16xf32> to vector<1x16x16xf32>
    tpu.vector_store %arg7[%c1, %c3_22, %c3_23], %35 {strides = array<i32>} : memref<2x24x128xf32, #tpu.memory_space<vmem>>, vector<1x16x16xf32>,
    %c0_24 = arith.constant 0 : index
    %c0_25 = arith.constant 0 : index
    %36 = memref.load %arg5[%c0_24, %c0_25] : memref<2x3xf32, #tpu.memory_space<smem>>
    %37 = vector.broadcast %36 : f32 to vector<16x16xf32>
    %c1_26 = arith.constant 1 : index
    %c0_27 = arith.constant 0 : index
    %38 = memref.load %arg5[%c1_26, %c0_27] : memref<2x3xf32, #tpu.memory_space<smem>>
    %39 = vector.broadcast %38 : f32 to vector<16x16xf32>
    %c0_28 = arith.constant 0 : index
    %c2 = arith.constant 2 : index
    %c2_29 = arith.constant 2 : index
    %40 = vector.load %arg7[%c0_28, %c2, %c2_29] : memref<2x24x128xf32, #tpu.memory_space<vmem>>, vector<2x16x16xf32>
    %c0_30 = arith.constant 0 : index
    %c0_31 = arith.constant 0 : index
    %41 = memref.load %arg4[%c0_30, %c0_31] : memref<2x27xf32, #tpu.memory_space<smem>>
    %42 = vector.extract_strided_slice %40 {offsets = [0, 0, 0], sizes = [1, 16, 16], strides = [1, 1, 1]} : vector<2x16x16xf32> to vector<1x16x16xf32>
    %43 = vector.shape_cast %42 : vector<1x16x16xf32> to vector<16x16xf32>
    %44 = vector.broadcast %41 : f32 to vector<16x16xf32>
    %45 = arith.mulf %44, %43 : vector<16x16xf32>
    %46 = arith.addf %37, %45 : vector<16x16xf32>
    %c1_32 = arith.constant 1 : index
    %c0_33 = arith.constant 0 : index
    %47 = memref.load %arg4[%c1_32, %c0_33] : memref<2x27xf32, #tpu.memory_space<smem>>
    %48 = vector.extract_strided_slice %40 {offsets = [1, 0, 0], sizes = [1, 16, 16], strides = [1, 1, 1]} : vector<2x16x16xf32> to vector<1x16x16xf32>
    %49 = vector.shape_cast %48 : vector<1x16x16xf32> to vector<16x16xf32>
    %50 = vector.broadcast %47 : f32 to vector<16x16xf32>
    %51 = arith.mulf %50, %49 : vector<16x16xf32>
    %52 = arith.addf %39, %51 : vector<16x16xf32>
    %c0_34 = arith.constant 0 : index
    %c2_35 = arith.constant 2 : index
    %c3_36 = arith.constant 3 : index
    %53 = vector.load %arg7[%c0_34, %c2_35, %c3_36] : memref<2x24x128xf32, #tpu.memory_space<vmem>>, vector<2x16x16xf32>
    %c0_37 = arith.constant 0 : index
    %c1_38 = arith.constant 1 : index
    %54 = memref.load %arg4[%c0_37, %c1_38] : memref<2x27xf32, #tpu.memory_space<smem>>
    %55 = vector.extract_strided_slice %53 {offsets = [0, 0, 0], sizes = [1, 16, 16], strides = [1, 1, 1]} : vector<2x16x16xf32> to vector<1x16x16xf32>
    %56 = vector.shape_cast %55 : vector<1x16x16xf32> to vector<16x16xf32>
    %57 = vector.broadcast %54 : f32 to vector<16x16xf32>
    %58 = arith.mulf %57, %56 : vector<16x16xf32>
    %59 = arith.addf %46, %58 : vector<16x16xf32>
    %c1_39 = arith.constant 1 : index
    %c1_40 = arith.constant 1 : index
    %60 = memref.load %arg4[%c1_39, %c1_40] : memref<2x27xf32, #tpu.memory_space<smem>>
    %61 = vector.extract_strided_slice %53 {offsets = [1, 0, 0], sizes = [1, 16, 16], strides = [1, 1, 1]} : vector<2x16x16xf32> to vector<1x16x16xf32>
    %62 = vector.shape_cast %61 : vector<1x16x16xf32> to vector<16x16xf32>
    %63 = vector.broadcast %60 : f32 to vector<16x16xf32>
    %64 = arith.mulf %63, %62 : vector<16x16xf32>
    %65 = arith.addf %52, %64 : vector<16x16xf32>
    %c0_41 = arith.constant 0 : index
    %c2_42 = arith.constant 2 : index
    %c4 = arith.constant 4 : index
    %66 = vector.load %arg7[%c0_41, %c2_42, %c4] : memref<2x24x128xf32, #tpu.memory_space<vmem>>, vector<2x16x16xf32>
    %c0_43 = arith.constant 0 : index
    %c2_44 = arith.constant 2 : index
    %67 = memref.load %arg4[%c0_43, %c2_44] : memref<2x27xf32, #tpu.memory_space<smem>>
    %68 = vector.extract_strided_slice %66 {offsets = [0, 0, 0], sizes = [1, 16, 16], strides = [1, 1, 1]} : vector<2x16x16xf32> to vector<1x16x16xf32>
    %69 = vector.shape_cast %68 : vector<1x16x16xf32> to vector<16x16xf32>
    %70 = vector.broadcast %67 : f32 to vector<16x16xf32>
    %71 = arith.mulf %70, %69 : vector<16x16xf32>
    %72 = arith.addf %59, %71 : vector<16x16xf32>
    %c1_45 = arith.constant 1 : index
    %c2_46 = arith.constant 2 : index
    %73 = memref.load %arg4[%c1_45, %c2_46] : memref<2x27xf32, #tpu.memory_space<smem>>
    %74 = vector.extract_strided_slice %66 {offsets = [1, 0, 0], sizes = [1, 16, 16], strides = [1, 1, 1]} : vector<2x16x16xf32> to vector<1x16x16xf32>
    %75 = vector.shape_cast %74 : vector<1x16x16xf32> to vector<16x16xf32>
    %76 = vector.broadcast %73 : f32 to vector<16x16xf32>
    %77 = arith.mulf %76, %75 : vector<16x16xf32>
    %78 = arith.addf %65, %77 : vector<16x16xf32>
    %c0_47 = arith.constant 0 : index
    %c3_48 = arith.constant 3 : index
    %c2_49 = arith.constant 2 : index
    %79 = vector.load %arg7[%c0_47, %c3_48, %c2_49] : memref<2x24x128xf32, #tpu.memory_space<vmem>>, vector<2x16x16xf32>
    %c0_50 = arith.constant 0 : index
    %c3_51 = arith.constant 3 : index
    %80 = memref.load %arg4[%c0_50, %c3_51] : memref<2x27xf32, #tpu.memory_space<smem>>
    %81 = vector.extract_strided_slice %79 {offsets = [0, 0, 0], sizes = [1, 16, 16], strides = [1, 1, 1]} : vector<2x16x16xf32> to vector<1x16x16xf32>
    %82 = vector.shape_cast %81 : vector<1x16x16xf32> to vector<16x16xf32>
    %83 = vector.broadcast %80 : f32 to vector<16x16xf32>
    %84 = arith.mulf %83, %82 : vector<16x16xf32>
    %85 = arith.addf %72, %84 : vector<16x16xf32>
    %c1_52 = arith.constant 1 : index
    %c3_53 = arith.constant 3 : index
    %86 = memref.load %arg4[%c1_52, %c3_53] : memref<2x27xf32, #tpu.memory_space<smem>>
    %87 = vector.extract_strided_slice %79 {offsets = [1, 0, 0], sizes = [1, 16, 16], strides = [1, 1, 1]} : vector<2x16x16xf32> to vector<1x16x16xf32>
    %88 = vector.shape_cast %87 : vector<1x16x16xf32> to vector<16x16xf32>
    %89 = vector.broadcast %86 : f32 to vector<16x16xf32>
    %90 = arith.mulf %89, %88 : vector<16x16xf32>
    %91 = arith.addf %78, %90 : vector<16x16xf32>
    %c0_54 = arith.constant 0 : index
    %c3_55 = arith.constant 3 : index
    %c3_56 = arith.constant 3 : index
    %92 = vector.load %arg7[%c0_54, %c3_55, %c3_56] : memref<2x24x128xf32, #tpu.memory_space<vmem>>, vector<2x16x16xf32>
    %c0_57 = arith.constant 0 : index
    %c4_58 = arith.constant 4 : index
    %93 = memref.load %arg4[%c0_57, %c4_58] : memref<2x27xf32, #tpu.memory_space<smem>>
    %94 = vector.extract_strided_slice %92 {offsets = [0, 0, 0], sizes = [1, 16, 16], strides = [1, 1, 1]} : vector<2x16x16xf32> to vector<1x16x16xf32>
    %95 = vector.shape_cast %94 : vector<1x16x16xf32> to vector<16x16xf32>
    %96 = vector.broadcast %93 : f32 to vector<16x16xf32>
    %97 = arith.mulf %96, %95 : vector<16x16xf32>
    %98 = arith.addf %85, %97 : vector<16x16xf32>
    %c1_59 = arith.constant 1 : index
    %c4_60 = arith.constant 4 : index
    %99 = memref.load %arg4[%c1_59, %c4_60] : memref<2x27xf32, #tpu.memory_space<smem>>
    %100 = vector.extract_strided_slice %92 {offsets = [1, 0, 0], sizes = [1, 16, 16], strides = [1, 1, 1]} : vector<2x16x16xf32> to vector<1x16x16xf32>
    %101 = vector.shape_cast %100 : vector<1x16x16xf32> to vector<16x16xf32>
    %102 = vector.broadcast %99 : f32 to vector<16x16xf32>
    %103 = arith.mulf %102, %101 : vector<16x16xf32>
    %104 = arith.addf %91, %103 : vector<16x16xf32>
    %c0_61 = arith.constant 0 : index
    %c3_62 = arith.constant 3 : index
    %c4_63 = arith.constant 4 : index
    %105 = vector.load %arg7[%c0_61, %c3_62, %c4_63] : memref<2x24x128xf32, #tpu.memory_space<vmem>>, vector<2x16x16xf32>
    %c0_64 = arith.constant 0 : index
    %c5 = arith.constant 5 : index
    %106 = memref.load %arg4[%c0_64, %c5] : memref<2x27xf32, #tpu.memory_space<smem>>
    %107 = vector.extract_strided_slice %105 {offsets = [0, 0, 0], sizes = [1, 16, 16], strides = [1, 1, 1]} : vector<2x16x16xf32> to vector<1x16x16xf32>
    %108 = vector.shape_cast %107 : vector<1x16x16xf32> to vector<16x16xf32>
    %109 = vector.broadcast %106 : f32 to vector<16x16xf32>
    %110 = arith.mulf %109, %108 : vector<16x16xf32>
    %111 = arith.addf %98, %110 : vector<16x16xf32>
    %c1_65 = arith.constant 1 : index
    %c5_66 = arith.constant 5 : index
    %112 = memref.load %arg4[%c1_65, %c5_66] : memref<2x27xf32, #tpu.memory_space<smem>>
    %113 = vector.extract_strided_slice %105 {offsets = [1, 0, 0], sizes = [1, 16, 16], strides = [1, 1, 1]} : vector<2x16x16xf32> to vector<1x16x16xf32>
    %114 = vector.shape_cast %113 : vector<1x16x16xf32> to vector<16x16xf32>
    %115 = vector.broadcast %112 : f32 to vector<16x16xf32>
    %116 = arith.mulf %115, %114 : vector<16x16xf32>
    %117 = arith.addf %104, %116 : vector<16x16xf32>
    %c0_67 = arith.constant 0 : index
    %c4_68 = arith.constant 4 : index
    %c2_69 = arith.constant 2 : index
    %118 = vector.load %arg7[%c0_67, %c4_68, %c2_69] : memref<2x24x128xf32, #tpu.memory_space<vmem>>, vector<2x16x16xf32>
    %c0_70 = arith.constant 0 : index
    %c6 = arith.constant 6 : index
    %119 = memref.load %arg4[%c0_70, %c6] : memref<2x27xf32, #tpu.memory_space<smem>>
    %120 = vector.extract_strided_slice %118 {offsets = [0, 0, 0], sizes = [1, 16, 16], strides = [1, 1, 1]} : vector<2x16x16xf32> to vector<1x16x16xf32>
    %121 = vector.shape_cast %120 : vector<1x16x16xf32> to vector<16x16xf32>
    %122 = vector.broadcast %119 : f32 to vector<16x16xf32>
    %123 = arith.mulf %122, %121 : vector<16x16xf32>
    %124 = arith.addf %111, %123 : vector<16x16xf32>
    %c1_71 = arith.constant 1 : index
    %c6_72 = arith.constant 6 : index
    %125 = memref.load %arg4[%c1_71, %c6_72] : memref<2x27xf32, #tpu.memory_space<smem>>
    %126 = vector.extract_strided_slice %118 {offsets = [1, 0, 0], sizes = [1, 16, 16], strides = [1, 1, 1]} : vector<2x16x16xf32> to vector<1x16x16xf32>
    %127 = vector.shape_cast %126 : vector<1x16x16xf32> to vector<16x16xf32>
    %128 = vector.broadcast %125 : f32 to vector<16x16xf32>
    %129 = arith.mulf %128, %127 : vector<16x16xf32>
    %130 = arith.addf %117, %129 : vector<16x16xf32>
    %c0_73 = arith.constant 0 : index
    %c4_74 = arith.constant 4 : index
    %c3_75 = arith.constant 3 : index
    %131 = vector.load %arg7[%c0_73, %c4_74, %c3_75] : memref<2x24x128xf32, #tpu.memory_space<vmem>>, vector<2x16x16xf32>
    %c0_76 = arith.constant 0 : index
    %c7 = arith.constant 7 : index
    %132 = memref.load %arg4[%c0_76, %c7] : memref<2x27xf32, #tpu.memory_space<smem>>
    %133 = vector.extract_strided_slice %131 {offsets = [0, 0, 0], sizes = [1, 16, 16], strides = [1, 1, 1]} : vector<2x16x16xf32> to vector<1x16x16xf32>
    %134 = vector.shape_cast %133 : vector<1x16x16xf32> to vector<16x16xf32>
    %135 = vector.broadcast %132 : f32 to vector<16x16xf32>
    %136 = arith.mulf %135, %134 : vector<16x16xf32>
    %137 = arith.addf %124, %136 : vector<16x16xf32>
    %c1_77 = arith.constant 1 : index
    %c7_78 = arith.constant 7 : index
    %138 = memref.load %arg4[%c1_77, %c7_78] : memref<2x27xf32, #tpu.memory_space<smem>>
    %139 = vector.extract_strided_slice %131 {offsets = [1, 0, 0], sizes = [1, 16, 16], strides = [1, 1, 1]} : vector<2x16x16xf32> to vector<1x16x16xf32>
    %140 = vector.shape_cast %139 : vector<1x16x16xf32> to vector<16x16xf32>
    %141 = vector.broadcast %138 : f32 to vector<16x16xf32>
    %142 = arith.mulf %141, %140 : vector<16x16xf32>
    %143 = arith.addf %130, %142 : vector<16x16xf32>
    %c0_79 = arith.constant 0 : index
    %c4_80 = arith.constant 4 : index
    %c4_81 = arith.constant 4 : index
    %144 = vector.load %arg7[%c0_79, %c4_80, %c4_81] : memref<2x24x128xf32, #tpu.memory_space<vmem>>, vector<2x16x16xf32>
    %c0_82 = arith.constant 0 : index
    %c8 = arith.constant 8 : index
    %145 = memref.load %arg4[%c0_82, %c8] : memref<2x27xf32, #tpu.memory_space<smem>>
    %146 = vector.extract_strided_slice %144 {offsets = [0, 0, 0], sizes = [1, 16, 16], strides = [1, 1, 1]} : vector<2x16x16xf32> to vector<1x16x16xf32>
    %147 = vector.shape_cast %146 : vector<1x16x16xf32> to vector<16x16xf32>
    %148 = vector.broadcast %145 : f32 to vector<16x16xf32>
    %149 = arith.mulf %148, %147 : vector<16x16xf32>
    %150 = arith.addf %137, %149 : vector<16x16xf32>
    %c1_83 = arith.constant 1 : index
    %c8_84 = arith.constant 8 : index
    %151 = memref.load %arg4[%c1_83, %c8_84] : memref<2x27xf32, #tpu.memory_space<smem>>
    %152 = vector.extract_strided_slice %144 {offsets = [1, 0, 0], sizes = [1, 16, 16], strides = [1, 1, 1]} : vector<2x16x16xf32> to vector<1x16x16xf32>
    %153 = vector.shape_cast %152 : vector<1x16x16xf32> to vector<16x16xf32>
    %154 = vector.broadcast %151 : f32 to vector<16x16xf32>
    %155 = arith.mulf %154, %153 : vector<16x16xf32>
    %156 = arith.addf %143, %155 : vector<16x16xf32>
    %c0_85 = arith.constant 0 : index
    %c3_86 = arith.constant 3 : index
    %c3_87 = arith.constant 3 : index
    %157 = vector.load %arg7[%c0_85, %c3_86, %c3_87] : memref<2x24x128xf32, #tpu.memory_space<vmem>>, vector<1x16x16xf32>
    %158 = vector.shape_cast %157 : vector<1x16x16xf32> to vector<16x16xf32>
    %159 = vector.shape_cast %150 : vector<16x16xf32> to vector<1x16x16xf32>
    tpu.vector_store %arg7[%c0_85, %c3_86, %c3_87], %159 {strides = array<i32>} : memref<2x24x128xf32, #tpu.memory_space<vmem>>, vector<1x16x16xf32>,
    %c1_88 = arith.constant 1 : index
    %c3_89 = arith.constant 3 : index
    %c3_90 = arith.constant 3 : index
    %160 = vector.load %arg7[%c1_88, %c3_89, %c3_90] : memref<2x24x128xf32, #tpu.memory_space<vmem>>, vector<1x16x16xf32>
    %161 = vector.shape_cast %160 : vector<1x16x16xf32> to vector<16x16xf32>
    %162 = vector.shape_cast %156 : vector<16x16xf32> to vector<1x16x16xf32>
    tpu.vector_store %arg7[%c1_88, %c3_89, %c3_90], %162 {strides = array<i32>} : memref<2x24x128xf32, #tpu.memory_space<vmem>>, vector<1x16x16xf32>,
    %c0_91 = arith.constant 0 : index
    %c1_92 = arith.constant 1 : index
    %163 = memref.load %arg5[%c0_91, %c1_92] : memref<2x3xf32, #tpu.memory_space<smem>>
    %164 = vector.broadcast %163 : f32 to vector<16x16xf32>
    %c1_93 = arith.constant 1 : index
    %c1_94 = arith.constant 1 : index
    %165 = memref.load %arg5[%c1_93, %c1_94] : memref<2x3xf32, #tpu.memory_space<smem>>
    %166 = vector.broadcast %165 : f32 to vector<16x16xf32>
    %c0_95 = arith.constant 0 : index
    %c1_96 = arith.constant 1 : index
    %c1_97 = arith.constant 1 : index
    %167 = vector.load %arg7[%c0_95, %c1_96, %c1_97] : memref<2x24x128xf32, #tpu.memory_space<vmem>>, vector<2x16x16xf32>
    %c0_98 = arith.constant 0 : index
    %c9 = arith.constant 9 : index
    %168 = memref.load %arg4[%c0_98, %c9] : memref<2x27xf32, #tpu.memory_space<smem>>
    %169 = vector.extract_strided_slice %167 {offsets = [0, 0, 0], sizes = [1, 16, 16], strides = [1, 1, 1]} : vector<2x16x16xf32> to vector<1x16x16xf32>
    %170 = vector.shape_cast %169 : vector<1x16x16xf32> to vector<16x16xf32>
    %171 = vector.broadcast %168 : f32 to vector<16x16xf32>
    %172 = arith.mulf %171, %170 : vector<16x16xf32>
    %173 = arith.addf %164, %172 : vector<16x16xf32>
    %c1_99 = arith.constant 1 : index
    %c9_100 = arith.constant 9 : index
    %174 = memref.load %arg4[%c1_99, %c9_100] : memref<2x27xf32, #tpu.memory_space<smem>>
    %175 = vector.extract_strided_slice %167 {offsets = [1, 0, 0], sizes = [1, 16, 16], strides = [1, 1, 1]} : vector<2x16x16xf32> to vector<1x16x16xf32>
    %176 = vector.shape_cast %175 : vector<1x16x16xf32> to vector<16x16xf32>
    %177 = vector.broadcast %174 : f32 to vector<16x16xf32>
    %178 = arith.mulf %177, %176 : vector<16x16xf32>
    %179 = arith.addf %166, %178 : vector<16x16xf32>
    %c0_101 = arith.constant 0 : index
    %c1_102 = arith.constant 1 : index
    %c3_103 = arith.constant 3 : index
    %180 = vector.load %arg7[%c0_101, %c1_102, %c3_103] : memref<2x24x128xf32, #tpu.memory_space<vmem>>, vector<2x16x16xf32>
    %c0_104 = arith.constant 0 : index
    %c10 = arith.constant 10 : index
    %181 = memref.load %arg4[%c0_104, %c10] : memref<2x27xf32, #tpu.memory_space<smem>>
    %182 = vector.extract_strided_slice %180 {offsets = [0, 0, 0], sizes = [1, 16, 16], strides = [1, 1, 1]} : vector<2x16x16xf32> to vector<1x16x16xf32>
    %183 = vector.shape_cast %182 : vector<1x16x16xf32> to vector<16x16xf32>
    %184 = vector.broadcast %181 : f32 to vector<16x16xf32>
    %185 = arith.mulf %184, %183 : vector<16x16xf32>
    %186 = arith.addf %173, %185 : vector<16x16xf32>
    %c1_105 = arith.constant 1 : index
    %c10_106 = arith.constant 10 : index
    %187 = memref.load %arg4[%c1_105, %c10_106] : memref<2x27xf32, #tpu.memory_space<smem>>
    %188 = vector.extract_strided_slice %180 {offsets = [1, 0, 0], sizes = [1, 16, 16], strides = [1, 1, 1]} : vector<2x16x16xf32> to vector<1x16x16xf32>
    %189 = vector.shape_cast %188 : vector<1x16x16xf32> to vector<16x16xf32>
    %190 = vector.broadcast %187 : f32 to vector<16x16xf32>
    %191 = arith.mulf %190, %189 : vector<16x16xf32>
    %192 = arith.addf %179, %191 : vector<16x16xf32>
    %c0_107 = arith.constant 0 : index
    %c1_108 = arith.constant 1 : index
    %c5_109 = arith.constant 5 : index
    %193 = vector.load %arg7[%c0_107, %c1_108, %c5_109] : memref<2x24x128xf32, #tpu.memory_space<vmem>>, vector<2x16x16xf32>
    %c0_110 = arith.constant 0 : index
    %c11 = arith.constant 11 : index
    %194 = memref.load %arg4[%c0_110, %c11] : memref<2x27xf32, #tpu.memory_space<smem>>
    %195 = vector.extract_strided_slice %193 {offsets = [0, 0, 0], sizes = [1, 16, 16], strides = [1, 1, 1]} : vector<2x16x16xf32> to vector<1x16x16xf32>
    %196 = vector.shape_cast %195 : vector<1x16x16xf32> to vector<16x16xf32>
    %197 = vector.broadcast %194 : f32 to vector<16x16xf32>
    %198 = arith.mulf %197, %196 : vector<16x16xf32>
    %199 = arith.addf %186, %198 : vector<16x16xf32>
    %c1_111 = arith.constant 1 : index
    %c11_112 = arith.constant 11 : index
    %200 = memref.load %arg4[%c1_111, %c11_112] : memref<2x27xf32, #tpu.memory_space<smem>>
    %201 = vector.extract_strided_slice %193 {offsets = [1, 0, 0], sizes = [1, 16, 16], strides = [1, 1, 1]} : vector<2x16x16xf32> to vector<1x16x16xf32>
    %202 = vector.shape_cast %201 : vector<1x16x16xf32> to vector<16x16xf32>
    %203 = vector.broadcast %200 : f32 to vector<16x16xf32>
    %204 = arith.mulf %203, %202 : vector<16x16xf32>
    %205 = arith.addf %192, %204 : vector<16x16xf32>
    %c0_113 = arith.constant 0 : index
    %c3_114 = arith.constant 3 : index
    %c1_115 = arith.constant 1 : index
    %206 = vector.load %arg7[%c0_113, %c3_114, %c1_115] : memref<2x24x128xf32, #tpu.memory_space<vmem>>, vector<2x16x16xf32>
    %c0_116 = arith.constant 0 : index
    %c12 = arith.constant 12 : index
    %207 = memref.load %arg4[%c0_116, %c12] : memref<2x27xf32, #tpu.memory_space<smem>>
    %208 = vector.extract_strided_slice %206 {offsets = [0, 0, 0], sizes = [1, 16, 16], strides = [1, 1, 1]} : vector<2x16x16xf32> to vector<1x16x16xf32>
    %209 = vector.shape_cast %208 : vector<1x16x16xf32> to vector<16x16xf32>
    %210 = vector.broadcast %207 : f32 to vector<16x16xf32>
    %211 = arith.mulf %210, %209 : vector<16x16xf32>
    %212 = arith.addf %199, %211 : vector<16x16xf32>
    %c1_117 = arith.constant 1 : index
    %c12_118 = arith.constant 12 : index
    %213 = memref.load %arg4[%c1_117, %c12_118] : memref<2x27xf32, #tpu.memory_space<smem>>
    %214 = vector.extract_strided_slice %206 {offsets = [1, 0, 0], sizes = [1, 16, 16], strides = [1, 1, 1]} : vector<2x16x16xf32> to vector<1x16x16xf32>
    %215 = vector.shape_cast %214 : vector<1x16x16xf32> to vector<16x16xf32>
    %216 = vector.broadcast %213 : f32 to vector<16x16xf32>
    %217 = arith.mulf %216, %215 : vector<16x16xf32>
    %218 = arith.addf %205, %217 : vector<16x16xf32>
    %c0_119 = arith.constant 0 : index
    %c3_120 = arith.constant 3 : index
    %c3_121 = arith.constant 3 : index
    %219 = vector.load %arg7[%c0_119, %c3_120, %c3_121] : memref<2x24x128xf32, #tpu.memory_space<vmem>>, vector<2x16x16xf32>
    %c0_122 = arith.constant 0 : index
    %c13 = arith.constant 13 : index
    %220 = memref.load %arg4[%c0_122, %c13] : memref<2x27xf32, #tpu.memory_space<smem>>
    %221 = vector.extract_strided_slice %219 {offsets = [0, 0, 0], sizes = [1, 16, 16], strides = [1, 1, 1]} : vector<2x16x16xf32> to vector<1x16x16xf32>
    %222 = vector.shape_cast %221 : vector<1x16x16xf32> to vector<16x16xf32>
    %223 = vector.broadcast %220 : f32 to vector<16x16xf32>
    %224 = arith.mulf %223, %222 : vector<16x16xf32>
    %225 = arith.addf %212, %224 : vector<16x16xf32>
    %c1_123 = arith.constant 1 : index
    %c13_124 = arith.constant 13 : index
    %226 = memref.load %arg4[%c1_123, %c13_124] : memref<2x27xf32, #tpu.memory_space<smem>>
    %227 = vector.extract_strided_slice %219 {offsets = [1, 0, 0], sizes = [1, 16, 16], strides = [1, 1, 1]} : vector<2x16x16xf32> to vector<1x16x16xf32>
    %228 = vector.shape_cast %227 : vector<1x16x16xf32> to vector<16x16xf32>
    %229 = vector.broadcast %226 : f32 to vector<16x16xf32>
    %230 = arith.mulf %229, %228 : vector<16x16xf32>
    %231 = arith.addf %218, %230 : vector<16x16xf32>
    %c0_125 = arith.constant 0 : index
    %c3_126 = arith.constant 3 : index
    %c5_127 = arith.constant 5 : index
    %232 = vector.load %arg7[%c0_125, %c3_126, %c5_127] : memref<2x24x128xf32, #tpu.memory_space<vmem>>, vector<2x16x16xf32>
    %c0_128 = arith.constant 0 : index
    %c14 = arith.constant 14 : index
    %233 = memref.load %arg4[%c0_128, %c14] : memref<2x27xf32, #tpu.memory_space<smem>>
    %234 = vector.extract_strided_slice %232 {offsets = [0, 0, 0], sizes = [1, 16, 16], strides = [1, 1, 1]} : vector<2x16x16xf32> to vector<1x16x16xf32>
    %235 = vector.shape_cast %234 : vector<1x16x16xf32> to vector<16x16xf32>
    %236 = vector.broadcast %233 : f32 to vector<16x16xf32>
    %237 = arith.mulf %236, %235 : vector<16x16xf32>
    %238 = arith.addf %225, %237 : vector<16x16xf32>
    %c1_129 = arith.constant 1 : index
    %c14_130 = arith.constant 14 : index
    %239 = memref.load %arg4[%c1_129, %c14_130] : memref<2x27xf32, #tpu.memory_space<smem>>
    %240 = vector.extract_strided_slice %232 {offsets = [1, 0, 0], sizes = [1, 16, 16], strides = [1, 1, 1]} : vector<2x16x16xf32> to vector<1x16x16xf32>
    %241 = vector.shape_cast %240 : vector<1x16x16xf32> to vector<16x16xf32>
    %242 = vector.broadcast %239 : f32 to vector<16x16xf32>
    %243 = arith.mulf %242, %241 : vector<16x16xf32>
    %244 = arith.addf %231, %243 : vector<16x16xf32>
    %c0_131 = arith.constant 0 : index
    %c5_132 = arith.constant 5 : index
    %c1_133 = arith.constant 1 : index
    %245 = vector.load %arg7[%c0_131, %c5_132, %c1_133] : memref<2x24x128xf32, #tpu.memory_space<vmem>>, vector<2x16x16xf32>
    %c0_134 = arith.constant 0 : index
    %c15 = arith.constant 15 : index
    %246 = memref.load %arg4[%c0_134, %c15] : memref<2x27xf32, #tpu.memory_space<smem>>
    %247 = vector.extract_strided_slice %245 {offsets = [0, 0, 0], sizes = [1, 16, 16], strides = [1, 1, 1]} : vector<2x16x16xf32> to vector<1x16x16xf32>
    %248 = vector.shape_cast %247 : vector<1x16x16xf32> to vector<16x16xf32>
    %249 = vector.broadcast %246 : f32 to vector<16x16xf32>
    %250 = arith.mulf %249, %248 : vector<16x16xf32>
    %251 = arith.addf %238, %250 : vector<16x16xf32>
    %c1_135 = arith.constant 1 : index
    %c15_136 = arith.constant 15 : index
    %252 = memref.load %arg4[%c1_135, %c15_136] : memref<2x27xf32, #tpu.memory_space<smem>>
    %253 = vector.extract_strided_slice %245 {offsets = [1, 0, 0], sizes = [1, 16, 16], strides = [1, 1, 1]} : vector<2x16x16xf32> to vector<1x16x16xf32>
    %254 = vector.shape_cast %253 : vector<1x16x16xf32> to vector<16x16xf32>
    %255 = vector.broadcast %252 : f32 to vector<16x16xf32>
    %256 = arith.mulf %255, %254 : vector<16x16xf32>
    %257 = arith.addf %244, %256 : vector<16x16xf32>
    %c0_137 = arith.constant 0 : index
    %c5_138 = arith.constant 5 : index
    %c3_139 = arith.constant 3 : index
    %258 = vector.load %arg7[%c0_137, %c5_138, %c3_139] : memref<2x24x128xf32, #tpu.memory_space<vmem>>, vector<2x16x16xf32>
    %c0_140 = arith.constant 0 : index
    %c16 = arith.constant 16 : index
    %259 = memref.load %arg4[%c0_140, %c16] : memref<2x27xf32, #tpu.memory_space<smem>>
    %260 = vector.extract_strided_slice %258 {offsets = [0, 0, 0], sizes = [1, 16, 16], strides = [1, 1, 1]} : vector<2x16x16xf32> to vector<1x16x16xf32>
    %261 = vector.shape_cast %260 : vector<1x16x16xf32> to vector<16x16xf32>
    %262 = vector.broadcast %259 : f32 to vector<16x16xf32>
    %263 = arith.mulf %262, %261 : vector<16x16xf32>
    %264 = arith.addf %251, %263 : vector<16x16xf32>
    %c1_141 = arith.constant 1 : index
    %c16_142 = arith.constant 16 : index
    %265 = memref.load %arg4[%c1_141, %c16_142] : memref<2x27xf32, #tpu.memory_space<smem>>
    %266 = vector.extract_strided_slice %258 {offsets = [1, 0, 0], sizes = [1, 16, 16], strides = [1, 1, 1]} : vector<2x16x16xf32> to vector<1x16x16xf32>
    %267 = vector.shape_cast %266 : vector<1x16x16xf32> to vector<16x16xf32>
    %268 = vector.broadcast %265 : f32 to vector<16x16xf32>
    %269 = arith.mulf %268, %267 : vector<16x16xf32>
    %270 = arith.addf %257, %269 : vector<16x16xf32>
    %c0_143 = arith.constant 0 : index
    %c5_144 = arith.constant 5 : index
    %c5_145 = arith.constant 5 : index
    %271 = vector.load %arg7[%c0_143, %c5_144, %c5_145] : memref<2x24x128xf32, #tpu.memory_space<vmem>>, vector<2x16x16xf32>
    %c0_146 = arith.constant 0 : index
    %c17 = arith.constant 17 : index
    %272 = memref.load %arg4[%c0_146, %c17] : memref<2x27xf32, #tpu.memory_space<smem>>
    %273 = vector.extract_strided_slice %271 {offsets = [0, 0, 0], sizes = [1, 16, 16], strides = [1, 1, 1]} : vector<2x16x16xf32> to vector<1x16x16xf32>
    %274 = vector.shape_cast %273 : vector<1x16x16xf32> to vector<16x16xf32>
    %275 = vector.broadcast %272 : f32 to vector<16x16xf32>
    %276 = arith.mulf %275, %274 : vector<16x16xf32>
    %277 = arith.addf %264, %276 : vector<16x16xf32>
    %c1_147 = arith.constant 1 : index
    %c17_148 = arith.constant 17 : index
    %278 = memref.load %arg4[%c1_147, %c17_148] : memref<2x27xf32, #tpu.memory_space<smem>>
    %279 = vector.extract_strided_slice %271 {offsets = [1, 0, 0], sizes = [1, 16, 16], strides = [1, 1, 1]} : vector<2x16x16xf32> to vector<1x16x16xf32>
    %280 = vector.shape_cast %279 : vector<1x16x16xf32> to vector<16x16xf32>
    %281 = vector.broadcast %278 : f32 to vector<16x16xf32>
    %282 = arith.mulf %281, %280 : vector<16x16xf32>
    %283 = arith.addf %270, %282 : vector<16x16xf32>
    %c0_149 = arith.constant 0 : index
    %c3_150 = arith.constant 3 : index
    %c3_151 = arith.constant 3 : index
    %284 = vector.load %arg7[%c0_149, %c3_150, %c3_151] : memref<2x24x128xf32, #tpu.memory_space<vmem>>, vector<1x16x16xf32>
    %285 = vector.shape_cast %284 : vector<1x16x16xf32> to vector<16x16xf32>
    %286 = vector.shape_cast %277 : vector<16x16xf32> to vector<1x16x16xf32>
    tpu.vector_store %arg7[%c0_149, %c3_150, %c3_151], %286 {strides = array<i32>} : memref<2x24x128xf32, #tpu.memory_space<vmem>>, vector<1x16x16xf32>,
    %c1_152 = arith.constant 1 : index
    %c3_153 = arith.constant 3 : index
    %c3_154 = arith.constant 3 : index
    %287 = vector.load %arg7[%c1_152, %c3_153, %c3_154] : memref<2x24x128xf32, #tpu.memory_space<vmem>>, vector<1x16x16xf32>
    %288 = vector.shape_cast %287 : vector<1x16x16xf32> to vector<16x16xf32>
    %289 = vector.shape_cast %283 : vector<16x16xf32> to vector<1x16x16xf32>
    tpu.vector_store %arg7[%c1_152, %c3_153, %c3_154], %289 {strides = array<i32>} : memref<2x24x128xf32, #tpu.memory_space<vmem>>, vector<1x16x16xf32>,
    %c0_155 = arith.constant 0 : index
    %c2_156 = arith.constant 2 : index
    %290 = memref.load %arg5[%c0_155, %c2_156] : memref<2x3xf32, #tpu.memory_space<smem>>
    %291 = vector.broadcast %290 : f32 to vector<16x16xf32>
    %c1_157 = arith.constant 1 : index
    %c2_158 = arith.constant 2 : index
    %292 = memref.load %arg5[%c1_157, %c2_158] : memref<2x3xf32, #tpu.memory_space<smem>>
    %293 = vector.broadcast %292 : f32 to vector<16x16xf32>
    %c0_159 = arith.constant 0 : index
    %c0_160 = arith.constant 0 : index
    %c0_161 = arith.constant 0 : index
    %294 = vector.load %arg7[%c0_159, %c0_160, %c0_161] : memref<2x24x128xf32, #tpu.memory_space<vmem>>, vector<2x16x16xf32>
    %c0_162 = arith.constant 0 : index
    %c18 = arith.constant 18 : index
    %295 = memref.load %arg4[%c0_162, %c18] : memref<2x27xf32, #tpu.memory_space<smem>>
    %296 = vector.extract_strided_slice %294 {offsets = [0, 0, 0], sizes = [1, 16, 16], strides = [1, 1, 1]} : vector<2x16x16xf32> to vector<1x16x16xf32>
    %297 = vector.shape_cast %296 : vector<1x16x16xf32> to vector<16x16xf32>
    %298 = vector.broadcast %295 : f32 to vector<16x16xf32>
    %299 = arith.mulf %298, %297 : vector<16x16xf32>
    %300 = arith.addf %291, %299 : vector<16x16xf32>
    %c1_163 = arith.constant 1 : index
    %c18_164 = arith.constant 18 : index
    %301 = memref.load %arg4[%c1_163, %c18_164] : memref<2x27xf32, #tpu.memory_space<smem>>
    %302 = vector.extract_strided_slice %294 {offsets = [1, 0, 0], sizes = [1, 16, 16], strides = [1, 1, 1]} : vector<2x16x16xf32> to vector<1x16x16xf32>
    %303 = vector.shape_cast %302 : vector<1x16x16xf32> to vector<16x16xf32>
    %304 = vector.broadcast %301 : f32 to vector<16x16xf32>
    %305 = arith.mulf %304, %303 : vector<16x16xf32>
    %306 = arith.addf %293, %305 : vector<16x16xf32>
    %c0_165 = arith.constant 0 : index
    %c0_166 = arith.constant 0 : index
    %c3_167 = arith.constant 3 : index
    %307 = vector.load %arg7[%c0_165, %c0_166, %c3_167] : memref<2x24x128xf32, #tpu.memory_space<vmem>>, vector<2x16x16xf32>
    %c0_168 = arith.constant 0 : index
    %c19 = arith.constant 19 : index
    %308 = memref.load %arg4[%c0_168, %c19] : memref<2x27xf32, #tpu.memory_space<smem>>
    %309 = vector.extract_strided_slice %307 {offsets = [0, 0, 0], sizes = [1, 16, 16], strides = [1, 1, 1]} : vector<2x16x16xf32> to vector<1x16x16xf32>
    %310 = vector.shape_cast %309 : vector<1x16x16xf32> to vector<16x16xf32>
    %311 = vector.broadcast %308 : f32 to vector<16x16xf32>
    %312 = arith.mulf %311, %310 : vector<16x16xf32>
    %313 = arith.addf %300, %312 : vector<16x16xf32>
    %c1_169 = arith.constant 1 : index
    %c19_170 = arith.constant 19 : index
    %314 = memref.load %arg4[%c1_169, %c19_170] : memref<2x27xf32, #tpu.memory_space<smem>>
    %315 = vector.extract_strided_slice %307 {offsets = [1, 0, 0], sizes = [1, 16, 16], strides = [1, 1, 1]} : vector<2x16x16xf32> to vector<1x16x16xf32>
    %316 = vector.shape_cast %315 : vector<1x16x16xf32> to vector<16x16xf32>
    %317 = vector.broadcast %314 : f32 to vector<16x16xf32>
    %318 = arith.mulf %317, %316 : vector<16x16xf32>
    %319 = arith.addf %306, %318 : vector<16x16xf32>
    %c0_171 = arith.constant 0 : index
    %c0_172 = arith.constant 0 : index
    %c6_173 = arith.constant 6 : index
    %320 = vector.load %arg7[%c0_171, %c0_172, %c6_173] : memref<2x24x128xf32, #tpu.memory_space<vmem>>, vector<2x16x16xf32>
    %c0_174 = arith.constant 0 : index
    %c20 = arith.constant 20 : index
    %321 = memref.load %arg4[%c0_174, %c20] : memref<2x27xf32, #tpu.memory_space<smem>>
    %322 = vector.extract_strided_slice %320 {offsets = [0, 0, 0], sizes = [1, 16, 16], strides = [1, 1, 1]} : vector<2x16x16xf32> to vector<1x16x16xf32>
    %323 = vector.shape_cast %322 : vector<1x16x16xf32> to vector<16x16xf32>
    %324 = vector.broadcast %321 : f32 to vector<16x16xf32>
    %325 = arith.mulf %324, %323 : vector<16x16xf32>
    %326 = arith.addf %313, %325 : vector<16x16xf32>
    %c1_175 = arith.constant 1 : index
    %c20_176 = arith.constant 20 : index
    %327 = memref.load %arg4[%c1_175, %c20_176] : memref<2x27xf32, #tpu.memory_space<smem>>
    %328 = vector.extract_strided_slice %320 {offsets = [1, 0, 0], sizes = [1, 16, 16], strides = [1, 1, 1]} : vector<2x16x16xf32> to vector<1x16x16xf32>
    %329 = vector.shape_cast %328 : vector<1x16x16xf32> to vector<16x16xf32>
    %330 = vector.broadcast %327 : f32 to vector<16x16xf32>
    %331 = arith.mulf %330, %329 : vector<16x16xf32>
    %332 = arith.addf %319, %331 : vector<16x16xf32>
    %c0_177 = arith.constant 0 : index
    %c3_178 = arith.constant 3 : index
    %c0_179 = arith.constant 0 : index
    %333 = vector.load %arg7[%c0_177, %c3_178, %c0_179] : memref<2x24x128xf32, #tpu.memory_space<vmem>>, vector<2x16x16xf32>
    %c0_180 = arith.constant 0 : index
    %c21 = arith.constant 21 : index
    %334 = memref.load %arg4[%c0_180, %c21] : memref<2x27xf32, #tpu.memory_space<smem>>
    %335 = vector.extract_strided_slice %333 {offsets = [0, 0, 0], sizes = [1, 16, 16], strides = [1, 1, 1]} : vector<2x16x16xf32> to vector<1x16x16xf32>
    %336 = vector.shape_cast %335 : vector<1x16x16xf32> to vector<16x16xf32>
    %337 = vector.broadcast %334 : f32 to vector<16x16xf32>
    %338 = arith.mulf %337, %336 : vector<16x16xf32>
    %339 = arith.addf %326, %338 : vector<16x16xf32>
    %c1_181 = arith.constant 1 : index
    %c21_182 = arith.constant 21 : index
    %340 = memref.load %arg4[%c1_181, %c21_182] : memref<2x27xf32, #tpu.memory_space<smem>>
    %341 = vector.extract_strided_slice %333 {offsets = [1, 0, 0], sizes = [1, 16, 16], strides = [1, 1, 1]} : vector<2x16x16xf32> to vector<1x16x16xf32>
    %342 = vector.shape_cast %341 : vector<1x16x16xf32> to vector<16x16xf32>
    %343 = vector.broadcast %340 : f32 to vector<16x16xf32>
    %344 = arith.mulf %343, %342 : vector<16x16xf32>
    %345 = arith.addf %332, %344 : vector<16x16xf32>
    %c0_183 = arith.constant 0 : index
    %c3_184 = arith.constant 3 : index
    %c3_185 = arith.constant 3 : index
    %346 = vector.load %arg7[%c0_183, %c3_184, %c3_185] : memref<2x24x128xf32, #tpu.memory_space<vmem>>, vector<2x16x16xf32>
    %c0_186 = arith.constant 0 : index
    %c22 = arith.constant 22 : index
    %347 = memref.load %arg4[%c0_186, %c22] : memref<2x27xf32, #tpu.memory_space<smem>>
    %348 = vector.extract_strided_slice %346 {offsets = [0, 0, 0], sizes = [1, 16, 16], strides = [1, 1, 1]} : vector<2x16x16xf32> to vector<1x16x16xf32>
    %349 = vector.shape_cast %348 : vector<1x16x16xf32> to vector<16x16xf32>
    %350 = vector.broadcast %347 : f32 to vector<16x16xf32>
    %351 = arith.mulf %350, %349 : vector<16x16xf32>
    %352 = arith.addf %339, %351 : vector<16x16xf32>
    %c1_187 = arith.constant 1 : index
    %c22_188 = arith.constant 22 : index
    %353 = memref.load %arg4[%c1_187, %c22_188] : memref<2x27xf32, #tpu.memory_space<smem>>
    %354 = vector.extract_strided_slice %346 {offsets = [1, 0, 0], sizes = [1, 16, 16], strides = [1, 1, 1]} : vector<2x16x16xf32> to vector<1x16x16xf32>
    %355 = vector.shape_cast %354 : vector<1x16x16xf32> to vector<16x16xf32>
    %356 = vector.broadcast %353 : f32 to vector<16x16xf32>
    %357 = arith.mulf %356, %355 : vector<16x16xf32>
    %358 = arith.addf %345, %357 : vector<16x16xf32>
    %c0_189 = arith.constant 0 : index
    %c3_190 = arith.constant 3 : index
    %c6_191 = arith.constant 6 : index
    %359 = vector.load %arg7[%c0_189, %c3_190, %c6_191] : memref<2x24x128xf32, #tpu.memory_space<vmem>>, vector<2x16x16xf32>
    %c0_192 = arith.constant 0 : index
    %c23 = arith.constant 23 : index
    %360 = memref.load %arg4[%c0_192, %c23] : memref<2x27xf32, #tpu.memory_space<smem>>
    %361 = vector.extract_strided_slice %359 {offsets = [0, 0, 0], sizes = [1, 16, 16], strides = [1, 1, 1]} : vector<2x16x16xf32> to vector<1x16x16xf32>
    %362 = vector.shape_cast %361 : vector<1x16x16xf32> to vector<16x16xf32>
    %363 = vector.broadcast %360 : f32 to vector<16x16xf32>
    %364 = arith.mulf %363, %362 : vector<16x16xf32>
    %365 = arith.addf %352, %364 : vector<16x16xf32>
    %c1_193 = arith.constant 1 : index
    %c23_194 = arith.constant 23 : index
    %366 = memref.load %arg4[%c1_193, %c23_194] : memref<2x27xf32, #tpu.memory_space<smem>>
    %367 = vector.extract_strided_slice %359 {offsets = [1, 0, 0], sizes = [1, 16, 16], strides = [1, 1, 1]} : vector<2x16x16xf32> to vector<1x16x16xf32>
    %368 = vector.shape_cast %367 : vector<1x16x16xf32> to vector<16x16xf32>
    %369 = vector.broadcast %366 : f32 to vector<16x16xf32>
    %370 = arith.mulf %369, %368 : vector<16x16xf32>
    %371 = arith.addf %358, %370 : vector<16x16xf32>
    %c0_195 = arith.constant 0 : index
    %c6_196 = arith.constant 6 : index
    %c0_197 = arith.constant 0 : index
    %372 = vector.load %arg7[%c0_195, %c6_196, %c0_197] : memref<2x24x128xf32, #tpu.memory_space<vmem>>, vector<2x16x16xf32>
    %c0_198 = arith.constant 0 : index
    %c24 = arith.constant 24 : index
    %373 = memref.load %arg4[%c0_198, %c24] : memref<2x27xf32, #tpu.memory_space<smem>>
    %374 = vector.extract_strided_slice %372 {offsets = [0, 0, 0], sizes = [1, 16, 16], strides = [1, 1, 1]} : vector<2x16x16xf32> to vector<1x16x16xf32>
    %375 = vector.shape_cast %374 : vector<1x16x16xf32> to vector<16x16xf32>
    %376 = vector.broadcast %373 : f32 to vector<16x16xf32>
    %377 = arith.mulf %376, %375 : vector<16x16xf32>
    %378 = arith.addf %365, %377 : vector<16x16xf32>
    %c1_199 = arith.constant 1 : index
    %c24_200 = arith.constant 24 : index
    %379 = memref.load %arg4[%c1_199, %c24_200] : memref<2x27xf32, #tpu.memory_space<smem>>
    %380 = vector.extract_strided_slice %372 {offsets = [1, 0, 0], sizes = [1, 16, 16], strides = [1, 1, 1]} : vector<2x16x16xf32> to vector<1x16x16xf32>
    %381 = vector.shape_cast %380 : vector<1x16x16xf32> to vector<16x16xf32>
    %382 = vector.broadcast %379 : f32 to vector<16x16xf32>
    %383 = arith.mulf %382, %381 : vector<16x16xf32>
    %384 = arith.addf %371, %383 : vector<16x16xf32>
    %c0_201 = arith.constant 0 : index
    %c6_202 = arith.constant 6 : index
    %c3_203 = arith.constant 3 : index
    %385 = vector.load %arg7[%c0_201, %c6_202, %c3_203] : memref<2x24x128xf32, #tpu.memory_space<vmem>>, vector<2x16x16xf32>
    %c0_204 = arith.constant 0 : index
    %c25 = arith.constant 25 : index
    %386 = memref.load %arg4[%c0_204, %c25] : memref<2x27xf32, #tpu.memory_space<smem>>
    %387 = vector.extract_strided_slice %385 {offsets = [0, 0, 0], sizes = [1, 16, 16], strides = [1, 1, 1]} : vector<2x16x16xf32> to vector<1x16x16xf32>
    %388 = vector.shape_cast %387 : vector<1x16x16xf32> to vector<16x16xf32>
    %389 = vector.broadcast %386 : f32 to vector<16x16xf32>
    %390 = arith.mulf %389, %388 : vector<16x16xf32>
    %391 = arith.addf %378, %390 : vector<16x16xf32>
    %c1_205 = arith.constant 1 : index
    %c25_206 = arith.constant 25 : index
    %392 = memref.load %arg4[%c1_205, %c25_206] : memref<2x27xf32, #tpu.memory_space<smem>>
    %393 = vector.extract_strided_slice %385 {offsets = [1, 0, 0], sizes = [1, 16, 16], strides = [1, 1, 1]} : vector<2x16x16xf32> to vector<1x16x16xf32>
    %394 = vector.shape_cast %393 : vector<1x16x16xf32> to vector<16x16xf32>
    %395 = vector.broadcast %392 : f32 to vector<16x16xf32>
    %396 = arith.mulf %395, %394 : vector<16x16xf32>
    %397 = arith.addf %384, %396 : vector<16x16xf32>
    %c0_207 = arith.constant 0 : index
    %c6_208 = arith.constant 6 : index
    %c6_209 = arith.constant 6 : index
    %398 = vector.load %arg7[%c0_207, %c6_208, %c6_209] : memref<2x24x128xf32, #tpu.memory_space<vmem>>, vector<2x16x16xf32>
    %c0_210 = arith.constant 0 : index
    %c26 = arith.constant 26 : index
    %399 = memref.load %arg4[%c0_210, %c26] : memref<2x27xf32, #tpu.memory_space<smem>>
    %400 = vector.extract_strided_slice %398 {offsets = [0, 0, 0], sizes = [1, 16, 16], strides = [1, 1, 1]} : vector<2x16x16xf32> to vector<1x16x16xf32>
    %401 = vector.shape_cast %400 : vector<1x16x16xf32> to vector<16x16xf32>
    %402 = vector.broadcast %399 : f32 to vector<16x16xf32>
    %403 = arith.mulf %402, %401 : vector<16x16xf32>
    %404 = arith.addf %391, %403 : vector<16x16xf32>
    %c1_211 = arith.constant 1 : index
    %c26_212 = arith.constant 26 : index
    %405 = memref.load %arg4[%c1_211, %c26_212] : memref<2x27xf32, #tpu.memory_space<smem>>
    %406 = vector.extract_strided_slice %398 {offsets = [1, 0, 0], sizes = [1, 16, 16], strides = [1, 1, 1]} : vector<2x16x16xf32> to vector<1x16x16xf32>
    %407 = vector.shape_cast %406 : vector<1x16x16xf32> to vector<16x16xf32>
    %408 = vector.broadcast %405 : f32 to vector<16x16xf32>
    %409 = arith.mulf %408, %407 : vector<16x16xf32>
    %410 = arith.addf %397, %409 : vector<16x16xf32>
    %411 = arith.negf %404 : vector<16x16xf32>
    %412 = math.exp %411 : vector<16x16xf32>
    %cst_213 = arith.constant 1.000000e+00 : f32
    %413 = vector.broadcast %cst_213 : f32 to vector<16x16xf32>
    %414 = arith.addf %413, %412 : vector<16x16xf32>
    %415 = arith.divf %413, %414 : vector<16x16xf32>
    %416 = arith.negf %410 : vector<16x16xf32>
    %417 = math.exp %416 : vector<16x16xf32>
    %cst_214 = arith.constant 1.000000e+00 : f32
    %418 = vector.broadcast %cst_214 : f32 to vector<16x16xf32>
    %419 = arith.addf %418, %417 : vector<16x16xf32>
    %420 = arith.divf %418, %419 : vector<16x16xf32>
    %421 = arith.addf %415, %420 : vector<16x16xf32>
    %422 = vector.shape_cast %23 : vector<1x32xf32> to vector<1x1x32xf32>
    %423 = vector.broadcast %422 : vector<1x1x32xf32> to vector<16x16x32xf32>
    %424 = arith.mulf %1, %423 : vector<16x16x32xf32>
    %425 = vector.shape_cast %421 : vector<16x16xf32> to vector<16x16x1xf32>
    %426 = vector.broadcast %425 : vector<16x16x1xf32> to vector<16x16x32xf32>
    %427 = arith.mulf %424, %426 : vector<16x16x32xf32>
    %c0_215 = arith.constant 0 : index
    %c0_216 = arith.constant 0 : index
    %c0_217 = arith.constant 0 : index
    %c0_218 = arith.constant 0 : index
    %428 = vector.load %arg6[%c0_215, %c0_216, %c0_217, %c0_218] : memref<1x16x16x32xf32, #tpu.memory_space<vmem>>, vector<1x16x16x32xf32>
    %429 = vector.shape_cast %428 : vector<1x16x16x32xf32> to vector<16x16x32xf32>
    %430 = vector.shape_cast %427 : vector<16x16x32xf32> to vector<1x16x16x32xf32>
    tpu.vector_store %arg6[%c0_215, %c0_216, %c0_217, %c0_218], %430 {strides = array<i32>} : memref<1x16x16x32xf32, #tpu.memory_space<vmem>>, vector<1x16x16x32xf32>,
    return
  }
  func.func @transform_0(%arg0: i32) -> (i32, i32, i32, i32) {
    %c0_i32 = arith.constant 0 : i32
    %c0_i32_0 = arith.constant 0 : i32
    %c0_i32_1 = arith.constant 0 : i32
    %c0_i32_2 = arith.constant 0 : i32
    return %arg0, %c0_i32, %c0_i32_0, %c0_i32_1 : i32, i32, i32, i32
  }
  func.func @transform_1(%arg0: i32) -> (i32, i32) {
    %c0_i32 = arith.constant 0 : i32
    %c0_i32_0 = arith.constant 0 : i32
    %c0_i32_1 = arith.constant 0 : i32
    return %c0_i32, %c0_i32_0 : i32, i32
  }
  func.func @transform_2(%arg0: i32) -> (i32, i32) {
    %c0_i32 = arith.constant 0 : i32
    %c0_i32_0 = arith.constant 0 : i32
    %c0_i32_1 = arith.constant 0 : i32
    return %c0_i32, %c0_i32_0 : i32, i32
  }
  func.func @transform_3(%arg0: i32) -> (i32, i32) {
    %c0_i32 = arith.constant 0 : i32
    %c0_i32_0 = arith.constant 0 : i32
    %c0_i32_1 = arith.constant 0 : i32
    return %c0_i32, %c0_i32_0 : i32, i32
  }
  func.func @transform_4(%arg0: i32) -> (i32, i32) {
    %c0_i32 = arith.constant 0 : i32
    %c0_i32_0 = arith.constant 0 : i32
    %c0_i32_1 = arith.constant 0 : i32
    return %c0_i32, %c0_i32_0 : i32, i32
  }
  func.func @transform_5(%arg0: i32) -> (i32, i32, i32, i32) {
    %c0_i32 = arith.constant 0 : i32
    %c0_i32_0 = arith.constant 0 : i32
    %c0_i32_1 = arith.constant 0 : i32
    %c0_i32_2 = arith.constant 0 : i32
    return %arg0, %c0_i32, %c0_i32_0, %c0_i32_1 : i32, i32, i32, i32
  }
}

</mosaic_0001>

<bundles_post_ra>
// kernel: dsaca_forward.1
= control target key start
LH: loop header
LB: loop body
LE: loop exit
PB: predicated region body
PF: predicated region fallthrough
CT: control target
= control target key end

     0   :  { %10 = vsyncpa [#allocation4], 0  ;;  %s4022_s0 = inlined_call_operand.hbm [shape: f32[2,16,16,32], index: 0, kind: input, shape index: {}]   ;;  %s4023_s1 = inlined_call_operand.vmem [shape: f32[32,8], index: 1, kind: input, shape index: {}]   ;;  %s4024_s2 = inlined_call_operand.vmem [shape: f32[8,32], index: 2, kind: input, shape index: {}]   ;;  %s4025_s3 = inlined_call_operand.vmem [shape: f32[2,27], index: 3, kind: input, shape index: {}]   ;;  %s4026_s4 = inlined_call_operand.vmem [shape: f32[2,3], index: 4, kind: input, shape index: {}]   ;;  %s4027_s5 = inlined_call_operand.hbm [shape: f32[2,16,16,32], index: 5, kind: output, shape index: {}]  }
   0x1   :  { %12 = vsyncpa [#allocation4 + $0x1], 0 }
   0x2   :  { %13 = vsyncpa [#allocation6], 0 }
   0x3   :  { %14 = vsyncpa [#allocation9], 0 }
   0x4   :  { %15 = vsyncpa [#allocation5], 0 }
   0x5   :  { %17 = vsyncpa [#allocation5 + $0x1], 0  ;;  %s2719_s18 = smov 0   ;;  %s2721_s19 = smov 0  }
   0x6   :  { %s2723_s20 = smov 0   ;;  %s2725_s21 = smov 0  }
   0x7 LB: > { %s2740_s22 = sadd.s32 4294967295, %s2669_s21   ;;  %s2288_s23 = sadd.s32 4294967294, %s2669_s21   ;;  %s2669_s21 = sphi %s2725_s21, %s4062_s21   ;;  %s2665_s20 = sphi %s2723_s20, %s4061_s20   ;;  %s2661_s19 = sphi %s2721_s19, %s4060_s19   ;;  %s2657_s18 = sphi %s2719_s18, %s4059_s18  }
   0x8   : > { %s2744_s24 = sadd.s32 1, %s2669_s21   ;;  %s30_s25 = sadd.s32 1, %s2665_s20 }
   0x9   : > { %s27_s26 = ssub.s32 %s2669_s21, %s2744_s24  ;;  %p37_p0 = scmp.ne.s32.totalorder %s2665_s20, %s2661_s19 }
   0xa   : > { %p28_p1 = scmp.eq.s32.totalorder %s27_s26, 0  ;;  %p38_p2 = scmp.eq.s32.totalorder %s2669_s21, 0 }
   0xb   : > { %p43_p3 = scmp.ne.s32.totalorder %s2661_s19, %s2657_s18  ;;  %p4028_p4 = scmp.eq.s32.totalorder %s2740_s22, 0 }
   0xc   : > { %s2756_s27 = scalar_select %p28_p1, %s2665_s20, %s30_s25  }
   0xd   : > { %p2758_p5 = por %p38_p2, %p37_p0  ;;  %p2764_p6 = por %p4028_p4, %p43_p3 }
   0xe   : > { %p151_p7 = scmp.eq.s32.totalorder %s2740_s22, 1  ;;  %p157_p8 = scmp.eq.s32.totalorder %s2288_s23, 1 }
   0xf   : > { %s4038_s29 = scalar_select %p2764_p6, 1, 0 }
  0x10   : > { %p2289_p9 = scmp.ge.s32.totalorder %s2669_s21, 1  ;;  %p164_p10 = scmp.lt.s32.totalorder %s2669_s21, 3 }
  0x11   : > { %p2771_p11 = por %p151_p7, %p37_p0  ;;  %p2775_p12 = por %p157_p8, %p43_p3 }
  0x12   : > { %p2779_p13 = pnand %p2289_p9, %p164_p10  ;;  %s183_s10 = sshll.u32 %s4025_s3, 4  ;;  %s184_s10 = int_to_ptr.vmem [resolvable:$true] %s183_s10 }
  0x13   : > { %s4039_s30 = scalar_select %p2771_p11, 1, 0 }
  0x14   : > { %s4040_s6 = scalar_select %p2775_p12, 1, 0 }
  0x15   : > { %s4041_s7 = scalar_select %p2779_p13, 1, 0 }
  0x16   : > { %p2414_p1 = pneg %p2779_p13  ;;  %p2431_p2 = scmp.lt.s32.totalorder %s2669_s21, 2 }
  0x17   : > { %s194_s14 = sshll.u32 %s4026_s4, 4  ;;  %s2535_s16 = scalar_lea.vmem %s184_s10, 32  ;;  %s195_s14 = int_to_ptr.vmem [resolvable:$true] %s194_s14 }
  0x18   : > { %p2792_p7 = pnand %p2414_p1, %p4028_p4  ;;  %p2801_p3 = pnand %p2431_p2, %p2758_p5 }
  0x19   : > { %p2536_p8 = scmp.ne.s32.totalorder %s184_s10, %s2535_s16  ;;  %p2543_p0 = scmp.lt.s32.totalorder %s184_s10, %s184_s10 }
  0x1a   : > { %s4043_s15 = scalar_select %p2801_p3, 1, 0 }
  0x1b   : > { %p2537_p9 = pneg %p2792_p7  ;;  %p2544_p4 = scmp.lt.s32.totalorder %s2535_s16, %s2535_s16 }
  0x1d   : > { %p2538_p10 = pnand %p2537_p9, %p2536_p8  ;;  %p2545_p12 = por %p2544_p4, %p2543_p0 }
  0x1f   : > { %p2539_p1 = pneg %p2538_p10 }
  0x21   : > { %p2546_p11 = pnand %p2545_p12, %p2539_p1 }
  0x23   : > { %2549 = shalt.err (!%p2546_p11)
}
  0x24   : > { %s2671_s17 = smov [#allocation7]   ;;  %s205_s23 = sand.u32 1, %s2665_s20  }
  0x25   : > { %2417 = dma.vmem_to_smem (!%p2792_p7), %s184_s10, 32, %s2671_s17, [#allocation6]  }
  0x26   : > { %s2550_s25 = scalar_lea.vmem %s195_s14, 32  ;;  %p2558_p8 = scmp.lt.s32.totalorder %s195_s14, %s195_s14 }
  0x27   : > { %p2551_p5 = scmp.ne.s32.totalorder %s195_s14, %s2550_s25  ;;  %p2559_p10 = scmp.lt.s32.totalorder %s2550_s25, %s2550_s25 }
  0x29   : > { %p2553_p2 = pnand %p2551_p5, %p2537_p9  ;;  %p2560_p13 = por %p2559_p10, %p2558_p8 }
  0x2b   : > { %p2554_p6 = pneg %p2553_p2 }
  0x2d   : > { %p2561_p3 = pnand %p2560_p13, %p2554_p6 }
  0x2f   : > { %2564 = shalt.err (!%p2561_p3)
}
  0x30   : > { %s2672_s26 = smov [#allocation8]   ;;  %s2293_s28 = sshll.u32 %s205_s23, 8 }
  0x31   : > { %2420 = dma.vmem_to_smem (!%p2792_p7), %s195_s14, 32, %s2672_s26, [#allocation9]  }
  0x32   : > { %s2371_s8 = sshll.u32 %s2669_s21, 12  ;;  %s209_s13 = scalar_lea.vmem [#allocation3], %s2293_s28 }
  0x33   : > { %s2822_s12 = scalar_lea.hbm %s4022_s0, %s2371_s8  ;;  %s216_s16 = sshll.u32 %s209_s13, 4  ;;  %s2824_s16 = int_to_ptr.vmem [resolvable:$true] %s216_s16 }
  0x34   : > { %s2826_s11 = scalar_lea.sflag [#allocation4], %s205_s23  ;;  %s2565_s17 = scalar_lea.hbm %s2822_s12, 4096 }
  0x35   : > { %p2566_p4 = scmp.ne.s32.totalorder %s2822_s12, %s2565_s17  ;;  %p4044_p6 = scmp.ne.s32.totalorder %s4043_s15, 0 }
  0x36   : > { %s2570_s26 = scalar_lea.hbm %s4022_s0, 8192  ;;  %p2571_p0 = scmp.lt.u32.totalorder %s2822_s12, %s4022_s0 }
  0x37   : > { %p2567_p11 = pneg %p4044_p6  ;;  %p2572_p7 = scmp.lt.u32.totalorder %s2570_s26, %s2565_s17 }
  0x38   : > { %p2574_p9 = scmp.lt.u32.totalorder %s2565_s17, %s2822_s12 }
  0x39   : > { %p2568_p12 = pnand %p2567_p11, %p2566_p4  ;;  %p2573_p3 = por %p2572_p7, %p2571_p0 }
  0x3b   : > { %p2569_p13 = pneg %p2568_p12  ;;  %p2575_p1 = por %p2574_p9, %p2573_p3 }
  0x3d   : > { %p2576_p5 = pnand %p2575_p1, %p2569_p13 }
  0x3f   : > { %2579 = shalt.err (!%p2576_p5)
}
  0x40   : > { %s2580_s23 = scalar_lea.vmem %s2824_s16, 4096  ;;  %s2673_s28 = smov [#allocation3]  }
  0x41   : > { %p2581_p2 = scmp.ne.s32.totalorder %s2824_s16, %s2580_s23  ;;  %s2585_s10 = sshll.u32 %s2673_s28, 4  ;;  %s2586_s10 = int_to_ptr.vmem [resolvable:$false] %s2585_s10 }
  0x42   : > { %s2587_s13 = scalar_lea.vmem %s2586_s10, 8192  ;;  %p2588_p4 = scmp.lt.s32.totalorder %s2824_s16, %s2586_s10 }
  0x43   : > { %p2583_p8 = pnand %p2581_p2, %p2567_p11  ;;  %p2589_p12 = scmp.lt.s32.totalorder %s2587_s13, %s2580_s23 }
  0x45   : > { %p2584_p10 = pneg %p2583_p8  ;;  %p2590_p0 = por %p2589_p12, %p2588_p4 }
  0x47   : > { %p2591_p7 = pnand %p2590_p0, %p2584_p10 }
  0x49   : > { %2594 = shalt.err (!%p2591_p7)
}
  0x4a   : > { %s2674_s17 = smov 128   ;;  %s2675_s14 = smov 8  }
  0x4b   : > { %2424 = dma.hbm_to_vmem [thread:$0]  (!%p4044_p6), %s2822_s12, 4096, %s2824_s16, %s2826_s11, %s2674_s17, %s2674_s17, %s2675_s14  }
  0x4c   : > { %p4045_p11 = scmp.ne.s32.totalorder %s4041_s7, 0 }
  0x4e   : > { %228 = sbr.rel (%p4045_p11) target bundleno = 1327 (0x52f), region = 40 }
  0x55   : > { %s2857_s25 = sand.u32 1, %s2661_s19   ;;  %p4046_p13 = scmp.ne.s32.totalorder %s4038_s29, 0 }
  0x56   : > { %s2297_s26 = sshll.u32 %s2857_s25, 8  ;;  %s231_s8 = scalar_lea.sflag [#allocation4], %s2857_s25 }
  0x57   : > { %s2863_s9 = scalar_lea.vmem [#allocation3], %s2297_s26 }
  0x58   : > { %2640 = dma.done.wait (%p4046_p13), %s231_s8, 4096  }
  0x59   : > { %2642 = vsyncadd (%p4046_p13), %s231_s8, 4294963200  ;;  %p4047_p6 = scmp.eq.s32.totalorder %s2740_s22, 0 }
  0x5b   : > { %2644 = dma.done.wait (%p4047_p6), [#allocation6], 32   ;;  %p4048_p3 = pmov %p4047_p6 }
  0x5d   : > { %2646 = vsyncadd (%p4048_p3), [#allocation6], 4294967264  ;;  %p4049_p9 = pmov %p4048_p3 }
  0x5e   : > { %p4050_p1 = pmov %p4048_p3 }
  0x5f   : > { %2648 = dma.done.wait (%p4049_p9), [#allocation9], 32  }
  0x60   : > { %2650 = vsyncadd (%p4050_p1), [#allocation9], 4294967264 }
  0x61   : > { %247 = sfence }
  0x62   : > { %v272_v0 = vld [vmem:[%s2863_s9 + $0x10] sm:$0xff]  ;;  %vm302_vm0 = vcmask 261120   ;;  %v270_v1 = vld [vmem:[%s2863_s9] sm:$0xff]  ;;  %v273_v2 = vld [vmem:[%s2863_s9 + $0x18] sm:$0xff]  ;;  %vm755_vm1 = vcmask 154712   ;;  %vm892_vm2 = vcmask 1041409  }
  0x63   : > { %v306_v3 = vsel %vm302_vm0, %v272_v0, 0.0  ;;  %v303_v4 = vsel %vm302_vm0, %v270_v1, 0.0  ;;  %v271_v5 = vld [vmem:[%s2863_s9 + $0x8] sm:$0xff]  ;;  %v308_v7 = vsel %vm302_vm0, %v273_v2, 0.0  ;;  %v286_v10 = vld [vmem:[%s2863_s9 + $0x80] sm:$0xff]  ;;  %v289_v12 = vld [vmem:[%s2863_s9 + $0x98] sm:$0xff] }
  0x64   : > { %618 = vadd.xlane.f32.xlu1 %v306_v3  ;;  %614 = vadd.xlane.f32.xlu0 %v303_v4  ;;  %v304_v6 = vsel %vm302_vm0, %v271_v5, 0.0  ;;  %v287_v9 = vld [vmem:[%s2863_s9 + $0x88] sm:$0xff]  ;;  %v288_v13 = vld [vmem:[%s2863_s9 + $0x90] sm:$0xff]  ;;  %v274_v14 = vld [vmem:[%s2863_s9 + $0x20] sm:$0xff]  ;;  %v2895_v17 = vsel %vm302_vm0, %v286_v10, 0.0  ;;  %v2901_v20 = vsel %vm302_vm0, %v286_v10, -inf }
  0x65   : > { %v305_v8 = vadd.f32 %v304_v6, %v303_v4  ;;  %v2891_v15 = vsel %vm302_vm0, %v287_v9, 0.0  ;;  %v275_v16 = vld [vmem:[%s2863_s9 + $0x28] sm:$0xff]  ;;  %v2898_v19 = vsel %vm302_vm0, %v287_v9, -inf  ;;  %v2904_v21 = vsel %vm302_vm0, %v289_v12, 0.0  ;;  %v276_v27 = vld [vmem:[%s2863_s9 + $0x30] sm:$0xff]  ;;  %v277_v34 = vld [vmem:[%s2863_s9 + $0x38] sm:$0xff] }
  0x66   : > { %v2907_v22 = vsel %vm302_vm0, %v288_v13, 0.0  ;;  %v310_v23 = vsel %vm302_vm0, %v274_v14, 0.0  ;;  %v393_v24 = vmax.f32 %v2901_v20, %v2898_v19  ;;  %v312_v25 = vsel %vm302_vm0, %v275_v16, 0.0  ;;  %v291_v39 = vld [vmem:[%s2863_s9 + $0xa8] sm:$0xff]  ;;  %v2950_v45 = vld [vmem:[%s2863_s9 + $0x40] sm:$0xff]  ;;  %v280_v60 = vld [vmem:[%s2863_s9 + $0x50] sm:$0xff] }
  0x67   : > { %v307_v11 = vadd.f32 %v306_v3, %v305_v8  ;;  %v2915_v28 = vsel %vm302_vm0, %v271_v5, -inf  ;;  %v2918_v29 = vsel %vm302_vm0, %v289_v12, -inf  ;;  %v2923_v30 = vsel %vm302_vm0, %v270_v1, -inf  ;;  %v290_v49 = vld [vmem:[%s2863_s9 + $0xa0] sm:$0xff]  ;;  %v279_v54 = vld [vmem:[%s2863_s9 + $0x48] sm:$0xff]  ;;  %v281_v1 = vld [vmem:[%s2863_s9 + $0x58] sm:$0xff] }
  0x68   : > { %620 = vadd.xlane.f32.xlu1 %v308_v7  ;;  %616 = vadd.xlane.f32.xlu0 %v304_v6  ;;  %v391_v31 = vmax.f32 %v2918_v29, %v393_v24  ;;  %v2927_v32 = vsel %vm302_vm0, %v275_v16, -inf  ;;  %v2930_v33 = vsel %vm302_vm0, %v274_v14, -inf  ;;  %v2934_v36 = vsel %vm302_vm0, %v288_v13, -inf  ;;  %v293_v3 = vld [vmem:[%s2863_s9 + $0xb8] sm:$0xff]  ;;  %v282_v8 = vld [vmem:[%s2863_s9 + $0x60] sm:$0xff]  ;;  %v292_v9 = vld [vmem:[%s2863_s9 + $0xb0] sm:$0xff] }
  0x69   : > { %v309_v18 = vadd.f32 %v308_v7, %v307_v11  ;;  %v381_v37 = vmax.f32 %v2915_v28, %v2927_v32  ;;  %v379_v38 = vmax.f32 %v2923_v30, %v2930_v33  ;;  %v314_v40 = vsel %vm302_vm0, %v276_v27, 0.0  ;;  %v283_v13 = vld [vmem:[%s2863_s9 + $0x68] sm:$0xff]  ;;  %s3394_s29 = sld [smem:[#allocation7 + $0x82]]  ;;  %s3396_s7 = sld [smem:[#allocation7 + $0x81]] }
  0x6a   : > { %v2943_v41 = vsel %vm302_vm0, %v273_v2, -inf  ;;  %v2946_v42 = vsel %vm302_vm0, %v272_v0, -inf  ;;  %v405_v43 = vmax.f32 %v2934_v36, %v391_v31  ;;  %v2953_v46 = vsel %vm302_vm0, %v291_v39, -inf  ;;  %v3014_v16 = vld [vmem:[%s2863_s9 + $0xc8] sm:$0xff]  ;;  %s3410_s15 = sld [smem:[#allocation7 + $0x84]]  ;;  %s3418_s12 = sld [smem:[#allocation7 + $0x1]] }
  0x6b   : > { %v311_v26 = vadd.f32 %v310_v23, %v309_v18  ;;  %v2956_v47 = vsel %vm302_vm0, %v277_v34, -inf  ;;  %v2959_v48 = vsel %vm302_vm0, %v276_v27, -inf  ;;  %v316_v50 = vsel %vm302_vm0, %v277_v34, 0.0  ;;  %v294_v27 = vld [vmem:[%s2863_s9 + $0xc0] sm:$0xff]  ;;  %s3427_s16 = sld [smem:[#allocation7 + $0x2]]  ;;  %s2677_s11 = smov 126  }
  0x6c   : > { %648 = vadd.xlane.f32.xlu1 %v2891_v15  ;;  %646 = vadd.xlane.f32.xlu0 %v2895_v17  ;;  %v403_v51 = vmax.f32 %v2953_v46, %v405_v43  ;;  %v385_v52 = vmax.f32 %v2943_v41, %v2956_v47  ;;  %v383_v53 = vmax.f32 %v2946_v42, %v2959_v48  ;;  %v2972_v56 = vsel %vm302_vm0, %v290_v49, -inf  ;;  %s2678_s23 = smov 127   ;;  %s3438_s28 = sld [smem:[#allocation7 + $0x4]] }
  0x6d   : > { %v313_v35 = vadd.f32 %v312_v25, %v311_v26  ;;  %v2976_v57 = vsel %vm302_vm0, %v2950_v45, 0.0  ;;  %v2982_v61 = vsel %vm302_vm0, %v279_v54, 0.0  ;;  %v2985_v63 = vsel %vm302_vm0, %v291_v39, 0.0  ;;  %v3026_v26 = vld [vmem:[%s2863_s9 + $0x70] sm:$0xff]  ;;  %s3447_s10 = sld [smem:[#allocation7 + $0x5]]  ;;  %s3465_s17 = sld [smem:[#allocation7 + $0x7]] }
  0x6e   : > { %v413_v58 = vmax.f32 %v2972_v56, %v403_v51  ;;  %v2988_v0 = vsel %vm302_vm0, %v290_v49, 0.0  ;;  %v2994_v4 = vsel %vm302_vm0, %v280_v60, 0.0  ;;  %v2998_v7 = vsel %vm302_vm0, %v293_v3, -inf  ;;  %s3458_s13 = sld [smem:[#allocation7 + $0x85]]  ;;  %s2319_s14 = sld [smem:[#allocation7 + $0x87]] }
  0x6f   : > { %v315_v44 = vadd.f32 %v314_v40, %v313_v35  ;;  %v3005_v10 = vsel %vm302_vm0, %v281_v1, 0.0  ;;  %v3009_v12 = vsel %vm302_vm0, %v292_v9, -inf  ;;  %v3030_v31 = vsel %vm302_vm0, %v283_v13, 0.0  ;;  %s2320_s8 = sld [smem:[#allocation7 + $0x8]]  ;;  %p4056_p2 = scmp.ne.s32.totalorder %s4039_s30, 0 }
  0x70   : > { %652 = vadd.xlane.f32.xlu1 %v2904_v21  ;;  %650 = vadd.xlane.f32.xlu0 %v2907_v22  ;;  %v421_v62 = vmax.f32 %v413_v58, %v385_v52  ;;  %v348_v35 = vsel %vm302_vm0, %v293_v3, 0.0  ;;  %v346_v39 = vsel %vm302_vm0, %v292_v9, 0.0  ;;  %v3036_v43 = vsel %vm302_vm0, %v294_v27, -inf }
  0x71   : > { %v317_v55 = vadd.f32 %v316_v50, %v315_v44  ;;  %v3039_v44 = vld [vmem:[%s2863_s9 + $0x78] sm:$0xff]  ;;  %v3048_v51 = vsel %vm302_vm0, %v279_v54, -inf  ;;  %vm894_vm3 = vcmask 1042434   ;;  %vm896_vm4 = vcmask 1043459  }
  0x72   : > { %v429_v5 = vmax.f32 %v421_v62, %v383_v53  ;;  %v3052_v53 = vsel %vm302_vm0, %v281_v1, -inf  ;;  %v3060_v58 = vsel %vm302_vm0, %v3039_v44, 0.0  ;;  %v3069_v1 = vsel %vm302_vm0, %v280_v60, -inf  ;;  %v296_v60 = vld [vmem:[%s2863_s9 + $0xd0] sm:$0xff] }
  0x73   : > { %v319_v59 = vadd.f32 %v2976_v57, %v317_v55  ;;  %v389_v55 = vmax.f32 %v381_v37, %v3048_v51  ;;  %vm898_vm5 = vcmask 1044484   ;;  %vm900_vm6 = vcmask 1045509  }
  0x74   : > { %624 = vadd.xlane.f32.xlu1 %v312_v25  ;;  %622 = vadd.xlane.f32.xlu0 %v310_v23  ;;  %v411_v11 = vmax.f32 %v2998_v7, %v429_v5  ;;  %v3018_v23 = vsel %vm302_vm0, %v282_v8, 0.0  ;;  %v3023_v25 = vsel %vm302_vm0, %v3014_v16, -inf  ;;  %vm902_vm7 = vcmask 1046534  }
  0x75   : > { %v321_v2 = vadd.f32 %v2982_v61, %v319_v59  ;;  %v3065_v59 = vsel %vm302_vm0, %v2950_v45, -inf  ;;  %v3082_v45 = vsel %vm302_vm0, %v283_v13, -inf  ;;  %vm904_vm8 = vcmask 1047559  }
  0x76   : > { %v419_v18 = vmax.f32 %v411_v11, %v3009_v12  ;;  %v387_v37 = vmax.f32 %v379_v38, %v3065_v59  ;;  %v397_v11 = vmax.f32 %v389_v55, %v3082_v45  ;;  %vm915_vm9 = vcmask 154648  }
  0x77   : > { %v323_v6 = vadd.f32 %v2994_v4, %v321_v2  ;;  %v297_v2 = vld [vmem:[%s2863_s9 + $0xd8] sm:$0xff]  ;;  %vm2682_vm10 = vmmov 0   ;;  %vm443_vm11 = vcmask 1040384   ;;  %vm524_vm12 = vcmask 64512  }
  0x78   : > { %656 = vadd.xlane.f32.xlu1 %v2985_v63  ;;  %654 = vadd.xlane.f32.xlu0 %v2988_v0  ;;  %v427_v34 = vmax.f32 %v419_v18, %v3023_v25 }
  0x79   : > { %v325_v14 = vadd.f32 %v3005_v10, %v323_v6  ;;  %v3079_v6 = vsel %vm302_vm0, %v297_v2, -inf }
  0x7b   : > { %v327_v24 = vadd.f32 %v3018_v23, %v325_v14  ;;  %v3091_v14 = vsel %vm302_vm0, %v296_v60, -inf }
  0x7c   : > { %628 = vadd.xlane.f32.xlu1 %v316_v50  ;;  %626 = vadd.xlane.f32.xlu0 %v314_v40  ;;  %v434_v40 = vmax.f32 %v427_v34, %v3036_v43  ;;  %v3045_v50 = vsel %vm302_vm0, %v3026_v26, 0.0 }
  0x7d   : > { %v329_v49 = vadd.f32 %v3030_v31, %v327_v24 }
  0x7e   : > { %v401_v54 = vmax.f32 %v3052_v53, %v434_v40 }
  0x7f   : > { %v331_v52 = vadd.f32 %v3045_v50, %v329_v49 }
  0x80   : > { %660 = vadd.xlane.f32.xlu1 %v348_v35  ;;  %658 = vadd.xlane.f32.xlu0 %v346_v39  ;;  %v409_v3 = vmax.f32 %v401_v54, %v3069_v1 }
  0x81   : > { %v333_v62 = vadd.f32 %v3060_v58, %v331_v52 }
  0x82   : > { %v399_v9 = vmax.f32 %v3079_v6, %v409_v3 }
  0x83   : > { %v335_v5 = vadd.f32 %v2895_v17, %v333_v62  ;;  %v3094_v17 = vsel %vm302_vm0, %v282_v8, -inf }
  0x84   : > { %920 = vmax.xlane.f32.xlu1 %v2915_v28  ;;  %918 = vmax.xlane.f32.xlu0 %v2923_v30  ;;  %v407_v13 = vmax.f32 %v399_v9, %v3091_v14  ;;  %v395_v18 = vmax.f32 %v387_v37, %v3094_v17 }
  0x85   : > { %v337_v38 = vadd.f32 %v2891_v15, %v335_v5 }
  0x86   : > { %v417_v30 = vmax.f32 %v397_v11, %v407_v13 }
  0x87   : > { %v339_v28 = vadd.f32 %v2907_v22, %v337_v38 }
  0x88   : > { %924 = vmax.xlane.f32.xlu1 %v2943_v41  ;;  %922 = vmax.xlane.f32.xlu0 %v2946_v42  ;;  %v3102_v15 = vmax.f32 %v417_v30, %v395_v18  ;;  %v354_v42 = vsel %vm302_vm0, %v296_v60, 0.0 }
  0x89   : > { %v341_v24 = vadd.f32 %v2904_v21, %v339_v28  ;;  %v350_v21 = vsel %vm302_vm0, %v294_v27, 0.0 }
  0x8b   : > { %v343_v34 = vadd.f32 %v2988_v0, %v341_v24  ;;  %v299_v0 = vld [vmem:[%s2863_s9 + $0xe8] sm:$0xff] }
  0x8c   : > { %952 = vmax.xlane.f32.xlu1 %v2898_v19  ;;  %950 = vmax.xlane.f32.xlu0 %v2901_v20  ;;  %v352_v19 = vsel %vm302_vm0, %v3014_v16, 0.0  ;;  %v301_v16 = vld [vmem:[%s2863_s9 + $0xf8] sm:$0xff] }
  0x8d   : > { %v345_v8 = vadd.f32 %v2985_v63, %v343_v34  ;;  %v298_v63 = vld [vmem:[%s2863_s9 + $0xe0] sm:$0xff]  ;;  %v364_v54 = vsel %vm302_vm0, %v301_v16, 0.0 }
  0x8f   : > { %v347_v49 = vadd.f32 %v346_v39, %v345_v8 }
  0x90   : > { %956 = vmax.xlane.f32.xlu1 %v2918_v29  ;;  %954 = vmax.xlane.f32.xlu0 %v2934_v36  ;;  %v356_v36 = vsel %vm302_vm0, %v297_v2, 0.0 }
  0x91   : > { %v349_v22 = vadd.f32 %v348_v35, %v347_v49  ;;  %v358_v35 = vsel %vm302_vm0, %v298_v63, 0.0  ;;  %v743_v49 = vlaneseq }
  0x93   : > { %v351_v41 = vadd.f32 %v350_v21, %v349_v22 }
  0x94   : > { %632 = vadd.xlane.f32.xlu1 %v2982_v61  ;;  %630 = vadd.xlane.f32.xlu0 %v2976_v57  ;;  %v300_v61 = vld [vmem:[%s2863_s9 + $0xf0] sm:$0xff]  ;;  %v360_v57 = vsel %vm302_vm0, %v299_v0, 0.0 }
  0x95   : > { %v353_v20 = vadd.f32 %v352_v19, %v351_v41  ;;  %v362_v52 = vsel %vm302_vm0, %v300_v61, 0.0  ;;  %v744_v41 = vand.u32 127, %v743_v49 }
  0x97   : > { %v355_v29 = vadd.f32 %v354_v42, %v353_v20 }
  0x98   : > { %664 = vadd.xlane.f32.xlu1 %v352_v19  ;;  %662 = vadd.xlane.f32.xlu0 %v350_v21  ;;  %v750_v19 = vadd.s32 4294967285, %v744_v41 }
  0x99   : > { %v357_v27 = vadd.f32 %v356_v36, %v355_v29  ;;  %v3232_v29 = vshrl.u32 %v743_v49, 7 }
  0x9b   : > { %v359_v39 = vadd.f32 %v358_v35, %v357_v27 }
  0x9c   : > { %928 = vmax.xlane.f32.xlu1 %v2927_v32  ;;  %926 = vmax.xlane.f32.xlu0 %v2930_v33  ;;  %v3152_v32 = vsel %vm302_vm0, %v299_v0, -inf  ;;  %v3155_v33 = vsel %vm302_vm0, %v298_v63, -inf  ;;  %v745_v63 = vadd.s32 4294967293, %v744_v41 }
  0x9d   : > { %v361_v40 = vadd.f32 %v360_v57, %v359_v39 }
  0x9f   : > { %v363_v55 = vadd.f32 %v362_v52, %v361_v40 }
  0xa0   : > { %960 = vmax.xlane.f32.xlu1 %v2953_v46  ;;  %958 = vmax.xlane.f32.xlu0 %v2972_v56  ;;  %v4033_v46 = vmov 0.0   ;;  %v3177_v56 = vsel %vm302_vm0, %v301_v16, -inf  ;;  %v3242_v16 = vsub.s32 %v745_v63, %v3232_v29 }
  0xa1   : > { %v3129_v62 = vadd.f32 %v364_v54, %v363_v55  ;;  %608 = vst [vmem:[#allocation2] sm:$0xff] %v4033_v46  ;;  %609 = vst [vmem:[#allocation2 + $0x8] sm:$0xff] %v4033_v46  ;;  %2391 = vmatprep.subr.mxu1 %v4033_v46 }
  0xa2   : > { %610 = vst [vmem:[#allocation2 + $0x10] sm:$0xff] %v4033_v46  ;;  %611 = vst [vmem:[#allocation2 + $0x18] sm:$0xff] %v4033_v46 }
  0xa3   : > { %4051 = vst [vmem:[#allocation15_spill] sm:$0xff] %v3129_v62  ;;  %612 = vst [vmem:[#allocation2 + $0x20] sm:$0xff] %v4033_v46 }
  0xa4   : > { %636 = vadd.xlane.f32.xlu1 %v3005_v10  ;;  %634 = vadd.xlane.f32.xlu0 %v2994_v4  ;;  %613 = vst [vmem:[#allocation2 + $0x28] sm:$0xff] %v4033_v46  ;;  %v3180_v4 = vsel %vm302_vm0, %v300_v61, -inf }
  0xa5   : > { %4052 = vst [vmem:[#allocation16_spill] sm:$0xff] %v3180_v4 }
  0xa8   : > { %668 = vadd.xlane.f32.xlu1 %v356_v36  ;;  %666 = vadd.xlane.f32.xlu0 %v354_v42  ;;  %v3235_v36 = vsub.s32 %v750_v19, %v3232_v29 }
  0xac   : > { %932 = vmax.xlane.f32.xlu1 %v2956_v47  ;;  %930 = vmax.xlane.f32.xlu0 %v2959_v48  ;;  %v3168_v47 = vsel %vm302_vm0, %v3039_v44, -inf  ;;  %v3172_v48 = vsel %vm302_vm0, %v3026_v26, -inf }
  0xb0   : > { %964 = vmax.xlane.f32.xlu1 %v2998_v7  ;;  %962 = vmax.xlane.f32.xlu0 %v3009_v12 }
  0xb4   : > { %640 = vadd.xlane.f32.xlu1 %v3030_v31  ;;  %638 = vadd.xlane.f32.xlu0 %v3018_v23 }
  0xb8   : > { %672 = vadd.xlane.f32.xlu1 %v360_v57  ;;  %670 = vadd.xlane.f32.xlu0 %v358_v35 }
  0xbc   : > { %936 = vmax.xlane.f32.xlu1 %v3048_v51  ;;  %934 = vmax.xlane.f32.xlu0 %v3065_v59 }
  0xc0   : > { %968 = vmax.xlane.f32.xlu1 %v3023_v25  ;;  %966 = vmax.xlane.f32.xlu0 %v3036_v43 }
  0xc4   : > { %644 = vadd.xlane.f32.xlu1 %v3060_v58  ;;  %642 = vadd.xlane.f32.xlu0 %v3045_v50 }
  0xc8   : > { %676 = vadd.xlane.f32.xlu1 %v364_v54  ;;  %674 = vadd.xlane.f32.xlu0 %v362_v52 }
  0xcc   : > { %940 = vmax.xlane.f32.xlu1 %v3052_v53  ;;  %938 = vmax.xlane.f32.xlu0 %v3069_v1 }
  0xd0   : > { %972 = vmax.xlane.f32.xlu1 %v3079_v6  ;;  %970 = vmax.xlane.f32.xlu0 %v3091_v14 }
  0xd4   : > { %944 = vmax.xlane.f32.xlu1 %v3082_v45  ;;  %942 = vmax.xlane.f32.xlu0 %v3094_v17 }
  0xd8   : > { %976 = vmax.xlane.f32.xlu1 %v3152_v32  ;;  %974 = vmax.xlane.f32.xlu0 %v3155_v33 }
  0xdc   : > { %948 = vmax.xlane.f32.xlu1 %v3168_v47  ;;  %946 = vmax.xlane.f32.xlu0 %v3172_v48 }
  0xe0   : > { %980 = vmax.xlane.f32.xlu1 %v3177_v56  ;;  %978 = vmax.xlane.f32.xlu0 %v3180_v4 }
  0xf1   : > { %v619_v7 = vpop.xlane.xlu1 %618  ;;  %v615_v10 = vpop.xlane.xlu0 %614 }
  0xf2   : > { %v681_v55 = vmul.f32 0.03125, %v619_v7  ;;  %v679_v54 = vmul.f32 0.03125, %v615_v10 }
  0xf4   : > { %v760_v7 = vrot.slane %v681_v55, %v3242_v16  ;;  %v749_v10 = vrot.slane %v679_v54, %v3242_v16 }
  0xf5   : > { %v621_v12 = vpop.xlane.xlu1 %620  ;;  %v617_v23 = vpop.xlane.xlu0 %616 }
  0xf6   : > { %v682_v35 = vmul.f32 0.03125, %v621_v12  ;;  %v680_v61 = vmul.f32 0.03125, %v617_v23 }
  0xf8   : > { %v764_v4 = vrot.slane %v682_v35, %v3235_v36  ;;  %v754_v62 = vrot.slane %v680_v61, %v3235_v36 }
  0xf9   : > { %v649_v25 = vpop.xlane.xlu1 %648  ;;  %v647_v26 = vpop.xlane.xlu0 %646 }
  0xfa   : > { %v696_v49 = vmul.f32 0.03125, %v649_v25  ;;  %v695_v41 = vmul.f32 0.03125, %v647_v26  ;;  %v765_v63 = vsel %vm755_vm1, %v764_v4, %v760_v7  ;;  %v756_v35 = vsel %vm755_vm1, %v754_v62, %v749_v10 }
  0xfc   : > { %v827_v25 = vrot.slane %v696_v49, %v3235_v36  ;;  %v823_v26 = vrot.slane %v695_v41, %v3242_v16  ;;  %v893_v49 = vsel %vm892_vm2, %v765_v63, %v756_v35 }
  0xfd   : > { %v653_v31 = vpop.xlane.xlu1 %652  ;;  %v651_v43 = vpop.xlane.xlu0 %650 }
  0xfe   : > { %v698_v39 = vmul.f32 0.03125, %v653_v31  ;;  %v697_v57 = vmul.f32 0.03125, %v651_v43 }
 0x100   : > { %v836_v12 = vrot.slane %v698_v39, %v3235_v36  ;;  %v832_v23 = vrot.slane %v697_v57, %v3242_v16 }
 0x101   : > { %v625_v44 = vpop.xlane.xlu1 %624  ;;  %v623_v50 = vpop.xlane.xlu0 %622 }
 0x102   : > { %v684_v40 = vmul.f32 0.03125, %v625_v44  ;;  %v683_v52 = vmul.f32 0.03125, %v623_v50  ;;  %v837_v61 = vsel %vm755_vm1, %v836_v12, %v832_v23 }
 0x104   : > { %v773_v31 = vrot.slane %v684_v40, %v3235_v36  ;;  %v769_v43 = vrot.slane %v683_v52, %v3242_v16  ;;  %v828_v52 = vsel %vm755_vm1, %v827_v25, %v823_v26 }
 0x105   : > { %v3184_v51 = vpop.xlane.xlu1 %656  ;;  %v3186_v53 = vpop.xlane.xlu0 %654  ;;  %v906_v4 = vsel %vm892_vm2, %v837_v61, %v828_v52 }
 0x106   : > { %v774_v39 = vsel %vm755_vm1, %v773_v31, %v769_v43  ;;  %v700_v62 = vmul.f32 0.03125, %v3184_v51 }
 0x109   : > { %v3188_v58 = vpop.xlane.xlu1 %628  ;;  %v3190_v59 = vpop.xlane.xlu0 %626 }
 0x10a   : > { %v686_v57 = vmul.f32 0.03125, %v3188_v58  ;;  %v685_v40 = vmul.f32 0.03125, %v3190_v59  ;;  %v895_v58 = vsel %vm894_vm3, %v774_v39, %v893_v49  ;;  %v699_v59 = vmul.f32 0.03125, %v3186_v53 }
 0x10d   : > { %v3192_v1 = vpop.xlane.xlu1 %660  ;;  %v3194_v2 = vpop.xlane.xlu0 %658 }
 0x10e   : > { %v702_v51 = vmul.f32 0.03125, %v3192_v1  ;;  %v701_v10 = vmul.f32 0.03125, %v3194_v2  ;;  %v845_v1 = vrot.slane %v700_v62, %v3235_v36  ;;  %v841_v2 = vrot.slane %v699_v59, %v3242_v16 }
 0x111   : > { %v3196_v37 = vpop.xlane.xlu1 %920  ;;  %v3198_v3 = vpop.xlane.xlu0 %918 }
 0x115   : > { %v3200_v5 = vpop.xlane.xlu1 %924  ;;  %v3202_v6 = vpop.xlane.xlu0 %922 }
 0x119   : > { %v3204_v45 = vpop.xlane.xlu1 %952  ;;  %v3206_v60 = vpop.xlane.xlu0 %950 }
 0x11d   : > { %v3208_v9 = vpop.xlane.xlu1 %956  ;;  %v3210_v11 = vpop.xlane.xlu0 %954 }
 0x121   : > { %v633_v38 = vpop.xlane.xlu1 %632  ;;  %v631_v14 = vpop.xlane.xlu0 %630 }
 0x122   : > { %v688_v55 = vmul.f32 0.03125, %v633_v38  ;;  %v687_v54 = vmul.f32 0.03125, %v631_v14  ;;  %v782_v38 = vrot.slane %v686_v57, %v3235_v36  ;;  %v778_v14 = vrot.slane %v685_v40, %v3242_v16 }
 0x123   : > { %v854_v57 = vrot.slane %v702_v51, %v3235_v36  ;;  %v850_v40 = vrot.slane %v701_v10, %v3242_v16 }
 0x124   : > { %v791_v25 = vrot.slane %v688_v55, %v3235_v36  ;;  %v787_v26 = vrot.slane %v687_v54, %v3242_v16 }
 0x125   : > { %v3212_v17 = vpop.xlane.xlu1 %664  ;;  %v3214_v13 = vpop.xlane.xlu0 %662  ;;  %v855_v10 = vsel %vm755_vm1, %v854_v57, %v850_v40 }
 0x126   : > { %v704_v53 = vmul.f32 0.03125, %v3212_v17  ;;  %v792_v52 = vsel %vm755_vm1, %v791_v25, %v787_v26 }
 0x128   : > { %v863_v55 = vrot.slane %v704_v53, %v3235_v36 }
 0x129   : > { %v3216_v18 = vpop.xlane.xlu1 %928  ;;  %v3218_v28 = vpop.xlane.xlu0 %926 }
 0x12d   : > { %v3220_v30 = vpop.xlane.xlu1 %960  ;;  %v3222_v24 = vpop.xlane.xlu0 %958 }
 0x131   : > { %v637_v34 = vpop.xlane.xlu1 %636  ;;  %v635_v8 = vpop.xlane.xlu0 %634 }
 0x132   : > { %v690_v23 = vmul.f32 0.03125, %v637_v34  ;;  %v689_v31 = vmul.f32 0.03125, %v635_v8  ;;  %v703_v34 = vmul.f32 0.03125, %v3214_v13 }
 0x134   : > { %v800_v35 = vrot.slane %v690_v23, %v3235_v36  ;;  %v796_v61 = vrot.slane %v689_v31, %v3242_v16  ;;  %v859_v54 = vrot.slane %v703_v34, %v3242_v16 }
 0x135   : > { %v3224_v22 = vpop.xlane.xlu1 %668  ;;  %v3226_v21 = vpop.xlane.xlu0 %666 }
 0x136   : > { %v706_v8 = vmul.f32 0.03125, %v3224_v22  ;;  %v705_v63 = vmul.f32 0.03125, %v3226_v21  ;;  %v783_v21 = vsel %vm755_vm1, %v782_v38, %v778_v14 }
 0x137   : > { %v897_v14 = vsel %vm896_vm4, %v783_v21, %v895_v58 }
 0x138   : > { %v872_v49 = vrot.slane %v706_v8, %v3235_v36  ;;  %v868_v62 = vrot.slane %v705_v63, %v3242_v16  ;;  %v899_v25 = vsel %vm898_vm5, %v792_v52, %v897_v14  ;;  %v864_v8 = vsel %vm755_vm1, %v863_v55, %v859_v54 }
 0x139   : > { %v3228_v20 = vpop.xlane.xlu1 %932  ;;  %v3230_v42 = vpop.xlane.xlu0 %930  ;;  %v1017_v14 = vrot.slane %v3198_v3, %v3242_v16  ;;  %v1098_v3 = vrot.slane %v3210_v11, %v3242_v16  ;;  %v1107_v11 = vrot.slane %v3222_v24, %v3242_v16 }
 0x13a   : > { %v873_v63 = vsel %vm755_vm1, %v872_v49, %v868_v62 }
 0x13d   : > { %v3237_v0 = vpop.xlane.xlu1 %964  ;;  %v3239_v27 = vpop.xlane.xlu0 %962 }
 0x13e   : > { %v1120_v24 = vrot.slane %v3237_v0, %v3235_v36 }
 0x141   : > { %v641_v46 = vpop.xlane.xlu1 %640  ;;  %v639_v19 = vpop.xlane.xlu0 %638 }
 0x142   : > { %v692_v43 = vmul.f32 0.03125, %v641_v46  ;;  %v691_v7 = vmul.f32 0.03125, %v639_v19 }
 0x144   : > { %v809_v17 = vrot.slane %v692_v43, %v3235_v36  ;;  %v805_v13 = vrot.slane %v691_v7, %v3242_v16 }
 0x145   : > { %v673_v44 = vpop.xlane.xlu1 %672  ;;  %v671_v50 = vpop.xlane.xlu0 %670 }
 0x146   : > { %v708_v22 = vmul.f32 0.03125, %v673_v44  ;;  %v707_v39 = vmul.f32 0.03125, %v671_v50  ;;  %v846_v44 = vsel %vm755_vm1, %v845_v1, %v841_v2  ;;  %v801_v50 = vsel %vm755_vm1, %v800_v35, %v796_v61 }
 0x147   : > { %v810_v43 = vsel %vm755_vm1, %v809_v17, %v805_v13  ;;  %v907_v34 = vsel %vm894_vm3, %v846_v44, %v906_v4  ;;  %v901_v58 = vsel %vm900_vm6, %v801_v50, %v899_v25  ;;  %v1026_v44 = vrot.slane %v3202_v6, %v3242_v16 }
 0x148   : > { %v881_v7 = vrot.slane %v708_v22, %v3235_v36  ;;  %v877_v51 = vrot.slane %v707_v39, %v3242_v16  ;;  %v903_v35 = vsel %vm902_vm7, %v810_v43, %v901_v58  ;;  %v908_v22 = vsel %vm896_vm4, %v855_v10, %v907_v34 }
 0x149   : > { %v3264_v41 = vpop.xlane.xlu1 %936  ;;  %v3266_v12 = vpop.xlane.xlu0 %934  ;;  %v909_v21 = vsel %vm898_vm5, %v864_v8, %v908_v22  ;;  %v1039_v43 = vrot.slane %v3216_v18, %v3235_v36  ;;  %v1089_v6 = vrot.slane %v3206_v60, %v3242_v16  ;;  %v1048_v18 = vrot.slane %v3228_v20, %v3235_v36 }
 0x14a   : > { %v882_v39 = vsel %vm755_vm1, %v881_v7, %v877_v51  ;;  %v910_v52 = vsel %vm900_vm6, %v873_v63, %v909_v21  ;;  %v1035_v7 = vrot.slane %v3218_v28, %v3242_v16  ;;  %v1044_v28 = vrot.slane %v3230_v42, %v3242_v16 }
 0x14b   : > { %v911_v49 = vsel %vm902_vm7, %v882_v39, %v910_v52  ;;  %v1057_v60 = vrot.slane %v3264_v41, %v3235_v36 }
 0x14d   : > { %v3280_v46 = vpop.xlane.xlu1 %968  ;;  %v3282_v19 = vpop.xlane.xlu0 %966 }
 0x151   : > { %v645_v59 = vpop.xlane.xlu1 %644  ;;  %v643_v23 = vpop.xlane.xlu0 %642 }
 0x152   : > { %v694_v31 = vmul.f32 0.03125, %v645_v59  ;;  %v693_v38 = vmul.f32 0.03125, %v643_v23  ;;  %v1030_v23 = vrot.slane %v3200_v5, %v3235_v36  ;;  %v1093_v5 = vrot.slane %v3204_v45, %v3235_v36 }
 0x153   : > { %v1040_v45 = vsel %vm755_vm1, %v1039_v43, %v1035_v7 }
 0x154   : > { %v818_v26 = vrot.slane %v694_v31, %v3235_v36  ;;  %v814_v53 = vrot.slane %v693_v38, %v3242_v16  ;;  %v1021_v38 = vrot.slane %v3196_v37, %v3235_v36  ;;  %v1031_v51 = vsel %vm755_vm1, %v1030_v23, %v1026_v44 }
 0x155   : > { %v677_v1 = vpop.xlane.xlu1 %676  ;;  %v675_v2 = vpop.xlane.xlu0 %674  ;;  %v1102_v37 = vrot.slane %v3208_v9, %v3235_v36  ;;  %v1111_v9 = vrot.slane %v3220_v30, %v3235_v36  ;;  %v1094_v8 = vsel %vm755_vm1, %v1093_v5, %v1089_v6  ;;  %v1049_v30 = vsel %vm755_vm1, %v1048_v18, %v1044_v28 }
 0x156   : > { %v819_v61 = vsel %vm755_vm1, %v818_v26, %v814_v53  ;;  %v710_v17 = vmul.f32 0.03125, %v677_v1  ;;  %v709_v13 = vmul.f32 0.03125, %v675_v2  ;;  %v1022_v26 = vsel %vm755_vm1, %v1021_v38, %v1017_v14 }
 0x157   : > { %v905_v4 = vsel %vm904_vm8, %v819_v61, %v903_v35  ;;  %v1053_v53 = vrot.slane %v3266_v12, %v3242_v16  ;;  %v1158_v34 = vsel %vm892_vm2, %v1031_v51, %v1022_v26  ;;  %v1103_v1 = vsel %vm755_vm1, %v1102_v37, %v1098_v3 }
 0x158   : > { %916 = vst.msk [vmem:[#allocation2 + $0x3] sm:$0xff] %vm915_vm9, %v905_v4  ;;  %v890_v57 = vrot.slane %v710_v17, %v3235_v36  ;;  %v886_v40 = vrot.slane %v709_v13, %v3242_v16  ;;  %v1116_v2 = vrot.slane %v3239_v27, %v3242_v16  ;;  %v1159_v35 = vsel %vm894_vm3, %v1040_v45, %v1158_v34 }
 0x159   : > { %v941_v55 = vpop.xlane.xlu1 %940  ;;  %v939_v54 = vpop.xlane.xlu0 %938  ;;  %v1058_v61 = vsel %vm755_vm1, %v1057_v60, %v1053_v53  ;;  %v1129_v17 = vrot.slane %v3280_v46, %v3235_v36  ;;  %v1125_v13 = vrot.slane %v3282_v19, %v3242_v16  ;;  %v1112_v22 = vsel %vm755_vm1, %v1111_v9, %v1107_v11 }
 0x15a   : > { %v891_v62 = vsel %vm755_vm1, %v890_v57, %v886_v40  ;;  %v1066_v20 = vrot.slane %v941_v55, %v3235_v36  ;;  %v1062_v42 = vrot.slane %v939_v54, %v3242_v16  ;;  %v1160_v27 = vsel %vm896_vm4, %v1049_v30, %v1159_v35 }
 0x15b   : > { %v912_v59 = vsel %vm904_vm8, %v891_v62, %v911_v49  ;;  %v1121_v19 = vsel %vm755_vm1, %v1120_v24, %v1116_v2  ;;  %v1161_v55 = vsel %vm898_vm5, %v1058_v61, %v1160_v27  ;;  %v1165_v62 = vsel %vm892_vm2, %v1103_v1, %v1094_v8 }
 0x15c   : > { %917 = vst.msk [vmem:[#allocation2 + $0xb] sm:$0xff] %vm915_vm9, %v912_v59  ;;  %v1067_v39 = vsel %vm755_vm1, %v1066_v20, %v1062_v42  ;;  %v1130_v59 = vsel %vm755_vm1, %v1129_v17, %v1125_v13  ;;  %v1166_v44 = vsel %vm894_vm3, %v1112_v22, %v1165_v62  ;;  %v1240_v26 = vstv %s3394_s29  ;;  %s2321_s29 = sld [smem:[#allocation7 + $0x88]] }
 0x15d   : > { %v973_v50 = vpop.xlane.xlu1 %972  ;;  %v971_v31 = vpop.xlane.xlu0 %970  ;;  %v1162_v23 = vsel %vm900_vm6, %v1067_v39, %v1161_v55  ;;  %v1167_v14 = vsel %vm896_vm4, %v1121_v19, %v1166_v44  ;;  %v1212_v45 = vstv %s3396_s7  ;;  %v1284_v9 = vstv %s3410_s15  ;;  %s1185_s7 = sld [smem:[#allocation7]] }
 0x15e   : > { %v1138_v4 = vrot.slane %v973_v50, %v3235_v36  ;;  %v1134_v0 = vrot.slane %v971_v31, %v3242_v16  ;;  %v1168_v6 = vsel %vm898_vm5, %v1130_v59, %v1167_v14  ;;  %v1198_v8 = vstv %s3418_s12  ;;  %s3509_s15 = sld [smem:[#allocation7 + $0x80]] }
 0x15f   : > { %v3435_v34 = vld [vmem:[#allocation2 + $0x2] sm:$0xff]  ;;  %v1270_v2 = vstv %s3438_s28  ;;  %v1298_v13 = vstv %s3447_s10  ;;  %v1356_v55 = vstv %s2319_s14  ;;  %v1370_v62 = vstv %s2320_s8  ;;  %s1177_s12 = sld [smem:[#allocation8]]  ;;  %s3519_s28 = sld [smem:[#allocation7 + $0x83]] }
 0x160   : > { %v1139_v50 = vsel %vm755_vm1, %v1138_v4, %v1134_v0  ;;  %v3453_v24 = vld [vmem:[#allocation2 + $0x3] sm:$0xff]  ;;  %v1312_v4 = vstv %s3458_s13  ;;  %s3523_s10 = sld [smem:[#allocation7 + $0x6]]  ;;  %s3548_s14 = sld [smem:[#allocation7 + $0x8a]] }
 0x161   : > { %v945_v10 = vpop.xlane.xlu1 %944  ;;  %v943_v25 = vpop.xlane.xlu0 %942  ;;  %v1169_v37 = vsel %vm900_vm6, %v1139_v50, %v1168_v6  ;;  %v1271_v61 = vmul.f32 %v1270_v2, %v3453_v24  ;;  %v1299_v22 = vmul.f32 %v1298_v13, %v3453_v24  ;;  %s3528_s13 = sld [smem:[#allocation7 + $0x86]]  ;;  %s3552_s8 = sld [smem:[#allocation7 + $0x8b]] }
 0x162   : > { %v1075_v58 = vrot.slane %v945_v10, %v3235_v36  ;;  %v1071_v41 = vrot.slane %v943_v25, %v3242_v16  ;;  %v1384_v50 = vstv %s2321_s29  ;;  %s3556_s29 = sld [smem:[#allocation7 + $0x8d]] }
 0x163   : > { %v3456_v35 = vld [vmem:[#allocation2 + $0xa] sm:$0xff] }
 0x164   : > { %v1076_v21 = vsel %vm755_vm1, %v1075_v58, %v1071_v41  ;;  %v1199_v58 = vmul.f32 %v1198_v8, %v3435_v34  ;;  %v1200_v17 = vmul.f32 %v1198_v8, %v3456_v35  ;;  %v3472_v0 = vld [vmem:[#allocation2 + $0xb] sm:$0xff] }
 0x165   : > { %v977_v63 = vpop.xlane.xlu1 %976  ;;  %v975_v12 = vpop.xlane.xlu0 %974  ;;  %v1163_v31 = vsel %vm902_vm7, %v1076_v21, %v1162_v23  ;;  %v1272_v21 = vmul.f32 %v1270_v2, %v3472_v0  ;;  %v3491_v59 = vld [vmem:[#allocation2 + $0xc] sm:$0xff] }
 0x166   : > { %v1147_v57 = vrot.slane %v977_v63, %v3235_v36  ;;  %v1143_v40 = vrot.slane %v975_v12, %v3242_v16  ;;  %v1226_v63 = vstv %s3427_s16  ;;  %s3511_s16 = sld [smem:[#allocation8 + $0x80]] }
 0x167   : > { %v1227_v1 = vmul.f32 %v1226_v63, %v3435_v34  ;;  %v1228_v39 = vmul.f32 %v1226_v63, %v3456_v35 }
 0x168   : > { %v1148_v43 = vsel %vm755_vm1, %v1147_v57, %v1143_v40  ;;  %v3478_v57 = vld [vmem:[#allocation2 + $0x4] sm:$0xff]  ;;  %v1342_v40 = vstv %s3465_s17  ;;  %s2679_s17 = smov 1  }
 0x169   : > { %v949_v46 = vpop.xlane.xlu1 %948  ;;  %v947_v52 = vpop.xlane.xlu0 %946  ;;  %v1170_v3 = vsel %vm902_vm7, %v1148_v43, %v1169_v37  ;;  %v1371_v23 = vmul.f32 %v1370_v62, %v3478_v57  ;;  %v1344_v44 = vmul.f32 %v1342_v40, %v3491_v59  ;;  %v1372_v43 = vmul.f32 %v1370_v62, %v3491_v59 }
 0x16a   : > { %v1084_v54 = vrot.slane %v949_v46, %v3235_v36  ;;  %v1080_v49 = vrot.slane %v947_v52, %v3242_v16  ;;  %v1343_v46 = vmul.f32 %v1342_v40, %v3478_v57  ;;  %v1300_v52 = vmul.f32 %v1298_v13, %v3472_v0 }
 0x16b   : > { %v1186_v37 = vstv %s1185_s7  ;;  %s3603_s7 = sld [smem:[#allocation7 + $0xb]] }
 0x16c   : > { %v1085_v38 = vsel %vm755_vm1, %v1084_v54, %v1080_v49  ;;  %v1188_v2 = vmul.f32 %v1186_v37, %v3456_v35 }
 0x16d   : > { %v1164_v7 = vsel %vm904_vm8, %v1085_v38, %v1163_v31  ;;  %v981_v51 = vpop.xlane.xlu1 %980  ;;  %v979_v5 = vpop.xlane.xlu0 %978 }
 0x16e   : > { %1175 = vst.msk [vmem:[#allocation2 + $0x1b] sm:$0xff] %vm915_vm9, %v1164_v7  ;;  %v1156_v10 = vrot.slane %v981_v51, %v3235_v36  ;;  %v1152_v25 = vrot.slane %v979_v5, %v3242_v16 }
 0x170   : > { %v1157_v18 = vsel %vm755_vm1, %v1156_v10, %v1152_v25 }
 0x171   : > { %v1171_v28 = vsel %vm904_vm8, %v1157_v18, %v1170_v3  ;;  %v1192_v18 = vstv %s3509_s15  ;;  %s3613_s15 = sld [smem:[#allocation7 + $0xd]] }
 0x172   : > { %1176 = vst.msk [vmem:[#allocation2 + $0x23] sm:$0xff] %vm915_vm9, %v1171_v28  ;;  %v1187_v28 = vmul.f32 %v1186_v37, %v3435_v34 }
 0x175   : > { %v3420_v36 = vld [vmem:[#allocation2 + $0x1a] sm:$0xff] }
 0x176   : > { %v1241_v16 = vmul.f32 %v1240_v26, %v3420_v36  ;;  %v1213_v60 = vmul.f32 %v1212_v45, %v3420_v36  ;;  %v3424_v53 = vld [vmem:[#allocation2 + $0x1b] sm:$0xff] }
 0x177   : > { %v1285_v20 = vmul.f32 %v1284_v9, %v3424_v53  ;;  %v1313_v27 = vmul.f32 %v1312_v4, %v3424_v53 }
 0x178   : > { %1245 = vrot.lane.b32.xlu0 %v1241_v16, %s2677_s11  ;;  %1217 = vrot.lane.b32.xlu1 %v1213_v60, %s2678_s23  ;;  %v1193_v60 = vmul.f32 %v1192_v18, %v3420_v36 }
 0x179   : > { %v3431_v11 = vld [vmem:[#allocation2 + $0x22] sm:$0xff] }
 0x17a   : > { %v1214_v42 = vmul.f32 %v1212_v45, %v3431_v11  ;;  %v1242_v41 = vmul.f32 %v1240_v26, %v3431_v11  ;;  %v3445_v12 = vld [vmem:[#allocation2 + $0x23] sm:$0xff]  ;;  %v1178_v26 = vstv %s1177_s12  ;;  %s3622_s12 = sld [smem:[#allocation7 + $0xe]] }
 0x17b   : > { %v1286_v30 = vmul.f32 %v1284_v9, %v3445_v12  ;;  %v3485_v19 = vld [vmem:[#allocation2 + $0x1c] sm:$0xff]  ;;  %v1314_v49 = vmul.f32 %v1312_v4, %v3445_v12  ;;  %v3497_v31 = vld [vmem:[#allocation2 + $0x24] sm:$0xff]  ;;  %v1180_v9 = vstv %s3511_s16  ;;  %s2338_s16 = sld [smem:[#allocation7 + $0x10]] }
 0x17c   : > { %1289 = vrot.lane.b32.xlu0 %v1285_v20, %s2678_s23  ;;  %1219 = vrot.lane.b32.xlu1 %v1214_v42, %s2678_s23  ;;  %v1357_v54 = vmul.f32 %v1356_v55, %v3485_v19  ;;  %v1385_v38 = vmul.f32 %v1384_v50, %v3485_v19  ;;  %v1358_v14 = vmul.f32 %v1356_v55, %v3497_v31 }
 0x17d   : > { %v1386_v7 = vmul.f32 %v1384_v50, %v3497_v31  ;;  %v1189_v20 = vadd.f32 %v1187_v28, %v1178_v26 }
 0x180   : > { %1203 = vrot.lane.b32.xlu0 %v1199_v58, %s2678_s23  ;;  %1247 = vrot.lane.b32.xlu1 %v1242_v41, %s2677_s11  ;;  %v1195_v58 = vadd.f32 %v1193_v60, %v1180_v9 }
 0x184   : > { %1231 = vrot.lane.b32.xlu0 %v1227_v1, %s2677_s11  ;;  %1291 = vrot.lane.b32.xlu1 %v1286_v30, %s2678_s23 }
 0x188   : > { %1275 = vrot.lane.b32.xlu0 %v1271_v61, %s2678_s23  ;;  %1205 = vrot.lane.b32.xlu1 %v1200_v17, %s2678_s23  ;;  %v1264_v17 = vstv %s3519_s28  ;;  %s2341_s28 = sld [smem:[#allocation7 + $0x91]] }
 0x189   : > { %v1265_v40 = vmul.f32 %v1264_v17, %v3424_v53  ;;  %v1336_v53 = vstv %s3528_s13  ;;  %s3668_s13 = sld [smem:[#allocation7 + $0x9]] }
 0x18c   : > { %1303 = vrot.lane.b32.xlu0 %v1299_v22, %s2677_s11  ;;  %1233 = vrot.lane.b32.xlu1 %v1228_v39, %s2677_s11  ;;  %v1194_v22 = vmul.f32 %v1192_v18, %v3431_v11  ;;  %v1190_v39 = vadd.f32 %v1188_v2, %v1178_v26 }
 0x190   : > { %1317 = vrot.lane.b32.xlu0 %v1313_v27, %s2677_s11  ;;  %1277 = vrot.lane.b32.xlu1 %v1272_v21, %s2678_s23 }
 0x194   : > { %1347 = vrot.lane.b32.xlu0 %v1343_v46, %s2678_s23  ;;  %1305 = vrot.lane.b32.xlu1 %v1300_v52, %s2677_s11  ;;  %v1196_v46 = vadd.f32 %v1194_v22, %v1180_v9  ;;  %v4053_v22 = vld [vmem:[#allocation15_spill] sm:$0xff] }
 0x198   : > { %1361 = vrot.lane.b32.xlu0 %v1357_v54, %s2678_s23  ;;  %1319 = vrot.lane.b32.xlu1 %v1314_v49, %s2677_s11  ;;  %v1330_v49 = vstv %s3523_s10  ;;  %s3666_s10 = sld [smem:[#allocation7 + $0x89]] }
 0x19c   : > { %1375 = vrot.lane.b32.xlu0 %v1371_v23, %s2677_s11  ;;  %1349 = vrot.lane.b32.xlu1 %v1344_v44, %s2678_s23 }
 0x1a0   : > { %1389 = vrot.lane.b32.xlu0 %v1385_v38, %s2677_s11  ;;  %1363 = vrot.lane.b32.xlu1 %v1358_v14, %s2678_s23  ;;  %s3514_s23 = sld [smem:[#allocation7 + $0x3]] }
 0x1a4   : > { %1377 = vrot.lane.b32.xlu1 %v1372_v43, %s2677_s11  ;;  %v1331_v43 = vmul.f32 %v1330_v49, %v3478_v57  ;;  %v1332_v57 = vmul.f32 %v1330_v49, %v3491_v59  ;;  %v433_v59 = vmax.f32 %v3102_v15, %v3152_v32 }
 0x1a6   : > { %v1258_v63 = vstv %s3514_s23  ;;  %s3569_s23 = sld [smem:[#allocation7 + $0x8e]] }
 0x1a7   : > { %v1259_v36 = vmul.f32 %v1258_v63, %v3453_v24  ;;  %v1260_v11 = vmul.f32 %v1258_v63, %v3472_v0 }
 0x1a8   : > { %1391 = vrot.lane.b32.xlu1 %v1386_v7, %s2677_s11 }
 0x1ea   : > { %v1218_v51 = vpop.permute.xlu1 %1217  ;;  %v1246_v5 = vpop.permute.xlu0 %1245 }
 0x1eb   : > { %v1223_v1 = vadd.f32 %v1218_v51, %v1195_v58 }
 0x1ed   : > { %v1251_v13 = vadd.f32 %v1246_v5, %v1223_v1  ;;  %v1266_v5 = vmul.f32 %v1264_v17, %v3445_v12  ;;  %v1338_v1 = vmul.f32 %v1336_v53, %v3497_v31 }
 0x1ee   : > { %v1220_v6 = vpop.permute.xlu1 %1219  ;;  %v1290_v10 = vpop.permute.xlu0 %1289 }
 0x1ef   : > { %v1267_v52 = vadd.f32 %v1265_v40, %v1251_v13  ;;  %v1224_v23 = vadd.f32 %v1220_v6, %v1196_v46  ;;  %v1337_v6 = vmul.f32 %v1336_v53, %v3485_v19  ;;  %v1452_v40 = vstv %s3548_s14  ;;  %v446_v46 = vld [vmem:[%s4023_s1 + $0x8] sm:$0xff]  ;;  %s3582_s14 = sld [smem:[#allocation7 + $0x90]] }
 0x1f1   : > { %v1295_v50 = vadd.f32 %v1290_v10, %v1267_v52 }
 0x1f2   : > { %v1248_v25 = vpop.permute.xlu1 %1247  ;;  %v1204_v3 = vpop.permute.xlu0 %1203 }
 0x1f3   : > { %v1209_v41 = vadd.f32 %v1204_v3, %v1189_v20  ;;  %v1252_v38 = vadd.f32 %v1248_v25, %v1224_v23 }
 0x1f5   : > { %v1268_v18 = vadd.f32 %v1266_v5, %v1252_v38 }
 0x1f6   : > { %v1292_v45 = vpop.permute.xlu1 %1291  ;;  %v1232_v16 = vpop.permute.xlu0 %1231 }
 0x1f7   : > { %v1237_v30 = vadd.f32 %v1232_v16, %v1209_v41  ;;  %v1296_v9 = vadd.f32 %v1292_v45, %v1268_v18 }
 0x1f9   : > { %v1261_v4 = vadd.f32 %v1259_v36, %v1237_v30  ;;  %v415_v36 = vmax.f32 %v3155_v33, %v433_v59 }
 0x1fa   : > { %v1206_v42 = vpop.permute.xlu1 %1205  ;;  %v1276_v8 = vpop.permute.xlu0 %1275 }
 0x1fb   : > { %v1210_v35 = vadd.f32 %v1206_v42, %v1190_v39  ;;  %v1281_v55 = vadd.f32 %v1276_v8, %v1261_v4  ;;  %v423_v17 = vmax.f32 %v415_v36, %v3168_v47  ;;  %v366_v39 = vrot.slane %v4053_v22, 4  ;;  %v4054_v4 = vld [vmem:[#allocation16_spill] sm:$0xff] }
 0x1fd   : > { %v431_v13 = vmax.f32 %v423_v17, %v3172_v48  ;;  %v367_v15 = vadd.f32 %v366_v39, %v4053_v22  ;;  %v1538_v17 = vstv %s3622_s12  ;;  %s2358_s12 = sld [smem:[#allocation7 + $0x19]] }
 0x1fe   : > { %v1234_v34 = vpop.permute.xlu1 %1233  ;;  %v1304_v61 = vpop.permute.xlu0 %1303 }
 0x1ff   : > { %v1238_v54 = vadd.f32 %v1234_v34, %v1210_v35  ;;  %v1309_v44 = vadd.f32 %v1304_v61, %v1281_v55  ;;  %v435_v31 = vmax.f32 %v431_v13, %v3177_v56  ;;  %v368_v47 = vrot.slane %v367_v15, 2  ;;  %v445_v35 = vld [vmem:[%s4023_s1] sm:$0xff] }
 0x200   : > { %v2680_v55 = vmov 0.0|0.0  }
 0x201   : > { %v1262_v14 = vadd.f32 %v1260_v11, %v1238_v54  ;;  %v1333_v3 = vadd.f32 %v1331_v43, %v1309_v44  ;;  %v369_v52 = vadd.f32 %v368_v47, %v367_v15  ;;  %2396 = vmatprep.subr.bf16.mxu0 %v2680_v55  ;;  %v2397_v54 = vpack.c.bf16 %v446_v46, %v445_v35  ;;  %v447_v11 = vld [vmem:[%s4023_s1 + $0x10] sm:$0xff] }
 0x202   : > { %v1278_v27 = vpop.permute.xlu1 %1277  ;;  %v1318_v21 = vpop.permute.xlu0 %1317  ;;  %v1480_v44 = vstv %s3552_s8  ;;  %s2681_s8 = smov 124  }
 0x203   : > { %v1323_v37 = vadd.f32 %v1318_v21, %v1295_v50  ;;  %v1282_v28 = vadd.f32 %v1278_v27, %v1262_v14  ;;  %v436_v27 = vmax.f32 %v4054_v4, %v435_v31  ;;  %2398 = vmatpush3.bf16.msra.mxu0 %v2397_v54  ;;  %v448_v50 = vld [vmem:[%s4023_s1 + $0x18] sm:$0xff]  ;;  %v370_v38 = vrot.slane %v369_v52, 1 }
 0x204   : > { %2399 = vmatprep.subr.bf16.mxu0 %v2680_v55  ;;  %v2400_v14 = vpack.c.bf16 %v448_v50, %v447_v11  ;;  %v1582_v4 = vstv %s2338_s16  ;;  %v1426_v11 = vstv %s3668_s13  ;;  %s3714_s13 = sld [smem:[#allocation7 + $0x97]]  ;;  %s2360_s16 = sld [smem:[#allocation7 + $0x1a]] }
 0x205   : > { %v1339_v10 = vadd.f32 %v1337_v6, %v1323_v37  ;;  %v437_v32 = vrot.slane %v436_v27, 4  ;;  %v371_v5 = vadd.f32 %v370_v38, %v369_v52  ;;  %v1552_v6 = vstv %s3569_s23  ;;  %s2340_s23 = sld [smem:[#allocation7 + $0x11]] }
 0x206   : > { %v1306_v24 = vpop.permute.xlu1 %1305  ;;  %v1348_v62 = vpop.permute.xlu0 %1347 }
 0x207   : > { %v1353_v26 = vadd.f32 %v1348_v62, %v1333_v3  ;;  %v1310_v0 = vadd.f32 %v1306_v24, %v1282_v28  ;;  %v438_v48 = vmax.f32 %v436_v27, %v437_v32  ;;  %2401 = vmatpush3.bf16.msra.mxu0 %v2400_v14  ;;  %v4055_v3 = vmov 0.0  }
 0x208   : > { %2388 = vmatprep.mubr.msk.f32.mxu0 %vm2682_vm10, %v4055_v3  ;;  %2393 = vmatprep.mubr.msk.f32.mxu1 %vm2682_vm10, %v4055_v3 }
 0x209   : > { %v1334_v58 = vadd.f32 %v1332_v57, %v1310_v0  ;;  %v439_v24 = vrot.slane %v438_v48, 2 }
 0x20a   : > { %v1320_v7 = vpop.permute.xlu1 %1319  ;;  %v1362_v51 = vpop.permute.xlu0 %1361 }
 0x20b   : > { %v1367_v20 = vadd.f32 %v1362_v51, %v1339_v10  ;;  %v1324_v8 = vadd.f32 %v1320_v7, %v1296_v9  ;;  %v440_v43 = vmax.f32 %v438_v48, %v439_v24  ;;  %v1524_v51 = vstv %s3556_s29  ;;  %s3592_s29 = sld [smem:[#allocation7 + $0xa]] }
 0x20c   : > { %v1610_v15 = vstv %s2340_s23  ;;  %v1624_v48 = vstv %s2341_s28  ;;  %s2347_s23 = sld [smem:[#allocation7 + $0x93]]  ;;  %s2349_s28 = sld [smem:[#allocation7 + $0x94]] }
 0x20d   : > { %v1340_v30 = vadd.f32 %v1338_v1, %v1324_v8  ;;  %v441_v18 = vrot.slane %v440_v43, 1 }
 0x20e   : > { %v1350_v16 = vpop.permute.xlu1 %1349  ;;  %v1376_v60 = vpop.permute.xlu0 %1375 }
 0x20f   : > { %v1381_v25 = vadd.f32 %v1376_v60, %v1353_v26  ;;  %v1354_v63 = vadd.f32 %v1350_v16, %v1334_v58  ;;  %v373_v16 = vmul.f32 0.00390625, %v371_v5  ;;  %v442_v60 = vmax.f32 %v440_v43, %v441_v18 }
 0x211   : > { %1399 = vrot.lane.b32.xlu0 %v1381_v25, %s2679_s17  ;;  %v444_v57 = vsel %vm443_vm11, %v373_v16, %v442_v60  ;;  %v1438_v58 = vstv %s3592_s29  ;;  %s3685_s29 = sld [smem:[#allocation7 + $0xf]] }
 0x212   : > { %v1364_v42 = vpop.permute.xlu1 %1363  ;;  %v1390_v12 = vpop.permute.xlu0 %1389  ;;  %2389 = vmatmul.mubr.msk.f32.vlgmr.msra.gmra.mrb[0].mxu0 %vm302_vm0, %v444_v57 }
 0x213   : > { %v1395_v41 = vadd.f32 %v1390_v12, %v1367_v20  ;;  %v1368_v34 = vadd.f32 %v1364_v42, %v1340_v30  ;;  %v1596_v20 = vstv %s3582_s14  ;;  %s3674_s14 = sld [smem:[#allocation7 + $0xc]] }
 0x215   : > { %1409 = vrot.lane.b32.xlu0 %v1395_v41, %s2679_s17 }
 0x216   : > { %v1378_v19 = vpop.permute.xlu1 %1377 }
 0x217   : > { %v1382_v2 = vadd.f32 %v1378_v19, %v1354_v63  ;;  %v1466_v19 = vstv %s3603_s7  ;;  %s3691_s7 = sld [smem:[#allocation7 + $0x8f]] }
 0x219   : > { %1401 = vrot.lane.b32.xlu1 %v1382_v2, %s2679_s17 }
 0x21a   : > { %v1392_v45 = vpop.permute.xlu1 %1391 }
 0x21b   : > { %v1396_v61 = vadd.f32 %v1392_v45, %v1368_v34 }
 0x21d   : > { %1411 = vrot.lane.b32.xlu1 %v1396_v61, %s2679_s17  ;;  %v1510_v61 = vstv %s3613_s15  ;;  %s3672_s17 = sld [smem:[#allocation8 + $0x1]]  ;;  %s2683_s15 = smov 2  }
 0x283   : > { %v1400_v21 = vpop.permute.xlu0 %1399 }
 0x284   : > { %1405 = vst.msk [vmem:[#allocation2 + $0x3] sm:$0xff] %vm915_vm9, %v1400_v21 }
 0x287   : > { %v1410_v33 = vpop.permute.xlu0 %1409 }
 0x288   : > { %1415 = vst.msk [vmem:[#allocation2 + $0x1b] sm:$0xff] %vm915_vm9, %v1410_v33 }
 0x28b   : > { %v1402_v56 = vpop.permute.xlu1 %1401  ;;  %v3610_v8 = vld [vmem:[#allocation2 + $0x1] sm:$0xff] }
 0x28c   : > { %1406 = vst.msk [vmem:[#allocation2 + $0xb] sm:$0xff] %vm915_vm9, %v1402_v56  ;;  %v1439_v63 = vmul.f32 %v1438_v58, %v3610_v8  ;;  %v1467_v2 = vmul.f32 %v1466_v19, %v3610_v8  ;;  %v3630_v45 = vld [vmem:[#allocation2 + $0x3] sm:$0xff]  ;;  %v1427_v43 = vmul.f32 %v1426_v11, %v3610_v8 }
 0x28d   : > { %v1511_v36 = vmul.f32 %v1510_v61, %v3630_v45  ;;  %v1539_v31 = vmul.f32 %v1538_v17, %v3630_v45 }
 0x28f   : > { %v1412_v49 = vpop.permute.xlu1 %1411  ;;  %v3564_v62 = vld [vmem:[#allocation2 + $0x19] sm:$0xff] }
 0x290   : > { %1416 = vst.msk [vmem:[#allocation2 + $0x23] sm:$0xff] %vm915_vm9, %v1412_v49  ;;  %v1453_v23 = vmul.f32 %v1452_v40, %v3564_v62  ;;  %v1481_v7 = vmul.f32 %v1480_v44, %v3564_v62  ;;  %v3579_v53 = vld [vmem:[#allocation2 + $0x1b] sm:$0xff] }
 0x291   : > { %v1525_v26 = vmul.f32 %v1524_v51, %v3579_v53  ;;  %v1553_v10 = vmul.f32 %v1552_v6, %v3579_v53 }
 0x292   : > { %1457 = vrot.lane.b32.xlu0 %v1453_v23, %s2677_s11 }
 0x293   : > { %v3628_v34 = vld [vmem:[#allocation2 + $0x9] sm:$0xff] }
 0x294   : > { %v1440_v59 = vmul.f32 %v1438_v58, %v3628_v34  ;;  %v1468_v13 = vmul.f32 %v1466_v19, %v3628_v34  ;;  %v3642_v22 = vld [vmem:[#allocation2 + $0xb] sm:$0xff] }
 0x295   : > { %v3644_v39 = vld [vmem:[#allocation2 + $0x5] sm:$0xff]  ;;  %v1512_v27 = vmul.f32 %v1510_v61, %v3642_v22  ;;  %v1540_v32 = vmul.f32 %v1538_v17, %v3642_v22  ;;  %v3654_v47 = vld [vmem:[#allocation2 + $0xd] sm:$0xff]  ;;  %v1570_v61 = vstv %s3685_s29  ;;  %s3740_s29 = sld [smem:[#allocation7 + $0x14]] }
 0x296   : > { %1485 = vrot.lane.b32.xlu0 %v1481_v7, %s2681_s8  ;;  %v1583_v21 = vmul.f32 %v1582_v4, %v3644_v39  ;;  %v1611_v33 = vmul.f32 %v1610_v15, %v3644_v39  ;;  %v1584_v56 = vmul.f32 %v1582_v4, %v3654_v47  ;;  %v1612_v35 = vmul.f32 %v1610_v15, %v3654_v47 }
 0x297   : > { %v3585_v37 = vld [vmem:[#allocation2 + $0x21] sm:$0xff] }
 0x298   : > { %v1454_v28 = vmul.f32 %v1452_v40, %v3585_v37  ;;  %v1482_v0 = vmul.f32 %v1480_v44, %v3585_v37  ;;  %v3598_v25 = vld [vmem:[#allocation2 + $0x23] sm:$0xff]  ;;  %v1432_v44 = vstv %s3666_s10  ;;  %s3708_s10 = sld [smem:[#allocation7 + $0x96]] }
 0x299   : > { %v3600_v9 = vld [vmem:[#allocation2 + $0x1d] sm:$0xff]  ;;  %v1526_v42 = vmul.f32 %v1524_v51, %v3598_v25  ;;  %v1554_v41 = vmul.f32 %v1552_v6, %v3598_v25  ;;  %v3619_v1 = vld [vmem:[#allocation2 + $0x25] sm:$0xff]  ;;  %v1433_v14 = vmul.f32 %v1432_v44, %v3564_v62  ;;  %v1418_v51 = vstv %s3672_s17  ;;  %s3721_s17 = sld [smem:[#allocation7 + $0x99]] }
 0x29a   : > { %1459 = vrot.lane.b32.xlu1 %v1454_v28, %s2677_s11  ;;  %1529 = vrot.lane.b32.xlu0 %v1525_v26, %s2677_s11  ;;  %v1597_v12 = vmul.f32 %v1596_v20, %v3600_v9  ;;  %v1598_v30 = vmul.f32 %v1596_v20, %v3619_v1  ;;  %v1625_v40 = vmul.f32 %v1624_v48, %v3600_v9  ;;  %v1498_v26 = vstv %s3674_s14  ;;  %s2685_s14 = smov 122  }
 0x29b   : > { %v1626_v46 = vmul.f32 %v1624_v48, %v3619_v1  ;;  %v1429_v28 = vadd.f32 %v1427_v43, %v1418_v51  ;;  %v1499_v20 = vmul.f32 %v1498_v26, %v3630_v45  ;;  %v1434_v57 = vmul.f32 %v1432_v44, %v3585_v37 }
 0x29e   : > { %1487 = vrot.lane.b32.xlu1 %v1482_v0, %s2681_s8  ;;  %1557 = vrot.lane.b32.xlu0 %v1553_v10, %s2681_s8 }
 0x2a2   : > { %1531 = vrot.lane.b32.xlu1 %v1526_v42, %s2677_s11  ;;  %1601 = vrot.lane.b32.xlu0 %v1597_v12, %s2677_s11  ;;  %v1428_v12 = vmul.f32 %v1426_v11, %v3628_v34  ;;  %v1571_v34 = vmul.f32 %v1570_v61, %v3644_v39  ;;  %v1572_v11 = vmul.f32 %v1570_v61, %v3654_v47  ;;  %v523_v47 = vld [vmem:[%s4024_s2] sm:$0xff] }
 0x2a3   : > { %2392 = vmatpush3.msra.mxu1 %v523_v47 }
 0x2a6   : > { %1559 = vrot.lane.b32.xlu1 %v1554_v41, %s2681_s8  ;;  %1443 = vrot.lane.b32.xlu0 %v1439_v63, %s2677_s11 }
 0x2aa   : > { %1603 = vrot.lane.b32.xlu1 %v1598_v30, %s2677_s11  ;;  %1471 = vrot.lane.b32.xlu0 %v1467_v2, %s2681_s8  ;;  %v1430_v2 = vadd.f32 %v1428_v12, %v1418_v51  ;;  %v1720_v12 = vstv %s2349_s28  ;;  %s2345_s28 = sld [smem:[#allocation7 + $0x92]] }
 0x2ae   : > { %1445 = vrot.lane.b32.xlu1 %v1440_v59, %s2677_s11  ;;  %1515 = vrot.lane.b32.xlu0 %v1511_v36, %s2677_s11 }
 0x2b2   : > { %1473 = vrot.lane.b32.xlu1 %v1468_v13, %s2681_s8  ;;  %1543 = vrot.lane.b32.xlu0 %v1539_v31, %s2681_s8  ;;  %v1500_v13 = vmul.f32 %v1498_v26, %v3642_v22 }
 0x2b6   : > { %1517 = vrot.lane.b32.xlu1 %v1512_v27, %s2677_s11  ;;  %1587 = vrot.lane.b32.xlu0 %v1583_v21, %s2677_s11  ;;  %v1576_v21 = vstv %s3691_s7  ;;  %s3749_s7 = sld [smem:[#allocation7 + $0x16]] }
 0x2b7   : > { %v1578_v51 = vmul.f32 %v1576_v21, %v3619_v1 }
 0x2ba   : > { %1545 = vrot.lane.b32.xlu1 %v1540_v32, %s2681_s8  ;;  %1615 = vrot.lane.b32.xlu0 %v1611_v33, %s2681_s8 }
 0x2be   : > { %1589 = vrot.lane.b32.xlu1 %v1584_v56, %s2677_s11  ;;  %1629 = vrot.lane.b32.xlu0 %v1625_v40, %s2681_s8  ;;  %s3670_s11 = sld [smem:[#allocation8 + $0x81]] }
 0x2c2   : > { %1617 = vrot.lane.b32.xlu1 %v1612_v35, %s2681_s8 }
 0x2c4   : > { %v1420_v7 = vstv %s3670_s11  ;;  %s2684_s11 = smov 125  }
 0x2c5   : > { %v1435_v18 = vadd.f32 %v1433_v14, %v1420_v7  ;;  %v1436_v19 = vadd.f32 %v1434_v57, %v1420_v7 }
 0x2c6   : > { %1631 = vrot.lane.b32.xlu1 %v1626_v46, %s2681_s8  ;;  %s3678_s8 = sld [smem:[#allocation7 + $0x8c]]  ;;  %v1577_v46 = vmul.f32 %v1576_v21, %v3600_v9  ;;  %v1706_v21 = vstv %s3740_s29  ;;  %s3821_s29 = sld [smem:[#allocation7 + $0x18]] }
 0x2cc   : > { %v1504_v60 = vstv %s3678_s8  ;;  %s3729_s8 = sld [smem:[#allocation7 + $0x13]] }
 0x2cd   : > { %v1505_v8 = vmul.f32 %v1504_v60, %v3579_v53  ;;  %v1506_v32 = vmul.f32 %v1504_v60, %v3598_v25 }
 0x304   : > { %v1458_v52 = vpop.permute.xlu0 %1457 }
 0x305   : > { %v1463_v6 = vadd.f32 %v1458_v52, %v1435_v18 }
 0x308   : > { %v1486_v55 = vpop.permute.xlu0 %1485 }
 0x309   : > { %v1491_v62 = vadd.f32 %v1486_v55, %v1463_v6 }
 0x30b   : > { %v1507_v30 = vadd.f32 %v1505_v8, %v1491_v62 }
 0x30c   : > { %v1460_v54 = vpop.permute.xlu1 %1459  ;;  %v1530_v24 = vpop.permute.xlu0 %1529 }
 0x30d   : > { %v1464_v59 = vadd.f32 %v1460_v54, %v1436_v19  ;;  %v1535_v31 = vadd.f32 %v1530_v24, %v1507_v30 }
 0x310   : > { %v1488_v49 = vpop.permute.xlu1 %1487  ;;  %v1558_v23 = vpop.permute.xlu0 %1557 }
 0x311   : > { %v1492_v4 = vadd.f32 %v1488_v49, %v1464_v59  ;;  %v1563_v15 = vadd.f32 %v1558_v23, %v1535_v31  ;;  %v1678_v31 = vstv %s3729_s8  ;;  %s3815_s8 = sld [smem:[#allocation7 + $0x15]] }
 0x313   : > { %v1508_v35 = vadd.f32 %v1506_v32, %v1492_v4  ;;  %v1579_v52 = vadd.f32 %v1577_v46, %v1563_v15 }
 0x314   : > { %v1532_v50 = vpop.permute.xlu1 %1531  ;;  %v1602_v38 = vpop.permute.xlu0 %1601 }
 0x315   : > { %v1536_v24 = vadd.f32 %v1532_v50, %v1508_v35  ;;  %v1607_v23 = vadd.f32 %v1602_v38, %v1579_v52  ;;  %v518_v38 = vpop.f32.mrb[0].mxu0 }
 0x316   : > { %v2390_v1 = vpop.f32.mrb[1].mxu0 }
 0x318   : > { %v1560_v5 = vpop.permute.xlu1 %1559  ;;  %v1444_v3 = vpop.permute.xlu0 %1443 }
 0x319   : > { %v1449_v16 = vadd.f32 %v1444_v3, %v1429_v28  ;;  %v1564_v14 = vadd.f32 %v1560_v5, %v1536_v24  ;;  %v522_v5 = vmax.f32 %v518_v38, 0.0 }
 0x31b   : > { %v1580_v3 = vadd.f32 %v1578_v51, %v1564_v14  ;;  %2394 = vmatmul.mubr.msk.f32.vlgmr.msra.gmra.mrb[0].mxu1 %vm524_vm12, %v522_v5 }
 0x31c   : > { %v1604_v0 = vpop.permute.xlu1 %1603  ;;  %v1472_v10 = vpop.permute.xlu0 %1471 }
 0x31d   : > { %v1477_v42 = vadd.f32 %v1472_v10, %v1449_v16  ;;  %v1608_v50 = vadd.f32 %v1604_v0, %v1580_v3  ;;  %v1672_v3 = vstv %s2345_s28  ;;  %s2686_s28 = smov [#allocation10]  }
 0x31f   : > { %v1501_v58 = vadd.f32 %v1499_v20, %v1477_v42  ;;  %v1692_v20 = vstv %s2347_s23  ;;  %s2361_s23 = sld [smem:[#allocation7 + $0x9a]] }
 0x320   : > { %v1446_v41 = vpop.permute.xlu1 %1445  ;;  %v1516_v63 = vpop.permute.xlu0 %1515 }
 0x321   : > { %v1450_v45 = vadd.f32 %v1446_v41, %v1430_v2  ;;  %v1521_v36 = vadd.f32 %v1516_v63, %v1501_v58  ;;  %v1764_v41 = vstv %s3708_s10  ;;  %v1792_v2 = vstv %s3714_s13  ;;  %s2343_s10 = sld [smem:[#allocation8 + $0x82]]  ;;  %s2351_s13 = sld [smem:[#allocation7 + $0x95]] }
 0x324   : > { %v1474_v17 = vpop.permute.xlu1 %1473  ;;  %v1544_v37 = vpop.permute.xlu0 %1543 }
 0x325   : > { %v1478_v53 = vadd.f32 %v1474_v17, %v1450_v45  ;;  %v1549_v27 = vadd.f32 %v1544_v37, %v1521_v36  ;;  %v1836_v17 = vstv %s3721_s17  ;;  %s3807_s17 = sld [smem:[#allocation7 + $0x12]] }
 0x327   : > { %v1502_v33 = vadd.f32 %v1500_v13, %v1478_v53  ;;  %v1573_v48 = vadd.f32 %v1571_v34, %v1549_v27 }
 0x328   : > { %v1518_v56 = vpop.permute.xlu1 %1517  ;;  %v1588_v40 = vpop.permute.xlu0 %1587 }
 0x329   : > { %v1522_v55 = vadd.f32 %v1518_v56, %v1502_v33  ;;  %v1593_v22 = vadd.f32 %v1588_v40, %v1573_v48  ;;  %v1750_v56 = vstv %s3749_s7  ;;  %s3849_s7 = scalar_lea.vmem [#allocation10], %s2297_s26  ;;  %s2372_s26 = sshll.u32 %s2740_s22, 12 }
 0x32a   : > { %s2180_s22 = scalar_lea.sflag [#allocation5], %s2857_s25 }
 0x32c   : > { %v1546_v54 = vpop.permute.xlu1 %1545  ;;  %v1616_v39 = vpop.permute.xlu0 %1615 }
 0x32d   : > { %v1550_v49 = vadd.f32 %v1546_v54, %v1522_v55  ;;  %v1621_v44 = vadd.f32 %v1616_v39, %v1593_v22  ;;  %v1822_v39 = vstv %s2358_s12 }
 0x32f   : > { %1639 = vrot.lane.b32.xlu0 %v1621_v44, %s2683_s15  ;;  %v1574_v25 = vadd.f32 %v1572_v11, %v1550_v49  ;;  %v1850_v44 = vstv %s2360_s16 }
 0x330   : > { %v1590_v43 = vpop.permute.xlu1 %1589  ;;  %v1630_v7 = vpop.permute.xlu0 %1629 }
 0x331   : > { %v1635_v9 = vadd.f32 %v1630_v7, %v1607_v23  ;;  %v1594_v18 = vadd.f32 %v1590_v43, %v1574_v25  ;;  %v1864_v25 = vstv %s2361_s23  ;;  %s3972_s23 = scalar_lea.hbm %s4027_s5, %s2372_s26 }
 0x333   : > { %1649 = vrot.lane.b32.xlu0 %v1635_v9, %s2683_s15 }
 0x334   : > { %v1618_v28 = vpop.permute.xlu1 %1617 }
 0x335   : > { %v1622_v26 = vadd.f32 %v1618_v28, %v1594_v18  ;;  %v1660_v28 = vstv %s2343_s10  ;;  %s2599_s10 = sshll.u32 %s2686_s28, 4  ;;  %s2600_s10 = int_to_ptr.vmem [resolvable:$false] %s2599_s10 }
 0x337   : > { %1641 = vrot.lane.b32.xlu1 %v1622_v26, %s2683_s15 }
 0x338   : > { %v1632_v6 = vpop.permute.xlu1 %1631 }
 0x339   : > { %v1636_v16 = vadd.f32 %v1632_v6, %v1608_v50  ;;  %v1744_v6 = vstv %s2351_s13  ;;  %s2601_s13 = scalar_lea.vmem %s2600_s10, 8192 }
 0x33b   : > { %1651 = vrot.lane.b32.xlu1 %v1636_v16, %s2683_s15  ;;  %s3758_s15 = sld [smem:[#allocation7 + $0x17]] }
 0x341   : > { %v1778_v46 = vstv %s3758_s15  ;;  %s2193_s15 = sshll.u32 %s3849_s7, 4  ;;  %s3974_s15 = int_to_ptr.vmem [resolvable:$true] %s2193_s15 }
 0x342   : > { %p2602_p4 = scmp.lt.s32.totalorder %s3974_s15, %s2600_s10 }
 0x3a1   : > { %v1640_v60 = vpop.permute.xlu0 %1639 }
 0x3a2   : > { %1645 = vst.msk [vmem:[#allocation2 + $0x3] sm:$0xff] %vm915_vm9, %v1640_v60 }
 0x3a5   : > { %v1650_v10 = vpop.permute.xlu0 %1649 }
 0x3a6   : > { %1655 = vst.msk [vmem:[#allocation2 + $0x1b] sm:$0xff] %vm915_vm9, %v1650_v10 }
 0x3a9   : > { %v1642_v0 = vpop.permute.xlu1 %1641  ;;  %v3746_v34 = vld [vmem:[#allocation2] sm:$0xff] }
 0x3aa   : > { %1646 = vst.msk [vmem:[#allocation2 + $0xb] sm:$0xff] %vm915_vm9, %v1642_v0  ;;  %v1679_v53 = vmul.f32 %v1678_v31, %v3746_v34  ;;  %v1707_v32 = vmul.f32 %v1706_v21, %v3746_v34  ;;  %v3766_v48 = vld [vmem:[#allocation2 + $0x3] sm:$0xff] }
 0x3ab   : > { %v1751_v35 = vmul.f32 %v1750_v56, %v3766_v48  ;;  %v1779_v55 = vmul.f32 %v1778_v46, %v3766_v48 }
 0x3ad   : > { %v1652_v62 = vpop.permute.xlu1 %1651  ;;  %v3710_v57 = vld [vmem:[#allocation2 + $0x18] sm:$0xff] }
 0x3ae   : > { %1656 = vst.msk [vmem:[#allocation2 + $0x23] sm:$0xff] %vm915_vm9, %v1652_v62  ;;  %v1693_v42 = vmul.f32 %v1692_v20, %v3710_v57  ;;  %v1721_v8 = vmul.f32 %v1720_v12, %v3710_v57  ;;  %v3718_v58 = vld [vmem:[#allocation2 + $0x1b] sm:$0xff]  ;;  %v1673_v18 = vmul.f32 %v1672_v3, %v3710_v57 }
 0x3af   : > { %v1765_v30 = vmul.f32 %v1764_v41, %v3718_v58  ;;  %v1793_v59 = vmul.f32 %v1792_v2, %v3718_v58  ;;  %v1745_v1 = vmul.f32 %v1744_v6, %v3718_v58 }
 0x3b0   : > { %1697 = vrot.lane.b32.xlu0 %v1693_v42, %s2684_s11  ;;  %v1675_v50 = vadd.f32 %v1673_v18, %v1660_v28 }
 0x3b1   : > { %v3764_v33 = vld [vmem:[#allocation2 + $0x8] sm:$0xff] }
 0x3b2   : > { %v1680_v40 = vmul.f32 %v1678_v31, %v3764_v33  ;;  %v1708_v52 = vmul.f32 %v1706_v21, %v3764_v33  ;;  %v3778_v22 = vld [vmem:[#allocation2 + $0xb] sm:$0xff] }
 0x3b3   : > { %v3780_v54 = vld [vmem:[#allocation2 + $0x6] sm:$0xff]  ;;  %v1752_v24 = vmul.f32 %v1750_v56, %v3778_v22  ;;  %v1780_v11 = vmul.f32 %v1778_v46, %v3778_v22  ;;  %v3790_v14 = vld [vmem:[#allocation2 + $0xe] sm:$0xff] }
 0x3b4   : > { %1725 = vrot.lane.b32.xlu0 %v1721_v8, %s2685_s14  ;;  %v1823_v49 = vmul.f32 %v1822_v39, %v3780_v54  ;;  %v1851_v23 = vmul.f32 %v1850_v44, %v3780_v54  ;;  %v1824_v43 = vmul.f32 %v1822_v39, %v3790_v14  ;;  %v1852_v51 = vmul.f32 %v1850_v44, %v3790_v14 }
 0x3b5   : > { %v3724_v63 = vld [vmem:[#allocation2 + $0x20] sm:$0xff]  ;;  %v1810_v44 = vstv %s3821_s29 }
 0x3b6   : > { %v1694_v19 = vmul.f32 %v1692_v20, %v3724_v63  ;;  %v1722_v61 = vmul.f32 %v1720_v12, %v3724_v63  ;;  %v3735_v45 = vld [vmem:[#allocation2 + $0x23] sm:$0xff]  ;;  %v1674_v5 = vmul.f32 %v1672_v3, %v3724_v63 }
 0x3b7   : > { %v3737_v36 = vld [vmem:[#allocation2 + $0x1e] sm:$0xff]  ;;  %v1766_v37 = vmul.f32 %v1764_v41, %v3735_v45  ;;  %v1794_v4 = vmul.f32 %v1792_v2, %v3735_v45  ;;  %v3755_v27 = vld [vmem:[#allocation2 + $0x26] sm:$0xff]  ;;  %v1746_v63 = vmul.f32 %v1744_v6, %v3735_v45 }
 0x3b8   : > { %1699 = vrot.lane.b32.xlu1 %v1694_v19, %s2684_s11  ;;  %1769 = vrot.lane.b32.xlu0 %v1765_v30, %s2684_s11  ;;  %v1837_v13 = vmul.f32 %v1836_v17, %v3737_v36  ;;  %v1838_v15 = vmul.f32 %v1836_v17, %v3755_v27  ;;  %v1865_v7 = vmul.f32 %v1864_v25, %v3737_v36  ;;  %v1666_v30 = vstv %s3807_s17 }
 0x3b9   : > { %v1866_v9 = vmul.f32 %v1864_v25, %v3755_v27  ;;  %v1676_v20 = vadd.f32 %v1674_v5, %v1660_v28 }
 0x3bc   : > { %1727 = vrot.lane.b32.xlu1 %v1722_v61, %s2685_s14  ;;  %1797 = vrot.lane.b32.xlu0 %v1793_v59, %s2685_s14 }
 0x3c0   : > { %1771 = vrot.lane.b32.xlu1 %v1766_v37, %s2684_s11  ;;  %1841 = vrot.lane.b32.xlu0 %v1837_v13, %s2684_s11  ;;  %v1667_v37 = vmul.f32 %v1666_v30, %v3746_v34 }
 0x3c4   : > { %1799 = vrot.lane.b32.xlu1 %v1794_v4, %s2685_s14  ;;  %1683 = vrot.lane.b32.xlu0 %v1679_v53, %s2684_s11 }
 0x3c8   : > { %1843 = vrot.lane.b32.xlu1 %v1838_v15, %s2684_s11  ;;  %1711 = vrot.lane.b32.xlu0 %v1707_v32, %s2685_s14  ;;  %v1738_v32 = vstv %s3815_s8 }
 0x3c9   : > { %v1739_v34 = vmul.f32 %v1738_v32, %v3766_v48 }
 0x3cc   : > { %1685 = vrot.lane.b32.xlu1 %v1680_v40, %s2684_s11  ;;  %1755 = vrot.lane.b32.xlu0 %v1751_v35, %s2684_s11 }
 0x3d0   : > { %1713 = vrot.lane.b32.xlu1 %v1708_v52, %s2685_s14  ;;  %1783 = vrot.lane.b32.xlu0 %v1779_v55, %s2685_s14  ;;  %v1668_v52 = vmul.f32 %v1666_v30, %v3764_v33 }
 0x3d4   : > { %1757 = vrot.lane.b32.xlu1 %v1752_v24, %s2684_s11  ;;  %1827 = vrot.lane.b32.xlu0 %v1823_v49, %s2684_s11 }
 0x3d8   : > { %1785 = vrot.lane.b32.xlu1 %v1780_v11, %s2685_s14  ;;  %1855 = vrot.lane.b32.xlu0 %v1851_v23, %s2685_s14 }
 0x3dc   : > { %1829 = vrot.lane.b32.xlu1 %v1824_v43, %s2684_s11  ;;  %1869 = vrot.lane.b32.xlu0 %v1865_v7, %s2685_s14  ;;  %s3803_s11 = sld [smem:[#allocation7 + $0x98]] }
 0x3e0   : > { %1857 = vrot.lane.b32.xlu1 %v1852_v51, %s2685_s14  ;;  %v1740_v51 = vmul.f32 %v1738_v32, %v3778_v22 }
 0x3e2   : > { %v1816_v62 = vstv %s3803_s11 }
 0x3e3   : > { %v1817_v58 = vmul.f32 %v1816_v62, %v3737_v36  ;;  %v1818_v45 = vmul.f32 %v1816_v62, %v3755_v27 }
 0x3e4   : > { %1871 = vrot.lane.b32.xlu1 %v1866_v9, %s2685_s14  ;;  %s3810_s14 = sld [smem:[#allocation8 + $0x2]]  ;;  %v1811_v9 = vmul.f32 %v1810_v44, %v3780_v54 }
 0x3ea   : > { %v1658_v13 = vstv %s3810_s14 }
 0x3eb   : > { %v1669_v15 = vadd.f32 %v1667_v37, %v1658_v13  ;;  %v1670_v49 = vadd.f32 %v1668_v52, %v1658_v13  ;;  %v1952_v52 = vsub.s32 1, %v3232_v29 }
 0x3ee   : > { %v594_v48 = vpop.f32.mrb[0].mxu1 }
 0x3ef   : > { %v599_v6 = vrot.slane %v594_v48, 1 }
 0x422   : > { %v1698_v26 = vpop.permute.xlu0 %1697 }
 0x423   : > { %v1703_v16 = vadd.f32 %v1698_v26, %v1675_v50 }
 0x426   : > { %v1726_v47 = vpop.permute.xlu0 %1725 }
 0x427   : > { %v1731_v38 = vadd.f32 %v1726_v47, %v1703_v16  ;;  %v2395_v16 = vpop.f32.mrb[1].mxu1 }
 0x429   : > { %v1747_v60 = vadd.f32 %v1745_v1, %v1731_v38 }
 0x42a   : > { %v1700_v10 = vpop.permute.xlu1 %1699  ;;  %v1770_v0 = vpop.permute.xlu0 %1769 }
 0x42b   : > { %v1704_v57 = vadd.f32 %v1700_v10, %v1676_v20  ;;  %v1775_v42 = vadd.f32 %v1770_v0, %v1747_v60  ;;  %v1812_v60 = vmul.f32 %v1810_v44, %v3790_v14  ;;  %v601_v10 = vadd.f32 %v599_v6, %v594_v48 }
 0x42d   : > { %v2303_v54 = vmul.f32 -1.442695, %v601_v10 }
 0x42e   : > { %v1728_v12 = vpop.permute.xlu1 %1727  ;;  %v1798_v8 = vpop.permute.xlu0 %1797 }
 0x42f   : > { %v1732_v41 = vadd.f32 %v1728_v12, %v1704_v57  ;;  %v1803_v19 = vadd.f32 %v1798_v8, %v1775_v42 }
 0x431   : > { %v1748_v2 = vadd.f32 %v1746_v63, %v1732_v41  ;;  %v1819_v61 = vadd.f32 %v1817_v58, %v1803_v19 }
 0x432   : > { %v1772_v59 = vpop.permute.xlu1 %1771  ;;  %v1842_v17 = vpop.permute.xlu0 %1841 }
 0x433   : > { %v1776_v31 = vadd.f32 %v1772_v59, %v1748_v2  ;;  %v1847_v0 = vadd.f32 %v1842_v17, %v1819_v61 }
 0x436   : > { %v1800_v4 = vpop.permute.xlu1 %1799  ;;  %v1684_v53 = vpop.permute.xlu0 %1683 }
 0x437   : > { %v1804_v21 = vadd.f32 %v1800_v4, %v1776_v31  ;;  %v1689_v36 = vadd.f32 %v1684_v53, %v1669_v15 }
 0x439   : > { %v1820_v56 = vadd.f32 %v1818_v45, %v1804_v21  ;;  %v1905_v45 = vsub.s32 0, %v3232_v29 }
 0x43a   : > { %v1844_v40 = vpop.permute.xlu1 %1843  ;;  %v1712_v35 = vpop.permute.xlu0 %1711 }
 0x43b   : > { %v1717_v46 = vadd.f32 %v1712_v35, %v1689_v36  ;;  %v1848_v63 = vadd.f32 %v1844_v40, %v1820_v56 }
 0x43d   : > { %v1741_v55 = vadd.f32 %v1739_v34, %v1717_v46 }
 0x43e   : > { %v1686_v39 = vpop.permute.xlu1 %1685  ;;  %v1756_v24 = vpop.permute.xlu0 %1755 }
 0x43f   : > { %v1690_v11 = vadd.f32 %v1686_v39, %v1670_v49  ;;  %v1761_v27 = vadd.f32 %v1756_v24, %v1741_v55  ;;  %v1963_v39 = vsub.s32 2, %v3232_v29 }
 0x442   : > { %v1714_v23 = vpop.permute.xlu1 %1713  ;;  %v1784_v25 = vpop.permute.xlu0 %1783 }
 0x443   : > { %v1718_v43 = vadd.f32 %v1714_v23, %v1690_v11  ;;  %v1789_v7 = vadd.f32 %v1784_v25, %v1761_v27  ;;  %v1974_v11 = vsub.s32 3, %v3232_v29  ;;  %v1985_v23 = vsub.s32 4, %v3232_v29 }
 0x445   : > { %v1742_v3 = vadd.f32 %v1740_v51, %v1718_v43  ;;  %v1813_v18 = vadd.f32 %v1811_v9, %v1789_v7  ;;  %v1996_v43 = vsub.s32 5, %v3232_v29  ;;  %v2007_v51 = vsub.s32 6, %v3232_v29 }
 0x446   : > { %v1758_v33 = vpop.permute.xlu1 %1757  ;;  %v1828_v28 = vpop.permute.xlu0 %1827 }
 0x447   : > { %v1762_v26 = vadd.f32 %v1758_v33, %v1742_v3  ;;  %v1833_v50 = vadd.f32 %v1828_v28, %v1813_v18  ;;  %v2018_v3 = vsub.s32 7, %v3232_v29 }
 0x44a   : > { %v1786_v47 = vpop.permute.xlu1 %1785  ;;  %v1856_v38 = vpop.permute.xlu0 %1855 }
 0x44b   : > { %v1790_v5 = vadd.f32 %v1786_v47, %v1762_v26  ;;  %v1861_v1 = vadd.f32 %v1856_v38, %v1833_v50  ;;  %v2503_v47 = vld [vmem:[%s2863_s9 + $0x8] sm:$0xff] }
 0x44d   : > { %v2362_v22 = vmul.f32 -1.442695, %v1861_v1  ;;  %v1814_v20 = vadd.f32 %v1812_v60, %v1790_v5  ;;  %v2504_v5 = vld [vmem:[%s2863_s9] sm:$0xff] }
 0x44e   : > { %v1830_v62 = vpop.permute.xlu1 %1829  ;;  %v1870_v57 = vpop.permute.xlu0 %1869 }
 0x44f   : > { %2483 = vpow2.f32 %v2362_v22  ;;  %v1875_v42 = vadd.f32 %v1870_v57, %v1847_v0  ;;  %v1834_v12 = vadd.f32 %v1830_v62, %v1814_v20  ;;  %v2505_v20 = vld [vmem:[%s2863_s9 + $0x18] sm:$0xff]  ;;  %v2506_v62 = vld [vmem:[%s2863_s9 + $0x10] sm:$0xff] }
 0x450   : > { %2485 = vpow2.f32 %v2303_v54 }
 0x451   : > { %v2364_v8 = vmul.f32 -1.442695, %v1875_v42 }
 0x452   : > { %v1858_v41 = vpop.permute.xlu1 %1857 }
 0x453   : > { %2487 = vpow2.f32 %v2364_v8  ;;  %v1862_v19 = vadd.f32 %v1858_v41, %v1834_v12 }
 0x455   : > { %v2363_v58 = vmul.f32 -1.442695, %v1862_v19  ;;  %v2507_v19 = vld [vmem:[%s2863_s9 + $0x28] sm:$0xff] }
 0x456   : > { %v1872_v30 = vpop.permute.xlu1 %1871 }
 0x457   : > { %2489 = vpow2.f32 %v2363_v58  ;;  %v1876_v14 = vadd.f32 %v1872_v30, %v1848_v63  ;;  %v2508_v58 = vld [vmem:[%s2863_s9 + $0x20] sm:$0xff] }
 0x459   : > { %v2484_v2 = vpop.eup %2483  ;;  %v2365_v61 = vmul.f32 -1.442695, %v1876_v14 }
 0x45a   : > { %v2486_v59 = vpop.eup %2485  ;;  %v1883_v17 = vadd.f32 1.0, %v2484_v2 }
 0x45b   : > { %2491 = vpow2.f32 %v2365_v61  ;;  %v605_v37 = vadd.f32 1.0, %v2486_v59 }
 0x45d   : > { %v2488_v13 = vpop.eup %2487  ;;  %2493 = vrcp.f32 %v605_v37 }
 0x45e   : > { %v1895_v31 = vadd.f32 1.0, %v2488_v13  ;;  %2495 = vrcp.f32 %v1883_v17  ;;  %v2509_v17 = vld [vmem:[%s2863_s9 + $0x38] sm:$0xff]  ;;  %v2510_v13 = vld [vmem:[%s2863_s9 + $0x30] sm:$0xff] }
 0x460   : > { %2497 = vrcp.f32 %v1895_v31 }
 0x461   : > { %v2490_v4 = vpop.eup %2489 }
 0x462   : > { %v1884_v53 = vadd.f32 1.0, %v2490_v4 }
 0x464   : > { %2499 = vrcp.f32 %v1884_v53 }
 0x465   : > { %v2492_v21 = vpop.eup %2491 }
 0x466   : > { %v1896_v15 = vadd.f32 1.0, %v2492_v21 }
 0x467   : > { %v2494_v32 = vpop.eup %2493 }
 0x468   : > { %2501 = vrcp.f32 %v1896_v15  ;;  %v3830_v36 = vrot.slane %v2494_v32, %v1905_v45  ;;  %v2496_v56 = vpop.eup %2495 }
 0x46a   : > { %v2498_v40 = vpop.eup %2497  ;;  %v1908_v38 = vmul.f32 %v2503_v47, %v3830_v36  ;;  %v1907_v1 = vmul.f32 %v2504_v5, %v3830_v36  ;;  %v1910_v54 = vmul.f32 %v2505_v20, %v3830_v36  ;;  %v1909_v57 = vmul.f32 %v2506_v62, %v3830_v36 }
 0x46b   : > { %v1901_v35 = vadd.f32 %v2498_v40, %v2496_v56  ;;  %v1912_v63 = vmul.f32 %v2507_v19, %v3830_v36  ;;  %v1911_v30 = vmul.f32 %v2508_v58, %v3830_v36  ;;  %v1914_v37 = vmul.f32 %v2509_v17, %v3830_v36  ;;  %v2512_v56 = vld [vmem:[%s2863_s9 + $0x40] sm:$0xff] }
 0x46c   : > { %v1913_v31 = vmul.f32 %v2510_v13, %v3830_v36  ;;  %v1915_v40 = vmul.f32 %v2512_v56, %v3830_v36 }
 0x46d   : > { %v1942_v46 = vrot.slane %v1901_v35, %v1905_v45  ;;  %v1953_v55 = vrot.slane %v1901_v35, %v1952_v52  ;;  %v1964_v44 = vrot.slane %v1901_v35, %v1963_v39  ;;  %v1975_v27 = vrot.slane %v1901_v35, %v1974_v11 }
 0x46e   : > { %v2500_v34 = vpop.eup %2499  ;;  %v1986_v25 = vrot.slane %v1901_v35, %v1985_v23  ;;  %v1997_v7 = vrot.slane %v1901_v35, %v1996_v43  ;;  %v2008_v9 = vrot.slane %v1901_v35, %v2007_v51  ;;  %v2019_v18 = vrot.slane %v1901_v35, %v2018_v3 }
 0x46f   : > { %1948 = vbcast.lane.b32.xlu1 %v1942_v46, 264  ;;  %1944 = vbcast.lane.b32.xlu0 %v1942_v46, 256 }
 0x472   : > { %v2502_v24 = vpop.eup %2501 }
 0x473   : > { %v1902_v49 = vadd.f32 %v2502_v24, %v2500_v34  ;;  %1959 = vbcast.lane.b32.xlu1 %v1953_v55, 264  ;;  %1955 = vbcast.lane.b32.xlu0 %v1953_v55, 256  ;;  %v2513_v55 = vld [vmem:[%s2863_s9 + $0x58] sm:$0xff]  ;;  %v2514_v24 = vld [vmem:[%s2863_s9 + $0x50] sm:$0xff] }
 0x475   : > { %v2030_v33 = vrot.slane %v1902_v49, %v1905_v45  ;;  %v2041_v28 = vrot.slane %v1902_v49, %v1952_v52  ;;  %v2052_v48 = vrot.slane %v1902_v49, %v1963_v39  ;;  %v2063_v26 = vrot.slane %v1902_v49, %v1974_v11  ;;  %v2511_v45 = vld [vmem:[%s2863_s9 + $0x48] sm:$0xff] }
 0x476   : > { %v2074_v29 = vrot.slane %v1902_v49, %v1985_v23  ;;  %v2085_v50 = vrot.slane %v1902_v49, %v1996_v43  ;;  %v2096_v6 = vrot.slane %v1902_v49, %v2007_v51  ;;  %v2107_v16 = vrot.slane %v1902_v49, %v2018_v3 }
 0x477   : > { %1970 = vbcast.lane.b32.xlu1 %v1964_v44, 264  ;;  %1966 = vbcast.lane.b32.xlu0 %v1964_v44, 256  ;;  %v1916_v32 = vmul.f32 %v2511_v45, %v3830_v36  ;;  %v1918_v39 = vmul.f32 %v2513_v55, %v3830_v36  ;;  %v1917_v49 = vmul.f32 %v2514_v24, %v3830_v36 }
 0x47b   : > { %1981 = vbcast.lane.b32.xlu1 %v1975_v27, 264  ;;  %1977 = vbcast.lane.b32.xlu0 %v1975_v27, 256 }
 0x47f   : > { %1992 = vbcast.lane.b32.xlu1 %v1986_v25, 264  ;;  %1988 = vbcast.lane.b32.xlu0 %v1986_v25, 256  ;;  %v2515_v25 = vld [vmem:[%s2863_s9 + $0x68] sm:$0xff] }
 0x480   : > { %v1920_v43 = vmul.f32 %v2515_v25, %v3830_v36 }
 0x483   : > { %2003 = vbcast.lane.b32.xlu1 %v1997_v7, 264  ;;  %1999 = vbcast.lane.b32.xlu0 %v1997_v7, 256  ;;  %v2516_v7 = vld [vmem:[%s2863_s9 + $0x60] sm:$0xff] }
 0x484   : > { %v1919_v51 = vmul.f32 %v2516_v7, %v3830_v36 }
 0x487   : > { %2014 = vbcast.lane.b32.xlu1 %v2008_v9, 264  ;;  %2010 = vbcast.lane.b32.xlu0 %v2008_v9, 256 }
 0x48b   : > { %2025 = vbcast.lane.b32.xlu1 %v2019_v18, 264  ;;  %2021 = vbcast.lane.b32.xlu0 %v2019_v18, 256 }
 0x48f   : > { %2036 = vbcast.lane.b32.xlu1 %v2030_v33, 264  ;;  %2032 = vbcast.lane.b32.xlu0 %v2030_v33, 256 }
 0x493   : > { %2047 = vbcast.lane.b32.xlu1 %v2041_v28, 264  ;;  %2043 = vbcast.lane.b32.xlu0 %v2041_v28, 256  ;;  %v2517_v28 = vld [vmem:[%s2863_s9 + $0x78] sm:$0xff] }
 0x497   : > { %2058 = vbcast.lane.b32.xlu1 %v2052_v48, 264  ;;  %2054 = vbcast.lane.b32.xlu0 %v2052_v48, 256  ;;  %v1922_v48 = vmul.f32 %v2517_v28, %v3830_v36 }
 0x49b   : > { %2069 = vbcast.lane.b32.xlu1 %v2063_v26, 264  ;;  %2065 = vbcast.lane.b32.xlu0 %v2063_v26, 256  ;;  %v2518_v26 = vld [vmem:[%s2863_s9 + $0x70] sm:$0xff] }
 0x49f   : > { %2080 = vbcast.lane.b32.xlu1 %v2074_v29, 264  ;;  %2076 = vbcast.lane.b32.xlu0 %v2074_v29, 256  ;;  %v1921_v29 = vmul.f32 %v2518_v26, %v3830_v36 }
 0x4a3   : > { %2091 = vbcast.lane.b32.xlu1 %v2085_v50, 264  ;;  %2087 = vbcast.lane.b32.xlu0 %v2085_v50, 256 }
 0x4a7   : > { %2102 = vbcast.lane.b32.xlu1 %v2096_v6, 264  ;;  %2098 = vbcast.lane.b32.xlu0 %v2096_v6, 256 }
 0x4ab   : > { %2113 = vbcast.lane.b32.xlu1 %v2107_v16, 264  ;;  %2109 = vbcast.lane.b32.xlu0 %v2107_v16, 256 }
 0x4e1   : > { %v1949_v60 = vpop.permute.xlu1 %1948  ;;  %v1945_v10 = vpop.permute.xlu0 %1944 }
 0x4e2   : > { %v2116_v0 = vmul.f32 %v1949_v60, %v1908_v38  ;;  %v2115_v22 = vmul.f32 %v1945_v10, %v1907_v1  ;;  %v2519_v38 = vld [vmem:[%s2863_s9 + $0x88] sm:$0xff]  ;;  %v2520_v1 = vld [vmem:[%s2863_s9 + $0x80] sm:$0xff] }
 0x4e3   : > { %v1924_v5 = vmul.f32 %v2519_v38, %v3830_v36  ;;  %v1923_v60 = vmul.f32 %v2520_v1, %v3830_v36 }
 0x4e4   : > { %2148 = vst.msk [vmem:[%s3849_s7 + $0x8] sm:$0xff] %vm302_vm0, %v2116_v0  ;;  %2147 = vst.msk [vmem:[%s3849_s7] sm:$0xff] %vm302_vm0, %v2115_v22 }
 0x4e5   : > { %v1960_v42 = vpop.permute.xlu1 %1959  ;;  %v1956_v12 = vpop.permute.xlu0 %1955 }
 0x4e6   : > { %v2118_v8 = vmul.f32 %v1960_v42, %v1910_v54  ;;  %v2117_v41 = vmul.f32 %v1956_v12, %v1909_v57  ;;  %v2521_v54 = vld [vmem:[%s2863_s9 + $0x98] sm:$0xff]  ;;  %v2522_v57 = vld [vmem:[%s2863_s9 + $0x90] sm:$0xff] }
 0x4e7   : > { %v1926_v62 = vmul.f32 %v2521_v54, %v3830_v36  ;;  %v1925_v42 = vmul.f32 %v2522_v57, %v3830_v36 }
 0x4e8   : > { %2150 = vst.msk [vmem:[%s3849_s7 + $0x18] sm:$0xff] %vm302_vm0, %v2118_v8  ;;  %2149 = vst.msk [vmem:[%s3849_s7 + $0x10] sm:$0xff] %vm302_vm0, %v2117_v41 }
 0x4e9   : > { %v1971_v14 = vpop.permute.xlu1 %1970  ;;  %v1967_v2 = vpop.permute.xlu0 %1966 }
 0x4ea   : > { %v2120_v61 = vmul.f32 %v1971_v14, %v1912_v63  ;;  %v2119_v59 = vmul.f32 %v1967_v2, %v1911_v30  ;;  %v2523_v63 = vld [vmem:[%s2863_s9 + $0xa8] sm:$0xff]  ;;  %v2524_v30 = vld [vmem:[%s2863_s9 + $0xa0] sm:$0xff] }
 0x4eb   : > { %v1928_v58 = vmul.f32 %v2523_v63, %v3830_v36  ;;  %v1927_v14 = vmul.f32 %v2524_v30, %v3830_v36 }
 0x4ec   : > { %2152 = vst.msk [vmem:[%s3849_s7 + $0x28] sm:$0xff] %vm302_vm0, %v2120_v61  ;;  %2151 = vst.msk [vmem:[%s3849_s7 + $0x20] sm:$0xff] %vm302_vm0, %v2119_v59 }
 0x4ed   : > { %v1982_v4 = vpop.permute.xlu1 %1981  ;;  %v1978_v53 = vpop.permute.xlu0 %1977 }
 0x4ee   : > { %v2122_v21 = vmul.f32 %v1982_v4, %v1914_v37  ;;  %v2121_v15 = vmul.f32 %v1978_v53, %v1913_v31  ;;  %v2525_v37 = vld [vmem:[%s2863_s9 + $0xb8] sm:$0xff]  ;;  %v2526_v31 = vld [vmem:[%s2863_s9 + $0xb0] sm:$0xff] }
 0x4ef   : > { %v1930_v13 = vmul.f32 %v2525_v37, %v3830_v36  ;;  %v1929_v4 = vmul.f32 %v2526_v31, %v3830_v36 }
 0x4f0   : > { %2154 = vst.msk [vmem:[%s3849_s7 + $0x38] sm:$0xff] %vm302_vm0, %v2122_v21  ;;  %2153 = vst.msk [vmem:[%s3849_s7 + $0x30] sm:$0xff] %vm302_vm0, %v2121_v15 }
 0x4f1   : > { %v1993_v35 = vpop.permute.xlu1 %1992  ;;  %v1989_v46 = vpop.permute.xlu0 %1988 }
 0x4f2   : > { %v2124_v52 = vmul.f32 %v1993_v35, %v1916_v32  ;;  %v2123_v34 = vmul.f32 %v1989_v46, %v1915_v40  ;;  %v2527_v32 = vld [vmem:[%s2863_s9 + $0xc8] sm:$0xff]  ;;  %v2528_v40 = vld [vmem:[%s2863_s9 + $0xc0] sm:$0xff] }
 0x4f3   : > { %v1932_v56 = vmul.f32 %v2527_v32, %v3830_v36  ;;  %v1931_v35 = vmul.f32 %v2528_v40, %v3830_v36 }
 0x4f4   : > { %2156 = vst.msk [vmem:[%s3849_s7 + $0x48] sm:$0xff] %vm302_vm0, %v2124_v52  ;;  %2155 = vst.msk [vmem:[%s3849_s7 + $0x40] sm:$0xff] %vm302_vm0, %v2123_v34 }
 0x4f5   : > { %v2004_v44 = vpop.permute.xlu1 %2003  ;;  %v2000_v11 = vpop.permute.xlu0 %1999 }
 0x4f6   : > { %v2126_v27 = vmul.f32 %v2004_v44, %v1918_v39  ;;  %v2125_v23 = vmul.f32 %v2000_v11, %v1917_v49  ;;  %v2529_v39 = vld [vmem:[%s2863_s9 + $0xd8] sm:$0xff]  ;;  %v2530_v49 = vld [vmem:[%s2863_s9 + $0xd0] sm:$0xff] }
 0x4f7   : > { %v1934_v24 = vmul.f32 %v2529_v39, %v3830_v36  ;;  %v1933_v44 = vmul.f32 %v2530_v49, %v3830_v36 }
 0x4f8   : > { %2158 = vst.msk [vmem:[%s3849_s7 + $0x58] sm:$0xff] %vm302_vm0, %v2126_v27  ;;  %2157 = vst.msk [vmem:[%s3849_s7 + $0x50] sm:$0xff] %vm302_vm0, %v2125_v23 }
 0x4f9   : > { %v2015_v9 = vpop.permute.xlu1 %2014  ;;  %v2011_v3 = vpop.permute.xlu0 %2010 }
 0x4fa   : > { %v2128_v18 = vmul.f32 %v2015_v9, %v1920_v43  ;;  %v2127_v33 = vmul.f32 %v2011_v3, %v1919_v51  ;;  %v2531_v43 = vld [vmem:[%s2863_s9 + $0xe8] sm:$0xff]  ;;  %v2532_v51 = vld [vmem:[%s2863_s9 + $0xe0] sm:$0xff] }
 0x4fb   : > { %v1936_v7 = vmul.f32 %v2531_v43, %v3830_v36  ;;  %v1935_v9 = vmul.f32 %v2532_v51, %v3830_v36 }
 0x4fc   : > { %2160 = vst.msk [vmem:[%s3849_s7 + $0x68] sm:$0xff] %vm302_vm0, %v2128_v18  ;;  %2159 = vst.msk [vmem:[%s3849_s7 + $0x60] sm:$0xff] %vm302_vm0, %v2127_v33 }
 0x4fd   : > { %v2026_v50 = vpop.permute.xlu1 %2025  ;;  %v2022_v6 = vpop.permute.xlu0 %2021 }
 0x4fe   : > { %v2130_v16 = vmul.f32 %v2026_v50, %v1922_v48  ;;  %v2129_v47 = vmul.f32 %v2022_v6, %v1921_v29  ;;  %v2533_v48 = vld [vmem:[%s2863_s9 + $0xf8] sm:$0xff]  ;;  %v2534_v29 = vld [vmem:[%s2863_s9 + $0xf0] sm:$0xff]  ;;  %s2595_s9 = scalar_lea.vmem %s3974_s15, 4096 }
 0x4ff   : > { %v1938_v26 = vmul.f32 %v2533_v48, %v3830_v36  ;;  %v1937_v50 = vmul.f32 %v2534_v29, %v3830_v36  ;;  %p2596_p5 = scmp.ne.s32.totalorder %s3974_s15, %s2595_s9  ;;  %p2603_p12 = scmp.lt.s32.totalorder %s2601_s13, %s2595_s9 }
 0x500   : > { %2162 = vst.msk [vmem:[%s3849_s7 + $0x78] sm:$0xff] %vm302_vm0, %v2130_v16  ;;  %2161 = vst.msk [vmem:[%s3849_s7 + $0x70] sm:$0xff] %vm302_vm0, %v2129_v47 }
 0x501   : > { %v2037_v10 = vpop.permute.xlu1 %2036  ;;  %v2033_v0 = vpop.permute.xlu0 %2032  ;;  %p2597_p8 = pnand %p2596_p5, %p4056_p2  ;;  %p2604_p0 = por %p2603_p12, %p2602_p4 }
 0x502   : > { %v2132_v22 = vmul.f32 %v2037_v10, %v1924_v5  ;;  %v2131_v20 = vmul.f32 %v2033_v0, %v1923_v60 }
 0x503   : > { %p2598_p10 = pneg %p2597_p8 }
 0x504   : > { %2164 = vst.msk [vmem:[%s3849_s7 + $0x88] sm:$0xff] %vm302_vm0, %v2132_v22  ;;  %2163 = vst.msk [vmem:[%s3849_s7 + $0x80] sm:$0xff] %vm302_vm0, %v2131_v20 }
 0x505   : > { %v2048_v12 = vpop.permute.xlu1 %2047  ;;  %v2044_v8 = vpop.permute.xlu0 %2043  ;;  %p2605_p7 = pnand %p2604_p0, %p2598_p10 }
 0x506   : > { %v2134_v41 = vmul.f32 %v2048_v12, %v1926_v62  ;;  %v2133_v19 = vmul.f32 %v2044_v8, %v1925_v42 }
 0x508   : > { %2166 = vst.msk [vmem:[%s3849_s7 + $0x98] sm:$0xff] %vm302_vm0, %v2134_v41  ;;  %2165 = vst.msk [vmem:[%s3849_s7 + $0x90] sm:$0xff] %vm302_vm0, %v2133_v19 }
 0x509   : > { %v2059_v2 = vpop.permute.xlu1 %2058  ;;  %v2055_v61 = vpop.permute.xlu0 %2054 }
 0x50a   : > { %v2136_v59 = vmul.f32 %v2059_v2, %v1928_v58  ;;  %v2135_v17 = vmul.f32 %v2055_v61, %v1927_v14 }
 0x50c   : > { %2168 = vst.msk [vmem:[%s3849_s7 + $0xa8] sm:$0xff] %vm302_vm0, %v2136_v59  ;;  %2167 = vst.msk [vmem:[%s3849_s7 + $0xa0] sm:$0xff] %vm302_vm0, %v2135_v17 }
 0x50d   : > { %v2070_v53 = vpop.permute.xlu1 %2069  ;;  %v2066_v21 = vpop.permute.xlu0 %2065 }
 0x50e   : > { %v2138_v15 = vmul.f32 %v2070_v53, %v1930_v13  ;;  %v2137_v45 = vmul.f32 %v2066_v21, %v1929_v4 }
 0x510   : > { %2170 = vst.msk [vmem:[%s3849_s7 + $0xb8] sm:$0xff] %vm302_vm0, %v2138_v15  ;;  %2169 = vst.msk [vmem:[%s3849_s7 + $0xb0] sm:$0xff] %vm302_vm0, %v2137_v45 }
 0x511   : > { %v2081_v46 = vpop.permute.xlu1 %2080  ;;  %v2077_v52 = vpop.permute.xlu0 %2076 }
 0x512   : > { %v2140_v34 = vmul.f32 %v2081_v46, %v1932_v56  ;;  %v2139_v55 = vmul.f32 %v2077_v52, %v1931_v35 }
 0x514   : > { %2172 = vst.msk [vmem:[%s3849_s7 + $0xc8] sm:$0xff] %vm302_vm0, %v2140_v34  ;;  %2171 = vst.msk [vmem:[%s3849_s7 + $0xc0] sm:$0xff] %vm302_vm0, %v2139_v55 }
 0x515   : > { %v2092_v11 = vpop.permute.xlu1 %2091  ;;  %v2088_v27 = vpop.permute.xlu0 %2087 }
 0x516   : > { %v2142_v23 = vmul.f32 %v2092_v11, %v1934_v24  ;;  %v2141_v25 = vmul.f32 %v2088_v27, %v1933_v44 }
 0x518   : > { %2174 = vst.msk [vmem:[%s3849_s7 + $0xd8] sm:$0xff] %vm302_vm0, %v2142_v23  ;;  %2173 = vst.msk [vmem:[%s3849_s7 + $0xd0] sm:$0xff] %vm302_vm0, %v2141_v25 }
 0x519   : > { %v2103_v3 = vpop.permute.xlu1 %2102  ;;  %v2099_v18 = vpop.permute.xlu0 %2098 }
 0x51a   : > { %v2144_v33 = vmul.f32 %v2103_v3, %v1936_v7  ;;  %v2143_v28 = vmul.f32 %v2099_v18, %v1935_v9 }
 0x51c   : > { %2176 = vst.msk [vmem:[%s3849_s7 + $0xe8] sm:$0xff] %vm302_vm0, %v2144_v33  ;;  %2175 = vst.msk [vmem:[%s3849_s7 + $0xe0] sm:$0xff] %vm302_vm0, %v2143_v28 }
 0x51d   : > { %v2114_v6 = vpop.permute.xlu1 %2113  ;;  %v2110_v16 = vpop.permute.xlu0 %2109 }
 0x51e   : > { %v2146_v47 = vmul.f32 %v2114_v6, %v1938_v26  ;;  %v2145_v38 = vmul.f32 %v2110_v16, %v1937_v50 }
 0x520   : > { %2178 = vst.msk [vmem:[%s3849_s7 + $0xf8] sm:$0xff] %vm302_vm0, %v2146_v47  ;;  %2177 = vst.msk [vmem:[%s3849_s7 + $0xf0] sm:$0xff] %vm302_vm0, %v2145_v38 }
 0x521   : > { %2608 = shalt.err (!%p2605_p7)
}
 0x522   : > { %s2609_s11 = scalar_lea.hbm %s3972_s23, 4096  ;;  %s2613_s8 = scalar_lea.hbm %s4027_s5, 8192 }
 0x523   : > { %p2610_p11 = scmp.ne.s32.totalorder %s3972_s23, %s2609_s11  ;;  %p2614_p3 = scmp.lt.u32.totalorder %s3972_s23, %s4027_s5 }
 0x524   : > { %p2615_p9 = scmp.lt.u32.totalorder %s2613_s8, %s2609_s11  ;;  %p2617_p5 = scmp.lt.u32.totalorder %s2609_s11, %s3972_s23 }
 0x525   : > { %p2611_p13 = pnand %p2610_p11, %p4056_p2 }
 0x526   : > { %p2616_p1 = por %p2615_p9, %p2614_p3 }
 0x527   : > { %p2612_p6 = pneg %p2611_p13 }
 0x528   : > { %p2618_p8 = por %p2617_p5, %p2616_p1 }
 0x52a   : > { %p2619_p10 = pnand %p2618_p8, %p2612_p6 }
 0x52c   : > { %2622 = shalt.err (!%p2619_p10)
}
 0x52d   : > { %s2687_s26 = smov 128   ;;  %s2688_s12 = smov 8  }
 0x52e   : > { %2412 = dma.vmem_to_hbm [thread:$0]  (%p4056_p2), %s3974_s15, 4096, %s3972_s23, %s2180_s22, %s2687_s26, %s2687_s26, %s2688_s12  }
 0x52f PF: > { %s2208_s16 = sand.u32 1, %s2657_s18   ;;  %p4057_p4 = scmp.ne.s32.totalorder %s4040_s6, 0 }
 0x530   : > { %p4058_p12 = scmp.ge.s32.totalorder %s2669_s21, 2  ;;  %s2209_s9 = scalar_lea.sflag [#allocation5], %s2208_s16 }
 0x532   : > { %p2426_p0 = pnand %p4058_p12, %p4057_p4 }
 0x534   : > { %2652 = dma.done.wait (!%p2426_p0), %s2209_s9, 4096  }
 0x535   : > { %2654 = vsyncadd (!%p2426_p0), %s2209_s9, 4294963200  ;;  %p20_p7 = scmp.ge.s32.totalorder %s2744_s24, 4   ;;  %s4059_s18 = smov %s2661_s19 }
 0x536   : > { %s4060_s19 = smov %s2665_s20  ;;  %s4061_s20 = smov %s2756_s27 }
 0x537   : > { %s4062_s21 = smov %s2744_s24  ;;  %22 = sbr.rel (!%p20_p7) target bundleno = 7 (0x7), region = 95 }
 0x53e   :  { %2214 = vsyncpa [#allocation4], 1 }
 0x53f   :  { %2216 = vsyncpa [#allocation4 + $0x1], 1 }
 0x540   :  { %2217 = vsyncpa [#allocation5], 1 }
 0x541   :  { %2219 = vsyncpa [#allocation5 + $0x1], 1 }
 0x542   :  { %2220 = vsyncpa [#allocation6], 1 }
 0x543   :  { %2222 = vsyncpa [#allocation6 + $0x1], 1 }
 0x544   :  { %2223 = vsyncpa [#allocation9], 1 }

</bundles_post_ra>
